<compile_context>
chip_gen: v6e
topology: v6e:2x2x1
jax: 0.10.0
libtpu: 0.0.40
codegen_flags: <defaults>
</compile_context>

<pallas_src>
import functools

import numpy as np
import jax
import jax.numpy as jnp
from jax.experimental import pallas as pl
from jax.experimental.pallas import tpu as pltpu

BN_EPS = 1e-5


# ----------------------------------------------------------------------------
# Fused kernel: deconv2 + relu + bn1  ->  deconv1 + relu   (one image per step)
# ----------------------------------------------------------------------------
def _make_block_kernel(stride):
    taps_l2 = 3 if stride == 1 else 2     # layer-2 tap-grid extent (3x3 or 2x2)
    off = 1 if stride == 1 else 0         # where layer-1 result sits in the scratch

    def kernel(x_ref, w2_ref, s1_ref, b1_ref, w1_ref, o_ref, y_ref):
        # x_ref : (1, H+2, W+2, C) bf16  bn2-applied, zero-padded input canvas
        # w2_ref: (9, C, C)        bf16  conv2 taps (flipped ConvTranspose weights)
        # s1_ref, b1_ref: (1, C)   f32   bn1 fused into layer-1 epilogue
        # w1_ref: (T, C, P)        bf16  conv1 taps; T=9,P=cout (s=1) or T=4,P=4*cout (s=2)
        # o_ref : (1, H, W, P)     f32
        # y_ref : VMEM scratch (H+halo, W+halo, C) bf16: layer-1 output + zero halo
        h = x_ref.shape[1] - 2
        w = x_ref.shape[2] - 2
        cin = x_ref.shape[3]
        p = w1_ref.shape[2]

        # ---- layer 1: deconv2 (stride-1 == SAME 3x3 conv) + relu + bn1 ----------
        acc = jnp.zeros((h * w, cin), jnp.float32)
        for t in range(9):                                  # taps gathered in VMEM
            kh, kw = divmod(t, 3)
            a = x_ref[0, kh:kh + h, kw:kw + w, :].reshape(h * w, cin)
            acc = acc + jnp.dot(a, w2_ref[t], preferred_element_type=jnp.float32)
        y = jnp.maximum(acc, 0.0) * s1_ref[0] + b1_ref[0]   # relu, then bn1
        y_ref[...] = jnp.zeros_like(y_ref)                  # zero halo for layer 2
        y_ref[off:off + h, off:off + w, :] = (
            y.reshape(h, w, cin).astype(y_ref.dtype))

        # ---- layer 2: deconv1 (+ relu) ------------------------------------------
        acc2 = jnp.zeros((h * w, p), jnp.float32)
        for t in range(taps_l2 * taps_l2):
            dh, dw = divmod(t, taps_l2)
            a = y_ref[dh:dh + h, dw:dw + w, :].reshape(h * w, cin)
            acc2 = acc2 + jnp.dot(a, w1_ref[t], preferred_element_type=jnp.float32)
        o_ref[...] = jnp.maximum(acc2, 0.0).reshape(1, h, w, p).astype(o_ref.dtype)

    return kernel


def _fused_block_call(canvas, w2, s1, b1, w1, *, stride):
    n, hp2, wp2, cin = canvas.shape
    h, w = hp2 - 2, wp2 - 2
    p = w1.shape[2]
    halo = 2 if stride == 1 else 1
    kernel = _make_block_kernel(stride)
    return pl.pallas_call(
        kernel,
        out_shape=jax.ShapeDtypeStruct((n, h, w, p), jnp.float32),
        grid_spec=pltpu.PrefetchScalarGridSpec(
            num_scalar_prefetch=0,
            grid=(n,),
            in_specs=[
                pl.BlockSpec((1, hp2, wp2, cin), lambda i: (i, 0, 0, 0)),
                pl.BlockSpec(w2.shape, lambda i: (0, 0, 0)),
                pl.BlockSpec(s1.shape, lambda i: (0, 0)),
                pl.BlockSpec(b1.shape, lambda i: (0, 0)),
                pl.BlockSpec(w1.shape, lambda i: (0, 0, 0)),
            ],
            out_specs=pl.BlockSpec((1, h, w, p), lambda i: (i, 0, 0, 0)),
            scratch_shapes=[pltpu.VMEM((h + halo, w + halo, cin), jnp.bfloat16)],
        ),
        # Per-step VMEM footprint is tens of KiB at these shapes; default limits are
        # ample on v5e/v6e/v7x, so no vmem_limit_bytes override is needed.
        compiler_params=pltpu.CompilerParams(
            dimension_semantics=("parallel",)),
    )(canvas, w2, s1, b1, w1)


# ----------------------------------------------------------------------------
# Parameters: raw (PyTorch layout) + one-time preprocessing for the Pallas path
# ----------------------------------------------------------------------------
def init_block_params(key, cin, cout):
    """Deterministic synthetic init matching the PyTorch module.
    ConvTranspose2d weight layout: (in_channels, out_channels, kH, kW)."""
    kw2, kb2, kw1, kb1 = jax.random.split(key, 4)

    def bn_params(k, c):
        kg, kb, km, kv = jax.random.split(k, 4)
        return {
            "gamma": 1.0 + 0.1 * jax.random.normal(kg, (c,), jnp.float32),
            "beta": 0.1 * jax.random.normal(kb, (c,), jnp.float32),
            "mean": 0.1 * jax.random.normal(km, (c,), jnp.float32),
            "var": 1.0 + 0.1 * jax.random.uniform(kv, (c,), jnp.float32),
        }

    def deconv_w(k, ci, co):
        return (jax.random.normal(k, (ci, co, 3, 3), jnp.float32)
                * np.sqrt(2.0 / (9 * ci)))

    return {
        "bn2": bn_params(kb2, cin), "wt2": deconv_w(kw2, cin, cin),
        "bn1": bn_params(kb1, cin), "wt1": deconv_w(kw1, cin, cout),
    }


def prepare_block_params(raw, stride):
    """One-time, input-independent preprocessing: fold BN, flip + tap-pack weights."""
    def fold_bn(p):
        s = p["gamma"] / jnp.sqrt(p["var"] + BN_EPS)
        return s, p["beta"] - p["mean"] * s

    s2, b2 = fold_bn(raw["bn2"])
    s1, b1 = fold_bn(raw["bn1"])

    wt2 = np.asarray(raw["wt2"])               # (cin, cin, 3, 3) ConvTranspose layout
    cin = wt2.shape[0]
    # stride-1 ConvTranspose == SAME 3x3 conv with the spatially flipped kernel:
    # tap (kh, kw) multiplies the input shifted by (kh-1, kw-1) with W[:, :, 2-kh, 2-kw].
    w2_taps = np.transpose(wt2[:, :, ::-1, ::-1], (2, 3, 0, 1)).reshape(9, cin, cin)

    wt1 = np.asarray(raw["wt1"])               # (cin, cout, 3, 3)
    cout = wt1.shape[1]
    if stride == 1:
        w1_taps = np.transpose(wt1[:, :, ::-1, ::-1], (2, 3, 0, 1)).reshape(9, cin, cout)
    elif stride == 2:
        # Sub-pixel decomposition of ConvTranspose2d(k=3, s=2, p=1, op=1):
        # output pixel (2*ph+rh, 2*pw+rw) only sees inputs (ph+dh, pw+dw), dh/dw in
        # {0,1}.  Pack the 4 phases (rh, rw) on the output-channel (lane) axis; each
        # of the 4 taps carries the kernel entries feeding the phases it can reach.
        w1_taps = np.zeros((4, cin, 4, cout), np.float32)  # (tap=dh*2+dw, ci, phase=rh*2+rw, co)
        w1_taps[0, :, 0] = wt1[:, :, 1, 1]   # tap (0,0) -> phase (0,0)
        w1_taps[0, :, 1] = wt1[:, :, 1, 2]   # tap (0,0) -> phase (0,1)
        w1_taps[0, :, 2] = wt1[:, :, 2, 1]   # tap (0,0) -> phase (1,0)
        w1_taps[0, :, 3] = wt1[:, :, 2, 2]   # tap (0,0) -> phase (1,1)
        w1_taps[1, :, 1] = wt1[:, :, 1, 0]   # tap (0,1) -> phase (0,1)
        w1_taps[1, :, 3] = wt1[:, :, 2, 0]   # tap (0,1) -> phase (1,1)
        w1_taps[2, :, 2] = wt1[:, :, 0, 1]   # tap (1,0) -> phase (1,0)
        w1_taps[2, :, 3] = wt1[:, :, 0, 2]   # tap (1,0) -> phase (1,1)
        w1_taps[3, :, 3] = wt1[:, :, 0, 0]   # tap (1,1) -> phase (1,1)
        w1_taps = w1_taps.reshape(4, cin, 4 * cout)
    else:
        raise NotImplementedError("stride must be 1 or 2")

    return {
        "s2": s2, "b2": b2,                                    # bn2: applied pre-canvas
        "s1": s1.reshape(1, cin).astype(jnp.float32),          # bn1: fused kernel epilogue
        "b1": b1.reshape(1, cin).astype(jnp.float32),
        "w2": jnp.asarray(w2_taps, jnp.bfloat16),
        "w1": jnp.asarray(w1_taps, jnp.bfloat16),
    }


# ----------------------------------------------------------------------------
# Forward pass (Pallas) and pure-JAX f32 reference
# ----------------------------------------------------------------------------
@functools.partial(jax.jit, static_argnames=("stride",))
def deconv_block_forward(params, x_nchw, *, stride):
    """deconvBasicBlock.forward: bn2 -> deconv2(s=1) -> relu -> bn1 ->
    deconv1(s=stride) -> relu.  No residual add (matches the reference code)."""
    n, cin, h, w = x_nchw.shape
    # NCHW -> NHWC, bn2 affine, SAME zero-pad, bf16 cast: one fused XLA pass.
    x = jnp.transpose(x_nchw, (0, 2, 3, 1)) * params["s2"] + params["b2"]
    canvas = jnp.pad(x.astype(jnp.bfloat16), ((0, 0), (1, 1), (1, 1), (0, 0)))
    z = _fused_block_call(canvas, params["w2"], params["s1"], params["b1"],
                          params["w1"], stride=stride)
    if stride == 1:
        return jnp.transpose(z, (0, 3, 1, 2))                  # (n, cout, h, w)
    # stride == 2: pixel shuffle (phase unpack) fused into the NHWC->NCHW transpose.
    cout = z.shape[3] // 4
    z = z.reshape(n, h, w, 2, 2, cout)                         # (..., rh, rw, co)
    return jnp.transpose(z, (0, 5, 1, 3, 2, 4)).reshape(n, cout, 2 * h, 2 * w)


def deconv_block_reference(raw, x_nchw, stride):
    def bn(x, p):
        s = p["gamma"] / jnp.sqrt(p["var"] + BN_EPS)
        b = p["beta"] - p["mean"] * s
        return x * s[None, :, None, None] + b[None, :, None, None]

    def deconv(x, wt, s):
        # ConvTranspose2d(k=3, stride=s, padding=1, output_padding=s-1, bias=False)
        w_conv = jnp.transpose(wt[:, :, ::-1, ::-1], (1, 0, 2, 3))   # -> OIHW
        return jax.lax.conv_general_dilated(
            x, w_conv, window_strides=(1, 1),
            padding=[(1, s), (1, s)], lhs_dilation=(s, s),
            dimension_numbers=("NCHW", "OIHW", "NCHW"))

    out = bn(x_nchw, raw["bn2"])
    out = deconv(out, raw["wt2"], 1)
    out = jnp.maximum(out, 0.0)
    out = bn(out, raw["bn1"])
    out = deconv(out, raw["wt1"], stride)
    out = jnp.maximum(out, 0.0)
    return out


if __name__ == "__main__":
    key = jax.random.PRNGKey(0)
    pkey, xkey = jax.random.split(key)
    cin, cout = 32, 16
    n, h, w = 2, 16, 16

    raw = init_block_params(pkey, cin, cout)
    x = jax.random.normal(xkey, (n, cin, h, w), jnp.float32)

    # stride=2 block: the upsampling (sub-pixel) path.
    params_s2 = prepare_block_params(raw, stride=2)
    out_s2 = jax.block_until_ready(deconv_block_forward(params_s2, x, stride=2))
    assert out_s2.shape == (n, cout, 2 * h, 2 * w), out_s2.shape
    ref_s2 = jax.block_until_ready(deconv_block_reference(raw, x, 2))
    # bf16 MXU operands + bf16 VMEM-resident intermediate vs. the all-f32 reference.
    np.testing.assert_allclose(np.asarray(out_s2), np.asarray(ref_s2),
                               rtol=2e-2, atol=3e-2)

    # stride=1 block: the module's default configuration.
    params_s1 = prepare_block_params(raw, stride=1)
    out_s1 = jax.block_until_ready(deconv_block_forward(params_s1, x, stride=1))
    assert out_s1.shape == (n, cout, h, w), out_s1.shape
    ref_s1 = jax.block_until_ready(deconv_block_reference(raw, x, 1))
    np.testing.assert_allclose(np.asarray(out_s1), np.asarray(ref_s1),
                               rtol=2e-2, atol=3e-2)

    print("KERNEL_OK")
</pallas_src>

<mosaic_0001>
module attributes {stable_mosaic.version = 11 : i64} {
  func.func @kernel(%arg0: i32, %arg1: memref<1x18x18x32xbf16, #tpu.memory_space<vmem>>, %arg2: memref<9x32x32xbf16, #tpu.memory_space<vmem>>, %arg3: memref<1x32xf32, #tpu.memory_space<vmem>>, %arg4: memref<1x32xf32, #tpu.memory_space<vmem>>, %arg5: memref<4x32x64xbf16, #tpu.memory_space<vmem>>, %arg6: memref<1x16x16x64xf32, #tpu.memory_space<vmem>>, %arg7: memref<17x17x32xbf16, #tpu.memory_space<vmem>>) attributes {dimension_semantics = [#tpu.dimension_semantics<parallel>], iteration_bounds = array<i64: 2>, scalar_prefetch = 0 : i64, scratch_operands = 1 : i64, tpu.core_type = #tpu.core_type<tc>, window_params = [{transform_indices = @transform_0, window_bounds = array<i64: 1, 18, 18, 32>}, {pipeline_mode = #tpu.pipeline_mode<synchronous>, transform_indices = @transform_1, window_bounds = array<i64: 9, 32, 32>}, {pipeline_mode = #tpu.pipeline_mode<synchronous>, transform_indices = @transform_2, window_bounds = array<i64: 1, 32>}, {pipeline_mode = #tpu.pipeline_mode<synchronous>, transform_indices = @transform_3, window_bounds = array<i64: 1, 32>}, {pipeline_mode = #tpu.pipeline_mode<synchronous>, transform_indices = @transform_4, window_bounds = array<i64: 4, 32, 64>}, {transform_indices = @transform_5, window_bounds = array<i64: 1, 16, 16, 64>}]} {
    %cst = arith.constant 0.000000e+00 : f32
    %0 = vector.broadcast %cst : f32 to vector<256x32xf32>
    %c0 = arith.constant 0 : index
    %c0_0 = arith.constant 0 : index
    %c0_1 = arith.constant 0 : index
    %c0_2 = arith.constant 0 : index
    %1 = vector.load %arg1[%c0, %c0_0, %c0_1, %c0_2] : memref<1x18x18x32xbf16, #tpu.memory_space<vmem>>, vector<1x16x16x32xbf16>
    %2 = vector.shape_cast %1 : vector<1x16x16x32xbf16> to vector<16x16x32xbf16>
    %3 = vector.shape_cast %2 : vector<16x16x32xbf16> to vector<256x32xbf16>
    %c0_3 = arith.constant 0 : index
    %c0_4 = arith.constant 0 : index
    %c0_5 = arith.constant 0 : index
    %4 = vector.load %arg2[%c0_3, %c0_4, %c0_5] : memref<9x32x32xbf16, #tpu.memory_space<vmem>>, vector<1x32x32xbf16>
    %5 = vector.shape_cast %4 : vector<1x32x32xbf16> to vector<32x32xbf16>
    %cst_6 = arith.constant dense<0.000000e+00> : vector<256x32xf32>
    %6 = tpu.matmul %3, %5, %cst_6 {dimension_numbers = #tpu.dot_dimension_numbers<[1], [0], [0], [1], [0, 0, 1, 1], [], []>} : vector<256x32xbf16>, vector<32x32xbf16>, vector<256x32xf32> -> vector<256x32xf32>
    %7 = arith.addf %0, %6 : vector<256x32xf32>
    %c0_7 = arith.constant 0 : index
    %c0_8 = arith.constant 0 : index
    %c1 = arith.constant 1 : index
    %c0_9 = arith.constant 0 : index
    %8 = vector.load %arg1[%c0_7, %c0_8, %c1, %c0_9] : memref<1x18x18x32xbf16, #tpu.memory_space<vmem>>, vector<1x16x16x32xbf16>
    %9 = vector.shape_cast %8 : vector<1x16x16x32xbf16> to vector<16x16x32xbf16>
    %10 = vector.shape_cast %9 : vector<16x16x32xbf16> to vector<256x32xbf16>
    %c1_10 = arith.constant 1 : index
    %c0_11 = arith.constant 0 : index
    %c0_12 = arith.constant 0 : index
    %11 = vector.load %arg2[%c1_10, %c0_11, %c0_12] : memref<9x32x32xbf16, #tpu.memory_space<vmem>>, vector<1x32x32xbf16>
    %12 = vector.shape_cast %11 : vector<1x32x32xbf16> to vector<32x32xbf16>
    %cst_13 = arith.constant dense<0.000000e+00> : vector<256x32xf32>
    %13 = tpu.matmul %10, %12, %cst_13 {dimension_numbers = #tpu.dot_dimension_numbers<[1], [0], [0], [1], [0, 0, 1, 1], [], []>} : vector<256x32xbf16>, vector<32x32xbf16>, vector<256x32xf32> -> vector<256x32xf32>
    %14 = arith.addf %7, %13 : vector<256x32xf32>
    %c0_14 = arith.constant 0 : index
    %c0_15 = arith.constant 0 : index
    %c2 = arith.constant 2 : index
    %c0_16 = arith.constant 0 : index
    %15 = vector.load %arg1[%c0_14, %c0_15, %c2, %c0_16] : memref<1x18x18x32xbf16, #tpu.memory_space<vmem>>, vector<1x16x16x32xbf16>
    %16 = vector.shape_cast %15 : vector<1x16x16x32xbf16> to vector<16x16x32xbf16>
    %17 = vector.shape_cast %16 : vector<16x16x32xbf16> to vector<256x32xbf16>
    %c2_17 = arith.constant 2 : index
    %c0_18 = arith.constant 0 : index
    %c0_19 = arith.constant 0 : index
    %18 = vector.load %arg2[%c2_17, %c0_18, %c0_19] : memref<9x32x32xbf16, #tpu.memory_space<vmem>>, vector<1x32x32xbf16>
    %19 = vector.shape_cast %18 : vector<1x32x32xbf16> to vector<32x32xbf16>
    %cst_20 = arith.constant dense<0.000000e+00> : vector<256x32xf32>
    %20 = tpu.matmul %17, %19, %cst_20 {dimension_numbers = #tpu.dot_dimension_numbers<[1], [0], [0], [1], [0, 0, 1, 1], [], []>} : vector<256x32xbf16>, vector<32x32xbf16>, vector<256x32xf32> -> vector<256x32xf32>
    %21 = arith.addf %14, %20 : vector<256x32xf32>
    %c0_21 = arith.constant 0 : index
    %c1_22 = arith.constant 1 : index
    %c0_23 = arith.constant 0 : index
    %c0_24 = arith.constant 0 : index
    %22 = vector.load %arg1[%c0_21, %c1_22, %c0_23, %c0_24] : memref<1x18x18x32xbf16, #tpu.memory_space<vmem>>, vector<1x16x16x32xbf16>
    %23 = vector.shape_cast %22 : vector<1x16x16x32xbf16> to vector<16x16x32xbf16>
    %24 = vector.shape_cast %23 : vector<16x16x32xbf16> to vector<256x32xbf16>
    %c3 = arith.constant 3 : index
    %c0_25 = arith.constant 0 : index
    %c0_26 = arith.constant 0 : index
    %25 = vector.load %arg2[%c3, %c0_25, %c0_26] : memref<9x32x32xbf16, #tpu.memory_space<vmem>>, vector<1x32x32xbf16>
    %26 = vector.shape_cast %25 : vector<1x32x32xbf16> to vector<32x32xbf16>
    %cst_27 = arith.constant dense<0.000000e+00> : vector<256x32xf32>
    %27 = tpu.matmul %24, %26, %cst_27 {dimension_numbers = #tpu.dot_dimension_numbers<[1], [0], [0], [1], [0, 0, 1, 1], [], []>} : vector<256x32xbf16>, vector<32x32xbf16>, vector<256x32xf32> -> vector<256x32xf32>
    %28 = arith.addf %21, %27 : vector<256x32xf32>
    %c0_28 = arith.constant 0 : index
    %c1_29 = arith.constant 1 : index
    %c1_30 = arith.constant 1 : index
    %c0_31 = arith.constant 0 : index
    %29 = vector.load %arg1[%c0_28, %c1_29, %c1_30, %c0_31] : memref<1x18x18x32xbf16, #tpu.memory_space<vmem>>, vector<1x16x16x32xbf16>
    %30 = vector.shape_cast %29 : vector<1x16x16x32xbf16> to vector<16x16x32xbf16>
    %31 = vector.shape_cast %30 : vector<16x16x32xbf16> to vector<256x32xbf16>
    %c4 = arith.constant 4 : index
    %c0_32 = arith.constant 0 : index
    %c0_33 = arith.constant 0 : index
    %32 = vector.load %arg2[%c4, %c0_32, %c0_33] : memref<9x32x32xbf16, #tpu.memory_space<vmem>>, vector<1x32x32xbf16>
    %33 = vector.shape_cast %32 : vector<1x32x32xbf16> to vector<32x32xbf16>
    %cst_34 = arith.constant dense<0.000000e+00> : vector<256x32xf32>
    %34 = tpu.matmul %31, %33, %cst_34 {dimension_numbers = #tpu.dot_dimension_numbers<[1], [0], [0], [1], [0, 0, 1, 1], [], []>} : vector<256x32xbf16>, vector<32x32xbf16>, vector<256x32xf32> -> vector<256x32xf32>
    %35 = arith.addf %28, %34 : vector<256x32xf32>
    %c0_35 = arith.constant 0 : index
    %c1_36 = arith.constant 1 : index
    %c2_37 = arith.constant 2 : index
    %c0_38 = arith.constant 0 : index
    %36 = vector.load %arg1[%c0_35, %c1_36, %c2_37, %c0_38] : memref<1x18x18x32xbf16, #tpu.memory_space<vmem>>, vector<1x16x16x32xbf16>
    %37 = vector.shape_cast %36 : vector<1x16x16x32xbf16> to vector<16x16x32xbf16>
    %38 = vector.shape_cast %37 : vector<16x16x32xbf16> to vector<256x32xbf16>
    %c5 = arith.constant 5 : index
    %c0_39 = arith.constant 0 : index
    %c0_40 = arith.constant 0 : index
    %39 = vector.load %arg2[%c5, %c0_39, %c0_40] : memref<9x32x32xbf16, #tpu.memory_space<vmem>>, vector<1x32x32xbf16>
    %40 = vector.shape_cast %39 : vector<1x32x32xbf16> to vector<32x32xbf16>
    %cst_41 = arith.constant dense<0.000000e+00> : vector<256x32xf32>
    %41 = tpu.matmul %38, %40, %cst_41 {dimension_numbers = #tpu.dot_dimension_numbers<[1], [0], [0], [1], [0, 0, 1, 1], [], []>} : vector<256x32xbf16>, vector<32x32xbf16>, vector<256x32xf32> -> vector<256x32xf32>
    %42 = arith.addf %35, %41 : vector<256x32xf32>
    %c0_42 = arith.constant 0 : index
    %c2_43 = arith.constant 2 : index
    %c0_44 = arith.constant 0 : index
    %c0_45 = arith.constant 0 : index
    %43 = vector.load %arg1[%c0_42, %c2_43, %c0_44, %c0_45] : memref<1x18x18x32xbf16, #tpu.memory_space<vmem>>, vector<1x16x16x32xbf16>
    %44 = vector.shape_cast %43 : vector<1x16x16x32xbf16> to vector<16x16x32xbf16>
    %45 = vector.shape_cast %44 : vector<16x16x32xbf16> to vector<256x32xbf16>
    %c6 = arith.constant 6 : index
    %c0_46 = arith.constant 0 : index
    %c0_47 = arith.constant 0 : index
    %46 = vector.load %arg2[%c6, %c0_46, %c0_47] : memref<9x32x32xbf16, #tpu.memory_space<vmem>>, vector<1x32x32xbf16>
    %47 = vector.shape_cast %46 : vector<1x32x32xbf16> to vector<32x32xbf16>
    %cst_48 = arith.constant dense<0.000000e+00> : vector<256x32xf32>
    %48 = tpu.matmul %45, %47, %cst_48 {dimension_numbers = #tpu.dot_dimension_numbers<[1], [0], [0], [1], [0, 0, 1, 1], [], []>} : vector<256x32xbf16>, vector<32x32xbf16>, vector<256x32xf32> -> vector<256x32xf32>
    %49 = arith.addf %42, %48 : vector<256x32xf32>
    %c0_49 = arith.constant 0 : index
    %c2_50 = arith.constant 2 : index
    %c1_51 = arith.constant 1 : index
    %c0_52 = arith.constant 0 : index
    %50 = vector.load %arg1[%c0_49, %c2_50, %c1_51, %c0_52] : memref<1x18x18x32xbf16, #tpu.memory_space<vmem>>, vector<1x16x16x32xbf16>
    %51 = vector.shape_cast %50 : vector<1x16x16x32xbf16> to vector<16x16x32xbf16>
    %52 = vector.shape_cast %51 : vector<16x16x32xbf16> to vector<256x32xbf16>
    %c7 = arith.constant 7 : index
    %c0_53 = arith.constant 0 : index
    %c0_54 = arith.constant 0 : index
    %53 = vector.load %arg2[%c7, %c0_53, %c0_54] : memref<9x32x32xbf16, #tpu.memory_space<vmem>>, vector<1x32x32xbf16>
    %54 = vector.shape_cast %53 : vector<1x32x32xbf16> to vector<32x32xbf16>
    %cst_55 = arith.constant dense<0.000000e+00> : vector<256x32xf32>
    %55 = tpu.matmul %52, %54, %cst_55 {dimension_numbers = #tpu.dot_dimension_numbers<[1], [0], [0], [1], [0, 0, 1, 1], [], []>} : vector<256x32xbf16>, vector<32x32xbf16>, vector<256x32xf32> -> vector<256x32xf32>
    %56 = arith.addf %49, %55 : vector<256x32xf32>
    %c0_56 = arith.constant 0 : index
    %c2_57 = arith.constant 2 : index
    %c2_58 = arith.constant 2 : index
    %c0_59 = arith.constant 0 : index
    %57 = vector.load %arg1[%c0_56, %c2_57, %c2_58, %c0_59] : memref<1x18x18x32xbf16, #tpu.memory_space<vmem>>, vector<1x16x16x32xbf16>
    %58 = vector.shape_cast %57 : vector<1x16x16x32xbf16> to vector<16x16x32xbf16>
    %59 = vector.shape_cast %58 : vector<16x16x32xbf16> to vector<256x32xbf16>
    %c8 = arith.constant 8 : index
    %c0_60 = arith.constant 0 : index
    %c0_61 = arith.constant 0 : index
    %60 = vector.load %arg2[%c8, %c0_60, %c0_61] : memref<9x32x32xbf16, #tpu.memory_space<vmem>>, vector<1x32x32xbf16>
    %61 = vector.shape_cast %60 : vector<1x32x32xbf16> to vector<32x32xbf16>
    %cst_62 = arith.constant dense<0.000000e+00> : vector<256x32xf32>
    %62 = tpu.matmul %59, %61, %cst_62 {dimension_numbers = #tpu.dot_dimension_numbers<[1], [0], [0], [1], [0, 0, 1, 1], [], []>} : vector<256x32xbf16>, vector<32x32xbf16>, vector<256x32xf32> -> vector<256x32xf32>
    %63 = arith.addf %56, %62 : vector<256x32xf32>
    %cst_63 = arith.constant 0.000000e+00 : f32
    %64 = vector.broadcast %cst_63 : f32 to vector<256x32xf32>
    %65 = arith.maximumf %63, %64 : vector<256x32xf32>
    %c0_64 = arith.constant 0 : index
    %c0_65 = arith.constant 0 : index
    %66 = vector.load %arg3[%c0_64, %c0_65] : memref<1x32xf32, #tpu.memory_space<vmem>>, vector<1x32xf32>
    %67 = vector.shape_cast %66 : vector<1x32xf32> to vector<32xf32>
    %68 = vector.shape_cast %67 : vector<32xf32> to vector<1x32xf32>
    %69 = vector.broadcast %68 : vector<1x32xf32> to vector<256x32xf32>
    %70 = arith.mulf %65, %69 : vector<256x32xf32>
    %c0_66 = arith.constant 0 : index
    %c0_67 = arith.constant 0 : index
    %71 = vector.load %arg4[%c0_66, %c0_67] : memref<1x32xf32, #tpu.memory_space<vmem>>, vector<1x32xf32>
    %72 = vector.shape_cast %71 : vector<1x32xf32> to vector<32xf32>
    %73 = vector.shape_cast %72 : vector<32xf32> to vector<1x32xf32>
    %74 = vector.broadcast %73 : vector<1x32xf32> to vector<256x32xf32>
    %75 = arith.addf %70, %74 : vector<256x32xf32>
    %cst_68 = arith.constant 0.000000e+00 : bf16
    %76 = vector.broadcast %cst_68 : bf16 to vector<17x17x32xbf16>
    %c0_69 = arith.constant 0 : index
    %c0_70 = arith.constant 0 : index
    %c0_71 = arith.constant 0 : index
    %77 = vector.load %arg7[%c0_69, %c0_70, %c0_71] : memref<17x17x32xbf16, #tpu.memory_space<vmem>>, vector<17x17x32xbf16>
    tpu.vector_store %arg7[%c0_69, %c0_70, %c0_71], %76 {strides = array<i32>} : memref<17x17x32xbf16, #tpu.memory_space<vmem>>, vector<17x17x32xbf16>,
    %78 = vector.shape_cast %75 : vector<256x32xf32> to vector<16x16x32xf32>
    %79 = arith.truncf %78 : vector<16x16x32xf32> to vector<16x16x32xbf16>
    %c0_72 = arith.constant 0 : index
    %c0_73 = arith.constant 0 : index
    %c0_74 = arith.constant 0 : index
    %80 = vector.load %arg7[%c0_72, %c0_73, %c0_74] : memref<17x17x32xbf16, #tpu.memory_space<vmem>>, vector<16x16x32xbf16>
    tpu.vector_store %arg7[%c0_72, %c0_73, %c0_74], %79 {strides = array<i32>} : memref<17x17x32xbf16, #tpu.memory_space<vmem>>, vector<16x16x32xbf16>,
    %cst_75 = arith.constant 0.000000e+00 : f32
    %81 = vector.broadcast %cst_75 : f32 to vector<256x64xf32>
    %c0_76 = arith.constant 0 : index
    %c0_77 = arith.constant 0 : index
    %c0_78 = arith.constant 0 : index
    %82 = vector.load %arg7[%c0_76, %c0_77, %c0_78] : memref<17x17x32xbf16, #tpu.memory_space<vmem>>, vector<16x16x32xbf16>
    %83 = vector.shape_cast %82 : vector<16x16x32xbf16> to vector<256x32xbf16>
    %c0_79 = arith.constant 0 : index
    %c0_80 = arith.constant 0 : index
    %c0_81 = arith.constant 0 : index
    %84 = vector.load %arg5[%c0_79, %c0_80, %c0_81] : memref<4x32x64xbf16, #tpu.memory_space<vmem>>, vector<1x32x64xbf16>
    %85 = vector.shape_cast %84 : vector<1x32x64xbf16> to vector<32x64xbf16>
    %cst_82 = arith.constant dense<0.000000e+00> : vector<256x64xf32>
    %86 = tpu.matmul %83, %85, %cst_82 {dimension_numbers = #tpu.dot_dimension_numbers<[1], [0], [0], [1], [0, 0, 1, 1], [], []>} : vector<256x32xbf16>, vector<32x64xbf16>, vector<256x64xf32> -> vector<256x64xf32>
    %87 = arith.addf %81, %86 : vector<256x64xf32>
    %c0_83 = arith.constant 0 : index
    %c1_84 = arith.constant 1 : index
    %c0_85 = arith.constant 0 : index
    %88 = vector.load %arg7[%c0_83, %c1_84, %c0_85] : memref<17x17x32xbf16, #tpu.memory_space<vmem>>, vector<16x16x32xbf16>
    %89 = vector.shape_cast %88 : vector<16x16x32xbf16> to vector<256x32xbf16>
    %c1_86 = arith.constant 1 : index
    %c0_87 = arith.constant 0 : index
    %c0_88 = arith.constant 0 : index
    %90 = vector.load %arg5[%c1_86, %c0_87, %c0_88] : memref<4x32x64xbf16, #tpu.memory_space<vmem>>, vector<1x32x64xbf16>
    %91 = vector.shape_cast %90 : vector<1x32x64xbf16> to vector<32x64xbf16>
    %cst_89 = arith.constant dense<0.000000e+00> : vector<256x64xf32>
    %92 = tpu.matmul %89, %91, %cst_89 {dimension_numbers = #tpu.dot_dimension_numbers<[1], [0], [0], [1], [0, 0, 1, 1], [], []>} : vector<256x32xbf16>, vector<32x64xbf16>, vector<256x64xf32> -> vector<256x64xf32>
    %93 = arith.addf %87, %92 : vector<256x64xf32>
    %c1_90 = arith.constant 1 : index
    %c0_91 = arith.constant 0 : index
    %c0_92 = arith.constant 0 : index
    %94 = vector.load %arg7[%c1_90, %c0_91, %c0_92] : memref<17x17x32xbf16, #tpu.memory_space<vmem>>, vector<16x16x32xbf16>
    %95 = vector.shape_cast %94 : vector<16x16x32xbf16> to vector<256x32xbf16>
    %c2_93 = arith.constant 2 : index
    %c0_94 = arith.constant 0 : index
    %c0_95 = arith.constant 0 : index
    %96 = vector.load %arg5[%c2_93, %c0_94, %c0_95] : memref<4x32x64xbf16, #tpu.memory_space<vmem>>, vector<1x32x64xbf16>
    %97 = vector.shape_cast %96 : vector<1x32x64xbf16> to vector<32x64xbf16>
    %cst_96 = arith.constant dense<0.000000e+00> : vector<256x64xf32>
    %98 = tpu.matmul %95, %97, %cst_96 {dimension_numbers = #tpu.dot_dimension_numbers<[1], [0], [0], [1], [0, 0, 1, 1], [], []>} : vector<256x32xbf16>, vector<32x64xbf16>, vector<256x64xf32> -> vector<256x64xf32>
    %99 = arith.addf %93, %98 : vector<256x64xf32>
    %c1_97 = arith.constant 1 : index
    %c1_98 = arith.constant 1 : index
    %c0_99 = arith.constant 0 : index
    %100 = vector.load %arg7[%c1_97, %c1_98, %c0_99] : memref<17x17x32xbf16, #tpu.memory_space<vmem>>, vector<16x16x32xbf16>
    %101 = vector.shape_cast %100 : vector<16x16x32xbf16> to vector<256x32xbf16>
    %c3_100 = arith.constant 3 : index
    %c0_101 = arith.constant 0 : index
    %c0_102 = arith.constant 0 : index
    %102 = vector.load %arg5[%c3_100, %c0_101, %c0_102] : memref<4x32x64xbf16, #tpu.memory_space<vmem>>, vector<1x32x64xbf16>
    %103 = vector.shape_cast %102 : vector<1x32x64xbf16> to vector<32x64xbf16>
    %cst_103 = arith.constant dense<0.000000e+00> : vector<256x64xf32>
    %104 = tpu.matmul %101, %103, %cst_103 {dimension_numbers = #tpu.dot_dimension_numbers<[1], [0], [0], [1], [0, 0, 1, 1], [], []>} : vector<256x32xbf16>, vector<32x64xbf16>, vector<256x64xf32> -> vector<256x64xf32>
    %105 = arith.addf %99, %104 : vector<256x64xf32>
    %cst_104 = arith.constant 0.000000e+00 : f32
    %106 = vector.broadcast %cst_104 : f32 to vector<256x64xf32>
    %107 = arith.maximumf %105, %106 : vector<256x64xf32>
    %108 = vector.shape_cast %107 : vector<256x64xf32> to vector<1x16x16x64xf32>
    %c0_105 = arith.constant 0 : index
    %c0_106 = arith.constant 0 : index
    %c0_107 = arith.constant 0 : index
    %c0_108 = arith.constant 0 : index
    %109 = vector.load %arg6[%c0_105, %c0_106, %c0_107, %c0_108] : memref<1x16x16x64xf32, #tpu.memory_space<vmem>>, vector<1x16x16x64xf32>
    tpu.vector_store %arg6[%c0_105, %c0_106, %c0_107, %c0_108], %108 {strides = array<i32>} : memref<1x16x16x64xf32, #tpu.memory_space<vmem>>, vector<1x16x16x64xf32>,
    return
  }
  func.func @transform_0(%arg0: i32) -> (i32, i32, i32, i32) {
    %c0_i32 = arith.constant 0 : i32
    %c0_i32_0 = arith.constant 0 : i32
    %c0_i32_1 = arith.constant 0 : i32
    %c0_i32_2 = arith.constant 0 : i32
    return %arg0, %c0_i32, %c0_i32_0, %c0_i32_1 : i32, i32, i32, i32
  }
  func.func @transform_1(%arg0: i32) -> (i32, i32, i32) {
    %c0_i32 = arith.constant 0 : i32
    %c0_i32_0 = arith.constant 0 : i32
    %c0_i32_1 = arith.constant 0 : i32
    %c0_i32_2 = arith.constant 0 : i32
    return %c0_i32, %c0_i32_0, %c0_i32_1 : i32, i32, i32
  }
  func.func @transform_2(%arg0: i32) -> (i32, i32) {
    %c0_i32 = arith.constant 0 : i32
    %c0_i32_0 = arith.constant 0 : i32
    %c0_i32_1 = arith.constant 0 : i32
    return %c0_i32, %c0_i32_0 : i32, i32
  }
  func.func @transform_3(%arg0: i32) -> (i32, i32) {
    %c0_i32 = arith.constant 0 : i32
    %c0_i32_0 = arith.constant 0 : i32
    %c0_i32_1 = arith.constant 0 : i32
    return %c0_i32, %c0_i32_0 : i32, i32
  }
  func.func @transform_4(%arg0: i32) -> (i32, i32, i32) {
    %c0_i32 = arith.constant 0 : i32
    %c0_i32_0 = arith.constant 0 : i32
    %c0_i32_1 = arith.constant 0 : i32
    %c0_i32_2 = arith.constant 0 : i32
    return %c0_i32, %c0_i32_0, %c0_i32_1 : i32, i32, i32
  }
  func.func @transform_5(%arg0: i32) -> (i32, i32, i32, i32) {
    %c0_i32 = arith.constant 0 : i32
    %c0_i32_0 = arith.constant 0 : i32
    %c0_i32_1 = arith.constant 0 : i32
    %c0_i32_2 = arith.constant 0 : i32
    return %arg0, %c0_i32, %c0_i32_0, %c0_i32_1 : i32, i32, i32, i32
  }
}

</mosaic_0001>

<bundles_post_ra>
// kernel: deconv_block_forward.1
= control target key start
LH: loop header
LB: loop body
LE: loop exit
PB: predicated region body
PF: predicated region fallthrough
CT: control target
= control target key end

     0   :  { %s9161_s18 = smov 0   ;;  %s12673_s0 = inlined_call_operand.vmem [shape: bf16[2,18,18,32], index: 0, kind: input, shape index: {}]   ;;  %s12674_s1 = inlined_call_operand.vmem [shape: bf16[9,32,32], index: 1, kind: input, shape index: {}]   ;;  %s12675_s2 = inlined_call_operand.vmem [shape: f32[1,32], index: 2, kind: input, shape index: {}]   ;;  %s12676_s3 = inlined_call_operand.vmem [shape: f32[1,32], index: 3, kind: input, shape index: {}]   ;;  %s12677_s4 = inlined_call_operand.vmem [shape: bf16[4,32,64], index: 4, kind: input, shape index: {}]   ;;  %s12678_s5 = inlined_call_operand.vmem [shape: f32[2,16,16,64], index: 5, kind: output, shape index: {}]  }
   0x1 LB: > { %s7491_s19 = sadd.s32 4294967295, %s9128_s18   ;;  %p7495_p0 = scmp.ge.s32.totalorder %s9128_s18, 1  ;;  %s9128_s18 = sphi %s9161_s18, %s15_s18  }
   0x2   : > { %p187_p1 = scmp.lt.s32.totalorder %s9128_s18, 3 }
   0x4   : > { %p188_p2 = pnand %p7495_p0, %p187_p1 }
   0x6   : > { %191 = sbr.rel (%p188_p2) target bundleno = 886 (0x376), region = 40 }
   0xb   : > { %v9010_v0 = vld [vmem:[%s12674_s1 + $0x18] sm:$0xff]   ;;  %p215_p3 = scmp.lt.s32.totalorder %s7491_s19, 1  ;;  %v9011_v1 = vld [vmem:[%s12674_s1 + $0x10] sm:$0xff]   ;;  %v9180_v2 = vld [vmem:[%s12674_s1 + $0x8] sm:$0xff]   ;;  %vm278_vm0 = vsmask.f32 3328 }
   0xc   : > { %8996 = vmatprep.subr.bf16.mxu1 %v9010_v0  ;;  %8528 = vmatprep.subr.bf16.mxu0 %v9010_v0  ;;  %v9186_v3 = vld [vmem:[%s12674_s1 + $0x28] sm:$0xff]   ;;  %vm279_vm1 = vsmask.f32 7440  ;;  %vm730_vm2 = vcmask 261120   ;;  %v12712_v29 = vmov 0  ;;  %vm1289_vm4 = vcmask 1042432  }
   0xd   : > { %s12980_s19 = smov (!%p215_p3, %s7491_s19), 1  ;;  %8998 = vmatpush3.bf16.msra.mxu1 %v9010_v0  ;;  %8529 = vmatpush3.bf16.msra.mxu0 %v9010_v0  ;;  %vm9231_vm3 = vmor %vm278_vm0, %vm279_vm1  ;;  %vm1290_vm5 = vcmask 1046532   ;;  %vm5002_vm7 = vcmask 257024   ;;  %vm5005_vm8 = vcmask 253952   ;;  %vm5006_vm9 = vsmask.f32 256 }
   0xe   : > { %8997 = vmatprep.subr.bf16.mxu1 %v9011_v1  ;;  %8530 = vmatprep.subr.bf16.mxu0 %v9011_v1  ;;  %s9000_s26 = smul.u32 216, %s12980_s19  ;;  %v12713_v29 = vsel %vm9231_vm3, 4294967295, %v12712_v29  ;;  %vm9517_vm6 = vmor %vm1289_vm4, %vm1290_vm5  ;;  %s8261_s13 = sshll.u32 %s12980_s19, 8  ;;  %vm7403_vm11 = vcmask 523264  }
   0xf   : > { %12714 = vst [vmem:[#allocation3_spill] sm:$0xff] %v12713_v29  ;;  %vm11496_vm10 = vmand %vm5005_vm8, %vm5006_vm9  ;;  %s12546_s16 = scalar_lea.vmem %s12678_s5, %s8261_s13 }
  0x10   : > { %s9191_s6 = scalar_lea.vmem %s12673_s0, %s9000_s26 }
  0x11   : > { %8999 = vmatpush3.bf16.msra.mxu1 %v9011_v1  ;;  %8531 = vmatpush3.bf16.msra.mxu0 %v9011_v1  ;;  %v9194_v4 = vld [vmem:[%s9191_s6] sm:$0xf]  ;;  %v9197_v5 = vld [vmem:[%s9191_s6 + $0x4] sm:$0xf]  ;;  %v9200_v6 = vld [vmem:[%s9191_s6 + $0x8] sm:$0x1] }
  0x12   : > { %v282_v7 = vshrl.u32 %v9194_v4, 16  ;;  %v285_v8 = vshll.u32 %v9194_v4, 16  ;;  %v291_v9 = vshll.u32 %v9197_v5, 16  ;;  %v295_v10 = vshrl.u32 %v9197_v5, 16  ;;  %v9207_v11 = vld [vmem:[%s9191_s6 + $0x60] sm:$0xf]  ;;  %8564 = vmatprep.subr.bf16.mxu1 %v9180_v2  ;;  %8600 = vmatprep.subr.bf16.mxu0 %v9186_v3 }
  0x13   : > { %v301_v12 = vshll.u32 %v9200_v6, 16  ;;  %v9213_v13 = vld [vmem:[%s9191_s6 + $0x64] sm:$0xf]  ;;  %v9216_v14 = vld [vmem:[%s9191_s6 + $0x68] sm:$0x1]  ;;  %v474_v20 = vshrl.u32 %v9207_v11, 16 }
  0x14   : > { %v284_v15 = vrot.slane %v282_v7, 4  ;;  %v287_v16 = vrot.slane %v285_v8, 5  ;;  %v293_v17 = vrot.slane %v291_v9, 5  ;;  %v297_v18 = vrot.slane %v295_v10, 4  ;;  %v9224_v27 = vld [vmem:[%s9191_s6 + $0xc] sm:$0xf] }
  0x15   : > { %v303_v19 = vrot.slane %v301_v12, 5  ;;  %v477_v21 = vshll.u32 %v9207_v11, 16  ;;  %v483_v22 = vshll.u32 %v9213_v13, 16  ;;  %v487_v25 = vshrl.u32 %v9213_v13, 16  ;;  %v9227_v28 = vld [vmem:[%s9191_s6 + $0x10] sm:$0xf] }
  0x16   : > { %v288_v23 = vor.u32 %v287_v16, %v284_v15  ;;  %v298_v24 = vor.u32 %v297_v18, %v293_v17  ;;  %v493_v26 = vshll.u32 %v9216_v14, 16  ;;  %v476_v31 = vrot.slane %v474_v20, 4  ;;  %v9237_v39 = vld [vmem:[%s9191_s6 + $0x14] sm:$0x1]  ;;  %v9248_v51 = vld [vmem:[%s9191_s6 + $0x6c] sm:$0xf] }
  0x17   : > { %v479_v32 = vrot.slane %v477_v21, 5  ;;  %v485_v33 = vrot.slane %v483_v22, 5  ;;  %v489_v36 = vrot.slane %v487_v25, 4  ;;  %v306_v40 = vshrl.u32 %v9224_v27, 16  ;;  %v9252_v56 = vld [vmem:[%s9191_s6 + $0x70] sm:$0xf] }
  0x18   : > { %v289_v34 = vrot.slane %v288_v23, 4  ;;  %v299_v35 = vrot.slane %v298_v24, 4  ;;  %v495_v37 = vrot.slane %v493_v26, 5  ;;  %v309_v41 = vshll.u32 %v9224_v27, 16  ;;  %v9260_v61 = vld [vmem:[%s9191_s6 + $0x74] sm:$0x1] }
  0x19   : > { %v480_v38 = vor.u32 %v479_v32, %v476_v31  ;;  %v315_v42 = vshll.u32 %v9227_v28, 16  ;;  %v490_v45 = vor.u32 %v489_v36, %v485_v33  ;;  %v319_v46 = vshrl.u32 %v9227_v28, 16  ;;  %v9266_v7 = vld [vmem:[%s9191_s6 + $0x18] sm:$0xf]  ;;  %v9279_v23 = vld [vmem:[%s9191_s6 + $0x20] sm:$0x1] }
  0x1a   : > { %v294_v43 = vsel %vm9231_vm3, %v289_v34, %v293_v17  ;;  %v304_v44 = vsel %vm9231_vm3, %v299_v35, %v303_v19  ;;  %v308_v49 = vrot.slane %v306_v40, 4  ;;  %v311_v50 = vrot.slane %v309_v41, 5  ;;  %v9273_v19 = vld [vmem:[%s9191_s6 + $0x1c] sm:$0xf]  ;;  %v9453_v30 = vld [vmem:[%s9191_s6 + $0xac] sm:$0xf] }
  0x1b   : > { %v7503_v47 = vcombine.low %v294_v43, %v304_v44  ;;  %v481_v48 = vrot.slane %v480_v38, 4  ;;  %v491_v52 = vrot.slane %v490_v45, 4  ;;  %v317_v53 = vrot.slane %v315_v42, 5  ;;  %v9015_v38 = vld [vmem:[%s12674_s1 + $0x20] sm:$0xff]   ;;  %v9293_v44 = vld [vmem:[%s9191_s6 + $0x7c] sm:$0xf] }
  0x1c   : > { %v321_v54 = vrot.slane %v319_v46, 4  ;;  %v325_v55 = vshll.u32 %v9237_v39, 16  ;;  %v312_v58 = vor.u32 %v311_v50, %v308_v49  ;;  %v498_v1 = vshrl.u32 %v9248_v51, 16  ;;  %12715 = vst [vmem:[#allocation4_spill] sm:$0xff] %v9293_v44  ;;  %12723 = vst [vmem:[#allocation12_spill] sm:$0xff] %v9453_v30 }
  0x1d   : > { %8532 = vmatprep.mubr.msk.bf16.mxu0 %vm730_vm2, %v7503_v47  ;;  %v486_v57 = vsel %vm9231_vm3, %v481_v48, %v485_v33  ;;  %v496_v62 = vsel %vm9231_vm3, %v491_v52, %v495_v37  ;;  %v501_v10 = vshll.u32 %v9248_v51, 16  ;;  %v507_v12 = vshll.u32 %v9252_v56, 16  ;;  %v246_v33 = vld [vmem:[%s9191_s6 + $0x78] sm:$0xf] }
  0x1e   : > { %v322_v63 = vor.u32 %v321_v54, %v317_v53  ;;  %v327_v0 = vrot.slane %v325_v55, 5  ;;  %v7511_v8 = vcombine.low %v486_v57, %v496_v62  ;;  %v313_v9 = vrot.slane %v312_v58, 4  ;;  %v9298_v54 = vld [vmem:[%s9191_s6 + $0x80] sm:$0x1] }
  0x1f   : > { %v500_v16 = vrot.slane %v498_v1, 4  ;;  %v511_v17 = vshrl.u32 %v9252_v56, 16  ;;  %v517_v18 = vshll.u32 %v9260_v61, 16  ;;  %v503_v21 = vrot.slane %v501_v10, 5  ;;  %12716 = vst [vmem:[#allocation5_spill] sm:$0xff] %v9298_v54 }
  0x20   : > { %v323_v15 = vrot.slane %v322_v63, 4  ;;  %8548 = vmatprep.mubr.msk.bf16.mxu1 %vm730_vm2, %v7511_v8  ;;  %v318_v20 = vsel %vm9231_vm3, %v313_v9, %v317_v53  ;;  %v509_v22 = vrot.slane %v507_v12, 5  ;;  %v330_v24 = vshrl.u32 %v9266_v7, 16  ;;  %v9304_v63 = vld [vmem:[%s9191_s6 + $0x24] sm:$0xf] }
  0x21   : > { %v513_v26 = vrot.slane %v511_v17, 4  ;;  %v519_v31 = vrot.slane %v517_v18, 5  ;;  %v333_v32 = vshll.u32 %v9266_v7, 16  ;;  %v504_v35 = vor.u32 %v503_v21, %v500_v16  ;;  %v9315_v10 = vld [vmem:[%s9191_s6 + $0x28] sm:$0xf]  ;;  %v9014_v18 = vld [vmem:[%s12674_s1] sm:$0xff]  }
  0x22   : > { %v328_v25 = vsel %vm9231_vm3, %v323_v15, %v327_v0  ;;  %v332_v36 = vrot.slane %v330_v24, 4  ;;  %v339_v37 = vshll.u32 %v9273_v19, 16  ;;  %v343_v42 = vshrl.u32 %v9273_v19, 16  ;;  %v9324_v24 = vld [vmem:[%s9191_s6 + $0x2c] sm:$0x1] }
  0x23   : > { %v7504_v34 = vcombine.low %v318_v20, %v328_v25  ;;  %v514_v40 = vor.u32 %v513_v26, %v509_v22  ;;  %v335_v41 = vrot.slane %v333_v32, 5  ;;  %v349_v43 = vshll.u32 %v9279_v23, 16 }
  0x24   : > { %v505_v45 = vrot.slane %v504_v35, 4  ;;  %v341_v46 = vrot.slane %v339_v37, 5  ;;  %v522_v47 = vshrl.u32 %v246_v33, 16  ;;  %v525_v48 = vshll.u32 %v246_v33, 16 }
  0x25   : > { %8533 = vmatmul.mubr.msk.bf16.vlgmr.msra.gmra.mxu0 %vm730_vm2, %v7504_v34  ;;  %v515_v49 = vrot.slane %v514_v40, 4  ;;  %v336_v50 = vor.u32 %v335_v41, %v332_v36  ;;  %v345_v52 = vrot.slane %v343_v42, 4  ;;  %v351_v53 = vrot.slane %v349_v43, 5  ;;  %v9331_v34 = vld [vmem:[%s9191_s6 + $0x84] sm:$0xf] }
  0x26   : > { %8601 = vmatpush3.bf16.msra.mxu0 %v9186_v3  ;;  %v510_v55 = vsel %vm9231_vm3, %v505_v45, %v509_v22  ;;  %v524_v57 = vrot.slane %v522_v47, 4  ;;  %v527_v58 = vrot.slane %v525_v48, 5  ;;  %v531_v62 = vshll.u32 %v9293_v44, 16  ;;  %v9309_v3 = vld [vmem:[%s12674_s1 + $0x48] sm:$0xff]  }
  0x27   : > { %8602 = vmatprep.subr.bf16.mxu0 %v9015_v38  ;;  %v520_v0 = vsel %vm9231_vm3, %v515_v49, %v519_v31  ;;  %v337_v1 = vrot.slane %v336_v50, 4  ;;  %v346_v8 = vor.u32 %v345_v52, %v341_v46  ;;  %v535_v9 = vshrl.u32 %v9293_v44, 16  ;;  %v9339_v40 = vld [vmem:[%s9191_s6 + $0x88] sm:$0xf]  ;;  %v9350_v49 = vld [vmem:[%s9191_s6 + $0x8c] sm:$0x1] }
  0x28   : > { %v7512_v12 = vcombine.low %v510_v55, %v520_v0  ;;  %v528_v15 = vor.u32 %v527_v58, %v524_v57  ;;  %v533_v16 = vrot.slane %v531_v62, 5  ;;  %v541_v17 = vshll.u32 %v9298_v54, 16  ;;  %v9358_v58 = vld [vmem:[%s9191_s6 + $0x30] sm:$0xf]  ;;  %v9482_v44 = vld [vmem:[%s9191_s6 + $0x5c] sm:$0x1] }
  0x29   : > { %v342_v20 = vsel %vm9231_vm3, %v337_v1, %v341_v46  ;;  %v347_v21 = vrot.slane %v346_v8, 4  ;;  %v537_v22 = vrot.slane %v535_v9, 4  ;;  %v354_v25 = vshrl.u32 %v9304_v63, 16  ;;  %v9363_v9 = vld [vmem:[%s9191_s6 + $0x34] sm:$0xf] }
  0x2a   : > { %8603 = vmatpush3.bf16.msra.mxu0 %v9015_v38  ;;  %8549 = vmatmul.mubr.msk.bf16.vlgmr.msra.gmra.mxu1 %vm730_vm2, %v7512_v12  ;;  %v529_v26 = vrot.slane %v528_v15, 4  ;;  %v543_v31 = vrot.slane %v541_v17, 5  ;;  %v357_v32 = vshll.u32 %v9304_v63, 16  ;;  %v363_v33 = vshll.u32 %v9315_v10, 16 }
  0x2b   : > { %8672 = vmatprep.subr.bf16.mxu0 %v9309_v3  ;;  %8565 = vmatpush3.bf16.msra.mxu1 %v9180_v2  ;;  %v352_v35 = vsel %vm9231_vm3, %v347_v21, %v351_v53  ;;  %v538_v36 = vor.u32 %v537_v22, %v533_v16  ;;  %v356_v37 = vrot.slane %v354_v25, 4  ;;  %v367_v38 = vshrl.u32 %v9315_v10, 16  ;;  %v9346_v2 = vld [vmem:[%s12674_s1 + $0x38] sm:$0xff]  }
  0x2c   : > { %v7505_v41 = vcombine.low %v342_v20, %v352_v35  ;;  %v534_v42 = vsel %vm9231_vm3, %v529_v26, %v533_v16  ;;  %v359_v43 = vrot.slane %v357_v32, 5  ;;  %v365_v45 = vrot.slane %v363_v33, 5  ;;  %8566 = vmatprep.subr.bf16.mxu1 %v9014_v18  ;;  %v9368_v25 = vld [vmem:[%s9191_s6 + $0x38] sm:$0x1]  ;;  %v9377_v35 = vld [vmem:[%s9191_s6 + $0x90] sm:$0xf] }
  0x2d   : > { %v539_v46 = vrot.slane %v538_v36, 4  ;;  %v369_v47 = vrot.slane %v367_v38, 4  ;;  %v373_v48 = vshll.u32 %v9324_v24, 16  ;;  %v546_v50 = vshrl.u32 %v9331_v34, 16  ;;  %12717 = vst [vmem:[#allocation6_spill] sm:$0xff] %v9377_v35 }
  0x2e   : > { %8536 = vmatprep.mubr.msk.bf16.mxu0 %vm730_vm2, %v7505_v41  ;;  %v360_v52 = vor.u32 %v359_v43, %v356_v37  ;;  %v549_v53 = vshll.u32 %v9331_v34, 16  ;;  %v555_v55 = vshll.u32 %v9339_v40, 16  ;;  %v559_v57 = vshrl.u32 %v9339_v40, 16  ;;  %v9380_v36 = vld [vmem:[%s9191_s6 + $0x94] sm:$0xf] }
  0x2f   : > { %v544_v62 = vsel %vm9231_vm3, %v539_v46, %v543_v31  ;;  %v370_v0 = vor.u32 %v369_v47, %v365_v45  ;;  %v375_v1 = vrot.slane %v373_v48, 5  ;;  %v548_v8 = vrot.slane %v546_v50, 4  ;;  %8567 = vmatpush3.bf16.msra.mxu1 %v9014_v18  ;;  %v9385_v48 = vld [vmem:[%s9191_s6 + $0x98] sm:$0x1] }
  0x30   : > { %v7513_v12 = vcombine.low %v534_v42, %v544_v62  ;;  %v361_v15 = vrot.slane %v360_v52, 4  ;;  %v551_v16 = vrot.slane %v549_v53, 5  ;;  %v557_v17 = vrot.slane %v555_v55, 5  ;;  %8636 = vmatprep.subr.bf16.mxu1 %v9346_v2  ;;  %12718 = vst [vmem:[#allocation7_spill] sm:$0xff] %v9385_v48 }
  0x31   : > { %v371_v20 = vrot.slane %v370_v0, 4  ;;  %v561_v21 = vrot.slane %v559_v57, 4  ;;  %v565_v22 = vshll.u32 %v9350_v49, 16  ;;  %v378_v26 = vshrl.u32 %v9358_v58, 16 }
  0x32   : > { %8552 = vmatprep.mubr.msk.bf16.mxu1 %vm730_vm2, %v7513_v12  ;;  %v366_v18 = vsel %vm9231_vm3, %v361_v15, %v365_v45  ;;  %v552_v31 = vor.u32 %v551_v16, %v548_v8  ;;  %v381_v32 = vshll.u32 %v9358_v58, 16  ;;  %v387_v33 = vshll.u32 %v9363_v9, 16  ;;  %v9396_v8 = vld [vmem:[%s9191_s6 + $0x3c] sm:$0xf] }
  0x33   : > { %v376_v37 = vsel %vm9231_vm3, %v371_v20, %v375_v1  ;;  %v562_v38 = vor.u32 %v561_v21, %v557_v17  ;;  %v567_v41 = vrot.slane %v565_v22, 5  ;;  %v380_v42 = vrot.slane %v378_v26, 4  ;;  %v9401_v21 = vld [vmem:[%s9191_s6 + $0x40] sm:$0xf] }
  0x34   : > { %v7506_v43 = vcombine.low %v366_v18, %v376_v37  ;;  %v553_v46 = vrot.slane %v552_v31, 4  ;;  %v383_v47 = vrot.slane %v381_v32, 5  ;;  %v389_v45 = vrot.slane %v387_v33, 5 }
  0x35   : > { %v563_v50 = vrot.slane %v562_v38, 4  ;;  %v391_v52 = vshrl.u32 %v9363_v9, 16  ;;  %v397_v53 = vshll.u32 %v9368_v25, 16  ;;  %v570_v55 = vshrl.u32 %v9377_v35, 16 }
  0x36   : > { %8537 = vmatmul.mubr.msk.bf16.gmra.mxu0 %vm730_vm2, %v7506_v43  ;;  %v558_v57 = vsel %vm9231_vm3, %v553_v46, %v557_v17  ;;  %v384_v62 = vor.u32 %v383_v47, %v380_v42  ;;  %v573_v0 = vshll.u32 %v9377_v35, 16  ;;  %v579_v1 = vshll.u32 %v9380_v36, 16  ;;  %v9410_v42 = vld [vmem:[%s9191_s6 + $0x44] sm:$0x1]  ;;  %v9415_v47 = vld [vmem:[%s9191_s6 + $0x9c] sm:$0xf] }
  0x37   : > { %v568_v12 = vsel %vm9231_vm3, %v563_v50, %v567_v41  ;;  %v393_v15 = vrot.slane %v391_v52, 4  ;;  %v399_v16 = vrot.slane %v397_v53, 5  ;;  %v572_v20 = vrot.slane %v570_v55, 4  ;;  %12719 = vst [vmem:[#allocation8_spill] sm:$0xff] %v9415_v47  ;;  %v1242_v35 = vld [vmem:[%s9191_s6 + $0xc] sm:$0xe] }
  0x38   : > { %v7514_v22 = vcombine.low %v558_v57, %v568_v12  ;;  %v385_v26 = vrot.slane %v384_v62, 4  ;;  %v575_v17 = vrot.slane %v573_v0, 5  ;;  %v581_v18 = vrot.slane %v579_v1, 5  ;;  %v9418_v57 = vld [vmem:[%s9191_s6 + $0xa0] sm:$0xf] }
  0x39   : > { %v394_v31 = vor.u32 %v393_v15, %v389_v45  ;;  %v583_v32 = vshrl.u32 %v9380_v36, 16  ;;  %v589_v33 = vshll.u32 %v9385_v48, 16  ;;  %v402_v37 = vshrl.u32 %v9396_v8, 16  ;;  %12720 = vst [vmem:[#allocation9_spill] sm:$0xff] %v9418_v57  ;;  %v9422_v12 = vld [vmem:[%s9191_s6 + $0xa4] sm:$0x1] }
  0x3a   : > { %8553 = vmatmul.mubr.msk.bf16.gmra.mxu1 %vm730_vm2, %v7514_v22  ;;  %v390_v38 = vsel %vm9231_vm3, %v385_v26, %v389_v45  ;;  %v576_v41 = vor.u32 %v575_v17, %v572_v20  ;;  %v405_v43 = vshll.u32 %v9396_v8, 16  ;;  %v411_v46 = vshll.u32 %v9401_v21, 16  ;;  %12721 = vst [vmem:[#allocation10_spill] sm:$0xff] %v9422_v12  ;;  %v9429_v17 = vld [vmem:[%s9191_s6 + $0x48] sm:$0xf] }
  0x3b   : > { %v395_v50 = vrot.slane %v394_v31, 4  ;;  %v585_v52 = vrot.slane %v583_v32, 4  ;;  %v591_v53 = vrot.slane %v589_v33, 5  ;;  %v404_v55 = vrot.slane %v402_v37, 4 }
  0x3c   : > { %v577_v62 = vrot.slane %v576_v41, 4  ;;  %v407_v0 = vrot.slane %v405_v43, 5  ;;  %v413_v1 = vrot.slane %v411_v46, 5  ;;  %v415_v45 = vshrl.u32 %v9401_v21, 16 }
  0x3d   : > { %v400_v15 = vsel %vm9231_vm3, %v395_v50, %v399_v16  ;;  %v586_v20 = vor.u32 %v585_v52, %v581_v18  ;;  %v421_v22 = vshll.u32 %v9410_v42, 16  ;;  %v594_v26 = vshrl.u32 %v9415_v47, 16 }
  0x3e   : > { %v7507_v31 = vcombine.low %v390_v38, %v400_v15  ;;  %v582_v32 = vsel %vm9231_vm3, %v577_v62, %v581_v18  ;;  %v408_v33 = vor.u32 %v407_v0, %v404_v55  ;;  %v417_v37 = vrot.slane %v415_v45, 4  ;;  %v9441_v0 = vld [vmem:[%s9191_s6 + $0x4c] sm:$0xf] }
  0x3f   : > { %v587_v41 = vrot.slane %v586_v20, 4  ;;  %v423_v43 = vrot.slane %v421_v22, 5  ;;  %v596_v46 = vrot.slane %v594_v26, 4  ;;  %v597_v16 = vshll.u32 %v9415_v47, 16 }
  0x40   : > { %8540 = vmatprep.mubr.msk.bf16.mxu0 %vm730_vm2, %v7507_v31  ;;  %v409_v50 = vrot.slane %v408_v33, 4  ;;  %v418_v52 = vor.u32 %v417_v37, %v413_v1  ;;  %v603_v60 = vshll.u32 %v9418_v57, 16  ;;  %v607_v38 = vshrl.u32 %v9418_v57, 16  ;;  %v9447_v31 = vld [vmem:[%s9191_s6 + $0x50] sm:$0x1] }
  0x41   : > { %v592_v18 = vsel %vm9231_vm3, %v587_v41, %v591_v53  ;;  %v599_v55 = vrot.slane %v597_v16, 5  ;;  %v613_v62 = vshll.u32 %v9422_v12, 16  ;;  %v426_v45 = vshrl.u32 %v9429_v17, 16  ;;  %v9450_v33 = vld [vmem:[%s9191_s6 + $0xa8] sm:$0xf] }
  0x42   : > { %v7515_v15 = vcombine.low %v582_v32, %v592_v18  ;;  %v414_v20 = vsel %vm9231_vm3, %v409_v50, %v413_v1  ;;  %v419_v22 = vrot.slane %v418_v52, 4  ;;  %v605_v26 = vrot.slane %v603_v60, 5  ;;  %12722 = vst [vmem:[#allocation11_spill] sm:$0xff] %v9450_v33 }
  0x43   : > { %v600_v37 = vor.u32 %v599_v55, %v596_v46  ;;  %v609_v53 = vrot.slane %v607_v38, 4  ;;  %v615_v41 = vrot.slane %v613_v62, 5  ;;  %v428_v16 = vrot.slane %v426_v45, 4  ;;  %v9463_v55 = vld [vmem:[%s9191_s6 + $0xb0] sm:$0x1] }
  0x44   : > { %8556 = vmatprep.mubr.msk.bf16.mxu1 %vm730_vm2, %v7515_v15  ;;  %v424_v32 = vsel %vm9231_vm3, %v419_v22, %v423_v43  ;;  %v429_v1 = vshll.u32 %v9429_v17, 16  ;;  %v435_v60 = vshll.u32 %v9441_v0, 16  ;;  %v439_v50 = vshrl.u32 %v9441_v0, 16  ;;  %12724 = vst [vmem:[#allocation13_spill] sm:$0xff] %v9463_v55  ;;  %v9467_v43 = vld [vmem:[%s9191_s6 + $0x54] sm:$0xf] }
  0x45   : > { %v7508_v52 = vcombine.low %v414_v20, %v424_v32  ;;  %v601_v46 = vrot.slane %v600_v37, 4  ;;  %v610_v38 = vor.u32 %v609_v53, %v605_v26  ;;  %v445_v18 = vshll.u32 %v9447_v31, 16  ;;  %v9474_v53 = vld [vmem:[%s9191_s6 + $0x58] sm:$0xf] }
  0x46   : > { %v431_v62 = vrot.slane %v429_v1, 5  ;;  %v437_v45 = vrot.slane %v435_v60, 5  ;;  %v441_v15 = vrot.slane %v439_v50, 4  ;;  %v618_v59 = vshrl.u32 %v9450_v33, 16 }
  0x47   : > { %8541 = vmatmul.mubr.msk.bf16.gmra.mxu0 %vm730_vm2, %v7508_v52  ;;  %v606_v22 = vsel %vm9231_vm3, %v601_v46, %v605_v26  ;;  %v611_v54 = vrot.slane %v610_v38, 4  ;;  %v447_v20 = vrot.slane %v445_v18, 5  ;;  %v621_v37 = vshll.u32 %v9450_v33, 16 }
  0x48   : > { %v432_v32 = vor.u32 %v431_v62, %v428_v16  ;;  %v442_v12 = vor.u32 %v441_v15, %v437_v45  ;;  %v620_v1 = vrot.slane %v618_v59, 4  ;;  %v627_v60 = vshll.u32 %v9453_v30, 16 }
  0x49   : > { %v616_v50 = vsel %vm9231_vm3, %v611_v54, %v615_v41  ;;  %v623_v52 = vrot.slane %v621_v37, 5  ;;  %v631_v26 = vshrl.u32 %v9453_v30, 16  ;;  %v637_v46 = vshll.u32 %v9463_v55, 16  ;;  %v9493_v37 = vld [vmem:[%s9191_s6 + $0xb4] sm:$0xf] }
  0x4a   : > { %v7516_v38 = vcombine.low %v606_v22, %v616_v50  ;;  %v433_v18 = vrot.slane %v432_v32, 4  ;;  %v443_v16 = vrot.slane %v442_v12, 4  ;;  %v629_v62 = vrot.slane %v627_v60, 5  ;;  %12725 = vst [vmem:[#allocation14_spill] sm:$0xff] %v9493_v37  ;;  %v9496_v32 = vld [vmem:[%s9191_s6 + $0xb8] sm:$0xf] }
  0x4b   : > { %v624_v15 = vor.u32 %v623_v52, %v620_v1  ;;  %v633_v59 = vrot.slane %v631_v26, 4  ;;  %v639_v33 = vrot.slane %v637_v46, 5  ;;  %v450_v47 = vshrl.u32 %v9467_v43, 16 }
  0x4c   : > { %8557 = vmatmul.mubr.msk.bf16.gmra.mxu1 %vm730_vm2, %v7516_v38  ;;  %v438_v54 = vsel %vm9231_vm3, %v433_v18, %v437_v45  ;;  %v448_v41 = vsel %vm9231_vm3, %v443_v16, %v447_v20  ;;  %v453_v22 = vshll.u32 %v9467_v43, 16  ;;  %v459_v12 = vshll.u32 %v9474_v53, 16  ;;  %v9501_v20 = vld [vmem:[%s9191_s6 + $0xbc] sm:$0x1] }
  0x4d   : > { %v7509_v1 = vcombine.low %v438_v54, %v448_v41  ;;  %v625_v60 = vrot.slane %v624_v15, 4  ;;  %v634_v50 = vor.u32 %v633_v59, %v629_v62  ;;  %v452_v52 = vrot.slane %v450_v47, 4 }
  0x4e   : > { %v455_v26 = vrot.slane %v453_v22, 5  ;;  %v461_v46 = vrot.slane %v459_v12, 5  ;;  %v463_v45 = vshrl.u32 %v9474_v53, 16  ;;  %v469_v38 = vshll.u32 %v9482_v44, 16  ;;  %v1241_v12 = vld [vmem:[%s9191_s6] sm:$0xe] }
  0x4f   : > { %8544 = vmatprep.mubr.msk.bf16.mxu0 %vm730_vm2, %v7509_v1  ;;  %v630_v18 = vsel %vm9231_vm3, %v625_v60, %v629_v62  ;;  %v635_v16 = vrot.slane %v634_v50, 4  ;;  %v642_v15 = vshrl.u32 %v9493_v37, 16  ;;  %v645_v59 = vshll.u32 %v9493_v37, 16 }
  0x50   : > { %v456_v47 = vor.u32 %v455_v26, %v452_v52  ;;  %v465_v54 = vrot.slane %v463_v45, 4  ;;  %v471_v41 = vrot.slane %v469_v38, 5  ;;  %v651_v22 = vshll.u32 %v9496_v32, 16 }
  0x51   : > { %v640_v55 = vsel %vm9231_vm3, %v635_v16, %v639_v33  ;;  %v644_v30 = vrot.slane %v642_v15, 4  ;;  %v647_v1 = vrot.slane %v645_v59, 5  ;;  %v655_v57 = vshrl.u32 %v9496_v32, 16 }
  0x52   : > { %v7517_v62 = vcombine.low %v630_v18, %v640_v55  ;;  %v457_v60 = vrot.slane %v456_v47, 4  ;;  %v466_v50 = vor.u32 %v465_v54, %v461_v46  ;;  %v653_v48 = vrot.slane %v651_v22, 5  ;;  %v1243_v47 = vld [vmem:[%s9191_s6 + $0x18] sm:$0xe] }
  0x53   : > { %v648_v37 = vor.u32 %v647_v1, %v644_v30  ;;  %v657_v52 = vrot.slane %v655_v57, 4  ;;  %v661_v26 = vshll.u32 %v9501_v20, 16  ;;  %v7571_v33 = vrot.slane %v1241_v12, 9 }
  0x54   : > { %8560 = vmatprep.mubr.msk.bf16.mxu1 %vm730_vm2, %v7517_v62  ;;  %v462_v55 = vsel %vm9231_vm3, %v457_v60, %v461_v46  ;;  %v467_v38 = vrot.slane %v466_v50, 4  ;;  %v1294_v18 = vrot.slane %v9197_v5, 5  ;;  %v7538_v30 = vcombine.low %v9224_v27, %v9227_v28 }
  0x55   : > { %v649_v57 = vrot.slane %v648_v37, 4  ;;  %v658_v16 = vor.u32 %v657_v52, %v653_v48  ;;  %v663_v15 = vrot.slane %v661_v26, 5  ;;  %v7572_v59 = vrot.slane %v1242_v35, 9  ;;  %v1244_v26 = vld [vmem:[%s9191_s6 + $0x24] sm:$0xe] }
  0x56   : > { %v472_v54 = vsel %vm9231_vm3, %v467_v38, %v471_v41  ;;  %v1295_v22 = vsel %vm9517_vm6, %v7571_v33, %v1294_v18  ;;  %v1296_v12 = vrot.slane %v1294_v18, 4  ;;  %v12728_v46 = vrot.slane %v9227_v28, 5 }
  0x57   : > { %v7510_v62 = vcombine.low %v462_v55, %v472_v54  ;;  %v654_v60 = vsel %vm9231_vm3, %v649_v57, %v653_v48  ;;  %v659_v37 = vrot.slane %v658_v16, 4  ;;  %v12729_v50 = vrot.slane %v9200_v6, 5 }
  0x58   : > { %v1303_v1 = vrot.slane %v12728_v46, 4  ;;  %v7539_v41 = vcombine.low %v9266_v7, %v9273_v19  ;;  %v7573_v52 = vrot.slane %v1243_v47, 9  ;;  %v7537_v55 = vcombine.low %v9194_v4, %v9197_v5  ;;  %v1245_v47 = vld [vmem:[%s9191_s6 + $0x30] sm:$0xe] }
  0x59   : > { %v1298_v35 = vsel %vm9517_vm6, %v1296_v12, %v12729_v50  ;;  %8545 = vmatmul.mubr.msk.bf16.gmra.mxu0 %vm730_vm2, %v7510_v62  ;;  %v664_v33 = vsel %vm9231_vm3, %v659_v37, %v663_v15  ;;  %v1308_v6 = vrot.slane %v9273_v19, 5  ;;  %v12730_v18 = vmov %v12728_v46 }
  0x5a   : > { %v7591_v48 = vcombine.low %v1295_v22, %v1298_v35  ;;  %v7518_v38 = vcombine.low %v654_v60, %v664_v33  ;;  %v1302_v7 = vsel %vm9517_vm6, %v7572_v59, %v12730_v18  ;;  %v12731_v57 = vrot.slane %v9237_v39, 5  ;;  %v1246_v22 = vld [vmem:[%s9191_s6 + $0x3c] sm:$0xe] }
  0x5b   : > { %v1311_v15 = vrot.slane %v9279_v23, 5  ;;  %v1309_v4 = vsel %vm9517_vm6, %v7573_v52, %v1308_v6  ;;  %v1310_v5 = vrot.slane %v1308_v6, 4  ;;  %v7574_v19 = vrot.slane %v1244_v26, 9  ;;  %v9029_v26 = vld [vmem:[%s12674_s1 + $0x40] sm:$0xff]   ;;  %v1248_v6 = vld [vmem:[%s9191_s6 + $0x54] sm:$0xe] }
  0x5c   : > { %v1305_v16 = vsel %vm9517_vm6, %v1303_v1, %v12731_v57  ;;  %8604 = vmatprep.mubr.msk.bf16.mxu0 %vm730_vm2, %v7591_v48  ;;  %v1315_v54 = vrot.slane %v9315_v10, 5  ;;  %8561 = vmatmul.mubr.msk.bf16.gmra.mxu1 %vm730_vm2, %v7518_v38  ;;  %v1318_v39 = vrot.slane %v9324_v24, 5  ;;  %v1322_v59 = vrot.slane %v9363_v9, 5  ;;  %v1247_v1 = vld [vmem:[%s9191_s6 + $0x48] sm:$0xe] }
  0x5d   : > { %8568 = vmatprep.mubr.msk.bf16.mxu1 %vm730_vm2, %v7537_v55  ;;  %v7592_v23 = vcombine.low %v1302_v7, %v1305_v16  ;;  %v1312_v12 = vsel %vm9517_vm6, %v1310_v5, %v1311_v15  ;;  %v7575_v60 = vrot.slane %v1245_v47, 9  ;;  %v1325_v37 = vrot.slane %v9368_v25, 5  ;;  %v1249_v16 = vld [vmem:[%s9191_s6 + $0x60] sm:$0xe]  ;;  %v9027_v15 = vld [vmem:[%s12674_s1 + $0x30] sm:$0xff]  }
  0x5e   : > { %v1317_v46 = vrot.slane %v1315_v54, 4  ;;  %v7593_v62 = vcombine.low %v1309_v4, %v1312_v12  ;;  %v1316_v50 = vsel %vm9517_vm6, %v7574_v19, %v1315_v54  ;;  %v1324_v24 = vrot.slane %v1322_v59, 4 }
  0x5f   : > { %v7576_v35 = vrot.slane %v1246_v22, 9  ;;  %v1329_v52 = vrot.slane %v9401_v21, 5  ;;  %v1332_v55 = vrot.slane %v9410_v42, 5  ;;  %v7577_v48 = vrot.slane %v1247_v1, 9  ;;  %v1252_v1 = vld [vmem:[%s9191_s6 + $0x84] sm:$0xe] }
  0x60   : > { %v1319_v33 = vsel %vm9517_vm6, %v1317_v46, %v1318_v39  ;;  %v1336_v25 = vrot.slane %v9441_v0, 5  ;;  %v1339_v18 = vrot.slane %v9447_v31, 5  ;;  %v7540_v7 = vcombine.low %v9304_v63, %v9315_v10  ;;  %v9605_v63 = vld [vmem:[%s12674_s1 + $0x68] sm:$0xff]  }
  0x61   : > { %8605 = vmatmul.mubr.msk.bf16.vlgmr.msra.gmra.mxu0 %vm730_vm2, %v7592_v23  ;;  %v1331_v38 = vrot.slane %v1329_v52, 4  ;;  %v1323_v57 = vsel %vm9517_vm6, %v7575_v60, %v1322_v59  ;;  %v7594_v47 = vcombine.low %v1316_v50, %v1319_v33  ;;  %v1326_v31 = vsel %vm9517_vm6, %v1324_v24, %v1325_v37  ;;  %v9646_v46 = vld [vmem:[%s9191_s6 + $0x6c] sm:$0xe]  ;;  %v9663_v24 = vld [vmem:[%s9191_s6 + $0x78] sm:$0xe] }
  0x62   : > { %8673 = vmatpush3.bf16.msra.mxu0 %v9309_v3  ;;  %8608 = vmatprep.mubr.msk.bf16.mxu0 %vm730_vm2, %v7593_v62  ;;  %v1338_v42 = vrot.slane %v1336_v25, 4  ;;  %v9599_v3 = vsel %vm9517_vm6, %v7576_v35, %v1329_v52  ;;  %v1343_v4 = vrot.slane %v9474_v53, 5  ;;  %v9617_v5 = vsel %vm9517_vm6, %v7577_v48, %v1336_v25  ;;  %v9739_v33 = vld [vmem:[%s9191_s6 + $0x10] sm:$0xf] }
  0x63   : > { %8674 = vmatprep.subr.bf16.mxu0 %v9029_v26  ;;  %v9613_v10 = vsel %vm9517_vm6, %v1331_v38, %v1332_v55  ;;  %v7578_v19 = vrot.slane %v1248_v6, 9  ;;  %v1346_v54 = vrot.slane %v9482_v44, 5  ;;  %v1350_v39 = vrot.slane %v9213_v13, 5  ;;  %v1253_v55 = vld [vmem:[%s9191_s6 + $0x90] sm:$0xe] }
  0x64   : > { %8569 = vmatmul.mubr.msk.bf16.vlgmr.msra.gmra.mxu1 %vm730_vm2, %v7538_v30  ;;  %v9624_v27 = vsel %vm9517_vm6, %v1338_v42, %v1339_v18  ;;  %v1345_v28 = vrot.slane %v1343_v4, 4  ;;  %v7579_v30 = vrot.slane %v1249_v16, 9  ;;  %v1353_v59 = vrot.slane %v9216_v14, 5  ;;  %v1254_v18 = vld [vmem:[%s9191_s6 + $0x9c] sm:$0xe] }
  0x65   : > { %8637 = vmatpush3.bf16.msra.mxu1 %v9346_v2  ;;  %8572 = vmatprep.mubr.msk.bf16.mxu1 %vm730_vm2, %v7539_v41  ;;  %v7541_v22 = vcombine.low %v9358_v58, %v9363_v9  ;;  %v7595_v44 = vcombine.low %v1323_v57, %v1326_v31  ;;  %v7542_v2 = vcombine.low %v9396_v8, %v9401_v21  ;;  %v9635_v41 = vld [vmem:[%s12674_s1 + $0x58] sm:$0xff]   ;;  %v1352_v52 = vrot.slane %v1350_v39, 4  ;;  %v9766_v8 = vld [vmem:[%s9191_s6 + $0x14] sm:$0x1] }
  0x66   : > { %8638 = vmatprep.subr.bf16.mxu1 %v9027_v15  ;;  %8675 = vmatpush3.bf16.msra.mxu0 %v9029_v26  ;;  %v7596_v23 = vcombine.low %v9599_v3, %v9613_v10  ;;  %v7543_v12 = vcombine.low %v9429_v17, %v9441_v0  ;;  %v7544_v58 = vcombine.low %v9467_v43, %v9474_v53  ;;  %v1357_v26 = vrot.slane %v9252_v56, 5  ;;  %v7699_v21 = vld [vmem:[%s9191_s6 + $0x1c] sm:$0xf] }
  0x67   : > { %v7545_v9 = vcombine.low %v9207_v11, %v9213_v13  ;;  %8744 = vmatprep.subr.bf16.mxu0 %v9605_v63  ;;  %v7597_v62 = vcombine.low %v9617_v5, %v9624_v27  ;;  %v9654_v60 = vsel %vm9517_vm6, %v7578_v19, %v1343_v4  ;;  %v9658_v37 = vsel %vm9517_vm6, %v1345_v28, %v1346_v54  ;;  %v12733_v5 = vld [vmem:[#allocation7_spill] sm:$0xff]  ;;  %v12734_v19 = vld [vmem:[#allocation9_spill] sm:$0xff]  ;;  %v12735_v54 = vld [vmem:[#allocation8_spill] sm:$0xff] }
  0x68   : > { %v7546_v50 = vcombine.low %v9248_v51, %v9252_v56  ;;  %v9668_v35 = vsel %vm9517_vm6, %v7579_v30, %v1350_v39  ;;  %v7580_v48 = vrot.slane %v9646_v46, 9  ;;  %v7582_v25 = vrot.slane %v1252_v1, 9  ;;  %v1255_v30 = vld [vmem:[%s9191_s6 + $0xa8] sm:$0xe]  ;;  %v7695_v27 = vld [vmem:[%s9191_s6 + $0xc] sm:$0xf] }
  0x69   : > { %8609 = vmatmul.mubr.msk.bf16.gmra.mxu0 %vm730_vm2, %v7594_v47  ;;  %8639 = vmatpush3.bf16.msra.mxu1 %v9027_v15  ;;  %v1371_v6 = vrot.slane %v9339_v40, 5  ;;  %v1374_v38 = vrot.slane %v9350_v49, 5  ;;  %v7598_v57 = vcombine.low %v9654_v60, %v9658_v37  ;;  %v1360_v42 = vrot.slane %v9260_v61, 5  ;;  %v12732_v15 = vld [vmem:[#allocation6_spill] sm:$0xff]  ;;  %v7698_v1 = vld [vmem:[%s9191_s6 + $0x18] sm:$0xf] }
  0x6a   : > { %8612 = vmatprep.mubr.msk.bf16.mxu0 %vm730_vm2, %v7595_v44  ;;  %8708 = vmatprep.subr.bf16.mxu1 %v9635_v41  ;;  %v7581_v16 = vrot.slane %v9663_v24, 9  ;;  %v7583_v3 = vrot.slane %v1253_v55, 9  ;;  %v1378_v4 = vrot.slane %v9380_v36, 5  ;;  %v1359_v10 = vrot.slane %v1357_v26, 4  ;;  %v12737_v55 = vld [vmem:[#allocation10_spill] sm:$0xff] }
  0x6b   : > { %v9689_v31 = vsel %vm9517_vm6, %v7582_v25, %v1371_v6  ;;  %v1373_v49 = vrot.slane %v1371_v6, 4  ;;  %v1381_v61 = vrot.slane %v12733_v5, 5  ;;  %v7584_v28 = vrot.slane %v1254_v18, 9  ;;  %v12738_v6 = vld [vmem:[#allocation12_spill] sm:$0xff]  ;;  %v12739_v18 = vld [vmem:[#allocation11_spill] sm:$0xff] }
  0x6c   : > { %8573 = vmatmul.mubr.msk.bf16.gmra.mxu1 %vm730_vm2, %v7540_v7  ;;  %v12736_v7 = vld [vmem:[#allocation4_spill] sm:$0xff]  ;;  %v9704_v46 = vsel %vm9517_vm6, %v7583_v3, %v1378_v4  ;;  %v1385_v24 = vrot.slane %v12734_v19, 5  ;;  %v1388_v25 = vrot.slane %v12737_v55, 5  ;;  %v1392_v3 = vrot.slane %v12738_v6, 5 }
  0x6d   : > { %8576 = vmatprep.mubr.msk.bf16.mxu1 %vm730_vm2, %v7541_v22  ;;  %v1364_v39 = vrot.slane %v12736_v7, 5  ;;  %v9700_v44 = vsel %vm9517_vm6, %v1373_v49, %v1374_v38  ;;  %v1380_v22 = vrot.slane %v1378_v4, 4  ;;  %v7585_v49 = vrot.slane %v1255_v30, 9  ;;  %v12740_v7 = vld [vmem:[#allocation13_spill] sm:$0xff] }
  0x6e   : > { %v1395_v4 = vrot.slane %v12740_v7, 5  ;;  %v9724_v5 = vsel %vm9517_vm6, %v7584_v28, %v1385_v24  ;;  %v1387_v47 = vrot.slane %v1385_v24, 4  ;;  %v1354_v30 = vsel %vm9517_vm6, %v1352_v52, %v1353_v59 }
  0x6f   : > { %v9714_v38 = vsel %vm9517_vm6, %v1380_v22, %v1381_v61  ;;  %v12741_v61 = vld [vmem:[#allocation14_spill] sm:$0xff]  ;;  %v9736_v28 = vsel %vm9517_vm6, %v7585_v49, %v1392_v3  ;;  %v1394_v24 = vrot.slane %v1392_v3, 4  ;;  %v1366_v22 = vrot.slane %v1364_v39, 4 }
  0x70   : > { %v2130_v14 = vshrl.u32 %v7695_v27, 16  ;;  %v2133_v55 = vshll.u32 %v7695_v27, 16  ;;  %v9752_v59 = vsel %vm9517_vm6, %v7580_v48, %v1357_v26  ;;  %v9756_v52 = vsel %vm9517_vm6, %v1359_v10, %v1360_v42 }
  0x71   : > { %8613 = vmatmul.mubr.msk.bf16.gmra.mxu0 %vm730_vm2, %v7596_v23  ;;  %v12742_v23 = vld [vmem:[#allocation5_spill] sm:$0xff]  ;;  %v9762_v27 = vsel %vm9517_vm6, %v1394_v24, %v1395_v4  ;;  %v2139_v42 = vshll.u32 %v9739_v33, 16  ;;  %v7599_v10 = vcombine.low %v9668_v35, %v1354_v30  ;;  %v1399_v49 = vrot.slane %v9496_v32, 5  ;;  %v7701_v24 = vld [vmem:[%s9191_s6 + $0x24] sm:$0xf] }
  0x72   : > { %8616 = vmatprep.mubr.msk.bf16.mxu0 %vm730_vm2, %v7597_v62  ;;  %v1367_v7 = vrot.slane %v12742_v23, 5  ;;  %v9743_v62 = vsel %vm9517_vm6, %v1387_v47, %v1388_v25  ;;  %v1256_v25 = vld [vmem:[%s9191_s6 + $0xb4] sm:$0xe]  ;;  %v2132_v26 = vrot.slane %v2130_v14, 4  ;;  %v2135_v48 = vrot.slane %v2133_v55, 5 }
  0x73   : > { %v2143_v3 = vshrl.u32 %v9739_v33, 16  ;;  %v2154_v4 = vshrl.u32 %v7698_v1, 16  ;;  %v7600_v17 = vcombine.low %v9752_v59, %v9756_v52  ;;  %v1365_v0 = vsel %vm9517_vm6, %v7581_v16, %v1364_v39  ;;  %v7700_v55 = vld [vmem:[%s9191_s6 + $0x20] sm:$0x1]  ;;  %v9790_v47 = vld [vmem:[%s9191_s6 + $0x28] sm:$0xf] }
  0x74   : > { %8577 = vmatmul.mubr.msk.bf16.gmra.mxu1 %vm730_vm2, %v7542_v2  ;;  %v2157_v23 = vshll.u32 %v7698_v1, 16  ;;  %v7586_v14 = vrot.slane %v1256_v25, 9  ;;  %v9787_v2 = vrot.slane %v2139_v42, 5  ;;  %v2163_v30 = vshll.u32 %v7699_v21, 16 }
  0x75   : > { %8580 = vmatprep.mubr.msk.bf16.mxu1 %vm730_vm2, %v7543_v12  ;;  %v1368_v12 = vsel %vm9517_vm6, %v1366_v22, %v1367_v7  ;;  %v2145_v35 = vrot.slane %v2143_v3, 4  ;;  %v1402_v16 = vrot.slane %v9501_v20, 5  ;;  %v2136_v39 = vor.u32 %v2135_v48, %v2132_v26 }
  0x76   : > { %v2149_v1 = vshll.u32 %v9766_v8, 16  ;;  %v2167_v22 = vshrl.u32 %v7699_v21, 16  ;;  %v1401_v7 = vrot.slane %v1399_v49, 4  ;;  %v2156_v59 = vrot.slane %v2154_v4, 4  ;;  %v9808_v21 = vld [vmem:[%s9191_s6 + $0x2c] sm:$0x1] }
  0x77   : > { %v2178_v52 = vshrl.u32 %v7701_v24, 16  ;;  %v2181_v25 = vshll.u32 %v7701_v24, 16  ;;  %v2159_v42 = vrot.slane %v2157_v23, 5  ;;  %v9799_v3 = vrot.slane %v2163_v30, 5 }
  0x78   : > { %v2169_v60 = vrot.slane %v2167_v22, 4  ;;  %v2173_v37 = vshll.u32 %v7700_v55, 16  ;;  %v2146_v20 = vor.u32 %v2145_v35, %v9787_v2  ;;  %v7601_v4 = vcombine.low %v1365_v0, %v1368_v12  ;;  %v7707_v0 = vld [vmem:[%s9191_s6 + $0x3c] sm:$0xf] }
  0x79   : > { %8617 = vmatmul.mubr.msk.bf16.gmra.mxu0 %vm730_vm2, %v7598_v57  ;;  %v7704_v57 = vld [vmem:[%s9191_s6 + $0x30] sm:$0xf]  ;;  %v2180_v26 = vrot.slane %v2178_v52, 4  ;;  %v2183_v48 = vrot.slane %v2181_v25, 5  ;;  %v9815_v55 = vrot.slane %v2136_v39, 4  ;;  %v9817_v43 = vrot.slane %v2149_v1, 5 }
  0x7a   : > { %8620 = vmatprep.mubr.msk.bf16.mxu0 %vm730_vm2, %v7599_v10  ;;  %v2187_v10 = vshll.u32 %v9790_v47, 16  ;;  %v2191_v53 = vshrl.u32 %v9790_v47, 16  ;;  %v9825_v23 = vsel %vm9517_vm6, %v7586_v14, %v1399_v49  ;;  %v9829_v11 = vsel %vm9517_vm6, %v1401_v7, %v1402_v16  ;;  %v9837_v14 = vld [vmem:[%s9191_s6 + $0x40] sm:$0xf]  ;;  %v9116_v16 = vld [vmem:[%s9191_s6 + $0x78] sm:$0xf] }
  0x7b   : > { %v2160_v12 = vor.u32 %v2159_v42, %v2156_v59  ;;  %v2170_v24 = vor.u32 %v2169_v60, %v9799_v3  ;;  %v2184_v35 = vor.u32 %v2183_v48, %v2180_v26  ;;  %v2147_v39 = vrot.slane %v2146_v20, 4  ;;  %v9117_v7 = vld [vmem:[%s9191_s6 + $0x7c] sm:$0xf] }
  0x7c   : > { %8581 = vmatmul.mubr.msk.bf16.gmra.mxu1 %vm730_vm2, %v7544_v58  ;;  %v9821_v58 = vld [vmem:[%s9191_s6 + $0x34] sm:$0xf]  ;;  %v9831_v13 = vrot.slane %v2187_v10, 5  ;;  %v2193_v30 = vrot.slane %v2191_v53, 4  ;;  %v2175_v1 = vrot.slane %v2173_v37, 5  ;;  %v2197_v22 = vshll.u32 %v9808_v21, 16 }
  0x7d   : > { %8584 = vmatprep.mubr.msk.bf16.mxu1 %vm730_vm2, %v7545_v9  ;;  %v2202_v9 = vshrl.u32 %v7704_v57, 16  ;;  %v2205_v49 = vshll.u32 %v7704_v57, 16  ;;  %v7547_v52 = vcombine.low %v9116_v16, %v9117_v7  ;;  %v2211_v25 = vshll.u32 %v9821_v58, 16  ;;  %v9853_v10 = vld [vmem:[%s9191_s6 + $0x38] sm:$0x1] }
  0x7e   : > { %v2194_v59 = vor.u32 %v2193_v30, %v9831_v13  ;;  %v2215_v42 = vshrl.u32 %v9821_v58, 16  ;;  %v7606_v60 = vcombine.low %v9825_v23, %v9829_v11  ;;  %v2161_v20 = vrot.slane %v2160_v12, 4  ;;  %v7710_v30 = vld [vmem:[%s9191_s6 + $0x48] sm:$0xf] }
  0x7f   : > { %v2204_v37 = vrot.slane %v2202_v9, 4  ;;  %v2207_v57 = vrot.slane %v2205_v49, 5  ;;  %v2171_v26 = vrot.slane %v2170_v24, 4  ;;  %v2185_v48 = vrot.slane %v2184_v35, 4 }
  0x80   : > { %v2226_v53 = vshrl.u32 %v7707_v0, 16  ;;  %v2217_v16 = vrot.slane %v2215_v42, 4  ;;  %v2195_v9 = vrot.slane %v2194_v59, 4  ;;  %v2199_v12 = vrot.slane %v2197_v22, 5  ;;  %v9879_v59 = vld [vmem:[%s9191_s6 + $0x4c] sm:$0xf] }
  0x81   : > { %8621 = vmatmul.mubr.msk.bf16.gmra.mxu0 %vm730_vm2, %v7600_v17  ;;  %v2142_v17 = vsel %vm9231_vm3, %v9815_v55, %v9787_v2  ;;  %v2229_v2 = vshll.u32 %v7707_v0, 16  ;;  %v2235_v55 = vshll.u32 %v9837_v14, 16  ;;  %v2239_v35 = vshrl.u32 %v9837_v14, 16 }
  0x82   : > { %8624 = vmatprep.mubr.msk.bf16.mxu0 %vm730_vm2, %v7601_v4  ;;  %v9860_v4 = vrot.slane %v2211_v25, 5  ;;  %v2228_v24 = vrot.slane %v2226_v53, 4  ;;  %v2152_v51 = vsel %vm9231_vm3, %v2147_v39, %v9817_v43  ;;  %v2208_v56 = vor.u32 %v2207_v57, %v2204_v37  ;;  %v7713_v57 = vld [vmem:[%s9191_s6 + $0x54] sm:$0xf] }
  0x83   : > { %v2231_v49 = vrot.slane %v2229_v2, 5  ;;  %v9871_v7 = vrot.slane %v2235_v55, 5  ;;  %v2166_v0 = vsel %vm9231_vm3, %v2161_v20, %v9799_v3  ;;  %v2176_v22 = vsel %vm9231_vm3, %v2171_v26, %v2175_v1  ;;  %v7716_v2 = vld [vmem:[%s9191_s6 + $0x60] sm:$0xf] }
  0x84   : > { %8585 = vmatmul.mubr.msk.bf16.gmra.mxu1 %vm730_vm2, %v7546_v50  ;;  %v9869_v50 = vld [vmem:[%s9191_s6 + $0x44] sm:$0x1]  ;;  %v2250_v25 = vshrl.u32 %v7710_v30, 16  ;;  %v2190_v43 = vsel %vm9231_vm3, %v2185_v48, %v9831_v13  ;;  %v2218_v39 = vor.u32 %v2217_v16, %v9860_v4  ;;  %v2221_v42 = vshll.u32 %v9853_v10, 16  ;;  %v9896_v48 = vld [vmem:[%s9191_s6 + $0x58] sm:$0xf] }
  0x85   : > { %8588 = vmatprep.mubr.msk.bf16.mxu1 %vm730_vm2, %v7547_v52  ;;  %v2241_v52 = vrot.slane %v2239_v35, 4  ;;  %v2253_v37 = vshll.u32 %v7710_v30, 16  ;;  %v12743_v3 = vcombine.low %v9689_v31, %v9700_v44  ;;  %v2200_v1 = vsel %vm9231_vm3, %v2195_v9, %v2199_v12  ;;  %v9909_v12 = vld [vmem:[%s9191_s6 + $0x50] sm:$0x1] }
  0x86   : > { %v2232_v20 = vor.u32 %v2231_v49, %v2228_v24  ;;  %v2245_v26 = vshll.u32 %v9869_v50, 16  ;;  %v12744_v53 = vcombine.low %v9704_v46, %v9714_v38  ;;  %v2209_v30 = vrot.slane %v2208_v56, 4  ;;  %v9913_v49 = vld [vmem:[%s9191_s6 + $0x64] sm:$0xf] }
  0x87   : > { %v2242_v13 = vor.u32 %v2241_v52, %v9871_v7  ;;  %v2252_v31 = vrot.slane %v2250_v25, 4  ;;  %v2255_v44 = vrot.slane %v2253_v37, 5  ;;  %v2259_v16 = vshll.u32 %v9879_v59, 16 }
  0x88   : > { %v9904_v55 = vcombine.low %v2142_v17, %v2152_v51  ;;  %v9906_v9 = vcombine.low %v2166_v0, %v2176_v22  ;;  %v2263_v24 = vshrl.u32 %v9879_v59, 16  ;;  %v2274_v35 = vshrl.u32 %v7713_v57, 16 }
  0x89   : > { %8625 = vmatmul.mubr.msk.bf16.gmra.mxu0 %vm730_vm2, %v12743_v3  ;;  %v12745_v46 = vcombine.low %v9331_v34, %v9339_v40  ;;  %v9919_v38 = vcombine.low %v2190_v43, %v2200_v1  ;;  %v2219_v17 = vrot.slane %v2218_v39, 4  ;;  %v2223_v51 = vrot.slane %v2221_v42, 5  ;;  %v7719_v42 = vld [vmem:[%s9191_s6 + $0x6c] sm:$0xf] }
  0x8a   : > { %8628 = vmatprep.mubr.msk.bf16.mxu0 %vm730_vm2, %v12744_v53  ;;  %v2277_v56 = vshll.u32 %v7713_v57, 16  ;;  %v12746_v0 = vcombine.low %v12732_v15, %v9380_v36  ;;  %v2233_v22 = vrot.slane %v2232_v20, 4  ;;  %v2243_v52 = vrot.slane %v2242_v13, 4  ;;  %v9933_v57 = vld [vmem:[%s9191_s6 + $0x5c] sm:$0x1] }
  0x8b   : > { %v2247_v25 = vrot.slane %v2245_v26, 5  ;;  %v2283_v37 = vshll.u32 %v9896_v48, 16  ;;  %v2214_v34 = vsel %vm9231_vm3, %v2209_v30, %v9860_v4  ;;  %v2256_v40 = vor.u32 %v2255_v44, %v2252_v31 }
  0x8c   : > { %8589 = vmatmul.mubr.msk.bf16.gmra.mxu1 %vm730_vm2, %v12745_v46  ;;  %v9929_v43 = vrot.slane %v2259_v16, 5  ;;  %v2265_v39 = vrot.slane %v2263_v24, 4  ;;  %v2276_v36 = vrot.slane %v2274_v35, 4  ;;  %v2279_v15 = vrot.slane %v2277_v56, 5  ;;  %v9952_v24 = vld [vmem:[%s9191_s6 + $0x70] sm:$0xf] }
  0x8d   : > { %8592 = vmatprep.mubr.msk.bf16.mxu1 %vm730_vm2, %v12746_v0  ;;  %v2287_v3 = vshrl.u32 %v9896_v48, 16  ;;  %v2298_v1 = vshrl.u32 %v7716_v2, 16  ;;  %v2224_v20 = vsel %vm9231_vm3, %v2219_v17, %v2223_v51  ;;  %v2269_v13 = vshll.u32 %v9909_v12, 16  ;;  %v9962_v35 = vld [vmem:[%s9191_s6 + $0x68] sm:$0x1] }
  0x8e   : > { %v2301_v4 = vshll.u32 %v7716_v2, 16  ;;  %v2307_v26 = vshll.u32 %v9913_v49, 16  ;;  %v12747_v53 = vcombine.low %v9724_v5, %v9743_v62  ;;  %v2238_v30 = vsel %vm9231_vm3, %v2233_v22, %v9871_v7  ;;  %v7722_v22 = vld [vmem:[%s9191_s6 + $0x78] sm:$0xf] }
  0x8f   : > { %v2248_v31 = vsel %vm9231_vm3, %v2243_v52, %v2247_v25  ;;  %v9949_v44 = vrot.slane %v2283_v37, 5  ;;  %v2289_v16 = vrot.slane %v2287_v3, 4  ;;  %v12748_v2 = vcombine.low %v9736_v28, %v9762_v27 }
  0x90   : > { %v9958_v5 = vrot.slane %v2256_v40, 4  ;;  %v2266_v62 = vor.u32 %v2265_v39, %v9929_v43  ;;  %v2300_v7 = vrot.slane %v2298_v1, 4  ;;  %v2311_v46 = vshrl.u32 %v9913_v49, 16 }
  0x91   : > { %8629 = vmatmul.mubr.msk.bf16.gmra.mxu0 %vm730_vm2, %v12747_v53  ;;  %v9965_v17 = vcombine.low %v2214_v34, %v2224_v20  ;;  %v2280_v51 = vor.u32 %v2279_v15, %v2276_v36  ;;  %v2303_v56 = vrot.slane %v2301_v4, 5  ;;  %v2322_v0 = vshrl.u32 %v7719_v42, 16  ;;  %v9978_v34 = vld [vmem:[%s9191_s6 + $0x74] sm:$0x1]  ;;  %v9988_v15 = vld [vmem:[%s9191_s6 + $0x7c] sm:$0xf] }
  0x92   : > { %8632 = vmatprep.mubr.msk.bf16.mxu0 %vm730_vm2, %v12748_v2  ;;  %v12749_v28 = vcombine.low %v12735_v54, %v12734_v19  ;;  %v9972_v27 = vrot.slane %v2269_v13, 5  ;;  %v2293_v52 = vshll.u32 %v9933_v57, 16  ;;  %v9975_v25 = vrot.slane %v2307_v26, 5 }
  0x93   : > { %v2313_v37 = vrot.slane %v2311_v46, 4  ;;  %v12750_v40 = vcombine.low %v12739_v18, %v12738_v6  ;;  %v9984_v39 = vcombine.low %v2238_v30, %v2248_v31  ;;  %v2290_v19 = vor.u32 %v2289_v16, %v9949_v44 }
  0x94   : > { %8593 = vmatmul.mubr.msk.bf16.gmra.mxu1 %vm730_vm2, %v12749_v28  ;;  %v2324_v54 = vrot.slane %v2322_v0, 4  ;;  %v2325_v36 = vshll.u32 %v7719_v42, 16  ;;  %v2262_v3 = vsel %vm9231_vm3, %v9958_v5, %v9929_v43  ;;  %v2267_v1 = vrot.slane %v2266_v62, 4  ;;  %v7725_v42 = vld [vmem:[%s9191_s6 + $0x84] sm:$0xf]  ;;  %v9036_v43 = vld [vmem:[%s9191_s6 + $0xc] sm:$0xff]  }
  0x95   : > { %8596 = vmatprep.mubr.msk.bf16.mxu1 %vm730_vm2, %v12750_v40  ;;  %v2331_v20 = vshll.u32 %v9952_v24, 16  ;;  %v2335_v6 = vshrl.u32 %v9952_v24, 16  ;;  %v2281_v18 = vrot.slane %v2280_v51, 4  ;;  %v2304_v13 = vor.u32 %v2303_v56, %v2300_v7  ;;  %v10013_v51 = vld [vmem:[%s9191_s6 + $0x80] sm:$0x1] }
  0x96   : > { %v2317_v4 = vshll.u32 %v9962_v35, 16  ;;  %v2327_v26 = vrot.slane %v2325_v36, 5  ;;  %v2295_v53 = vrot.slane %v2293_v52, 5  ;;  %v2314_v30 = vor.u32 %v2313_v37, %v9975_v25 }
  0x97   : > { %v9999_v31 = vrot.slane %v2331_v20, 5  ;;  %v2346_v16 = vshrl.u32 %v7722_v22, 16  ;;  %v2291_v2 = vrot.slane %v2290_v19, 4  ;;  %v2337_v62 = vrot.slane %v2335_v6, 4  ;;  %v10040_v20 = vld [vmem:[%s9191_s6 + $0x94] sm:$0xf] }
  0x98   : > { %v2328_v5 = vor.u32 %v2327_v26, %v2324_v54  ;;  %v2341_v7 = vshll.u32 %v9978_v34, 16  ;;  %v2272_v46 = vsel %vm9231_vm3, %v2267_v1, %v9972_v27  ;;  %v2349_v56 = vshll.u32 %v7722_v22, 16  ;;  %v7728_v54 = vld [vmem:[%s9191_s6 + $0x90] sm:$0xf]  ;;  %12753 = vst [vmem:[#allocation7_spill] sm:$0xff] %v10040_v20  ;;  %v9038_v6 = vld [vmem:[%s9191_s6 + $0x18] sm:$0xff]  }
  0x99   : > { %8633 = vmatmul.mubr.msk.bf16.gmra.mxu0 %vm730_vm2, %v7606_v60  ;;  %v2355_v23 = vshll.u32 %v9988_v15, 16  ;;  %v2359_v11 = vshrl.u32 %v9988_v15, 16  ;;  %v10018_v60 = vld [vmem:[%s9191_s6 + $0x88] sm:$0xf]  ;;  %v2286_v0 = vsel %vm9231_vm3, %v2281_v18, %v9949_v44  ;;  %v2319_v28 = vrot.slane %v2317_v4, 5 }
  0x9a   : > { %8676 = vmatprep.mubr.msk.bf16.mxu0 %vm730_vm2, %v9904_v55  ;;  %12751 = vst [vmem:[#allocation6_spill] sm:$0xff] %v10018_v60  ;;  %v2305_v55 = vrot.slane %v2304_v13, 4  ;;  %v2338_v52 = vor.u32 %v2337_v62, %v9999_v31  ;;  %v12752_v27 = vcombine.low %v12741_v61, %v9496_v32  ;;  %v2315_v22 = vrot.slane %v2314_v30, 4  ;;  %v9049_v32 = vld [vmem:[%s12674_s1 + $0x60] sm:$0xff]   ;;  %v9047_v62 = vld [vmem:[%s12674_s1 + $0x50] sm:$0xff]  }
  0x9b   : > { %v2348_v37 = vrot.slane %v2346_v16, 4  ;;  %v2351_v40 = vrot.slane %v2349_v56, 5  ;;  %v2370_v19 = vshrl.u32 %v7725_v42, 16  ;;  %v2296_v44 = vsel %vm9231_vm3, %v2291_v2, %v2295_v53  ;;  %v9040_v2 = vld [vmem:[%s9191_s6 + $0x24] sm:$0xff]  }
  0x9c   : > { %8597 = vmatmul.mubr.msk.bf16.gmra.mxu1 %vm730_vm2, %v12752_v27  ;;  %v10032_v36 = vrot.slane %v2328_v5, 4  ;;  %v10034_v1 = vrot.slane %v2341_v7, 5  ;;  %v2373_v61 = vshll.u32 %v7725_v42, 16  ;;  %v10043_v18 = vrot.slane %v2355_v23, 5 }
  0x9d   : > { %8640 = vmatprep.mubr.msk.bf16.mxu1 %vm730_vm2, %v9036_v43  ;;  %v2361_v13 = vrot.slane %v2359_v11, 4  ;;  %v2372_v4 = vrot.slane %v2370_v19, 4  ;;  %v2379_v26 = vshll.u32 %v10018_v60, 16  ;;  %v2339_v53 = vrot.slane %v2338_v52, 4  ;;  %v10066_v52 = vld [vmem:[%s9191_s6 + $0x8c] sm:$0x1] }
  0x9e   : > { %v2365_v30 = vshll.u32 %v10013_v51, 16  ;;  %v2375_v16 = vrot.slane %v2373_v61, 5  ;;  %v2383_v43 = vshrl.u32 %v10018_v60, 16  ;;  %v2310_v42 = vsel %vm9231_vm3, %v2305_v55, %v9975_v25  ;;  %12754 = vst [vmem:[#allocation9_spill] sm:$0xff] %v10066_v52  ;;  %v10196_v60 = vld [vmem:[%s9191_s6 + $0xc8] sm:$0x1] }
  0x9f   : > { %v2320_v5 = vsel %vm9231_vm3, %v2315_v22, %v2319_v28  ;;  %v2352_v7 = vor.u32 %v2351_v40, %v2348_v37  ;;  %v10057_v56 = vrot.slane %v2379_v26, 5  ;;  %v10061_v23 = vcombine.low %v2262_v3, %v2272_v46  ;;  %v7731_v28 = vld [vmem:[%s9191_s6 + $0x9c] sm:$0xf]  ;;  %v10091_v40 = vld [vmem:[%s12674_s1 + $0x88] sm:$0xff]  }
  0xa0   : > { %v10063_v11 = vcombine.low %v2286_v0, %v2296_v44  ;;  %v2385_v25 = vrot.slane %v2383_v43, 4  ;;  %v2394_v55 = vshrl.u32 %v7728_v54, 16  ;;  %v2362_v27 = vor.u32 %v2361_v13, %v10043_v18  ;;  %12756 = vst [vmem:[#allocation4_spill] sm:$0xff] %v10091_v40 }
  0xa1   : > { %8677 = vmatmul.mubr.msk.bf16.vlgmr.msra.gmra.mxu0 %vm730_vm2, %v9906_v9  ;;  %v2376_v22 = vor.u32 %v2375_v16, %v2372_v4  ;;  %v2397_v37 = vshll.u32 %v7728_v54, 16  ;;  %v2403_v9 = vshll.u32 %v10040_v20, 16  ;;  %v10074_v3 = vcombine.low %v2310_v42, %v2320_v5  ;;  %v7734_v16 = vld [vmem:[%s9191_s6 + $0xa8] sm:$0xf] }
  0xa2   : > { %8745 = vmatpush3.bf16.msra.mxu0 %v9605_v63  ;;  %8680 = vmatprep.mubr.msk.bf16.mxu0 %vm730_vm2, %v9919_v38  ;;  %v2334_v46 = vsel %vm9231_vm3, %v10032_v36, %v9999_v31  ;;  %v2344_v63 = vsel %vm9231_vm3, %v2339_v53, %v10034_v1  ;;  %v10083_v0 = vrot.slane %v2365_v30, 5  ;;  %v10086_v38 = vld [vmem:[%s9191_s6 + $0xa0] sm:$0xf]  ;;  %v10094_v19 = vrot.slane %v2352_v7, 4  ;;  %v10102_v36 = vld [vmem:[%s12674_s1 + $0x78] sm:$0xff]  }
  0xa3   : > { %8746 = vmatprep.subr.bf16.mxu0 %v9049_v32  ;;  %12755 = vst [vmem:[#allocation8_spill] sm:$0xff] %v10086_v38  ;;  %v2386_v31 = vor.u32 %v2385_v25, %v10057_v56  ;;  %v2389_v54 = vshll.u32 %v10066_v52, 16  ;;  %v2407_v44 = vshrl.u32 %v10040_v20, 16  ;;  %12757 = vst [vmem:[#allocation10_spill] sm:$0xff] %v10102_v36  ;;  %v10107_v1 = vld [vmem:[%s9191_s6 + $0x98] sm:$0x1] }
  0xa4   : > { %8641 = vmatmul.mubr.msk.bf16.vlgmr.msra.gmra.mxu1 %vm730_vm2, %v9038_v6  ;;  %12758 = vst [vmem:[#allocation12_spill] sm:$0xff] %v10107_v1  ;;  %v2396_v61 = vrot.slane %v2394_v55, 4  ;;  %v2399_v6 = vrot.slane %v2397_v37, 5  ;;  %v2418_v13 = vshrl.u32 %v7731_v28, 16  ;;  %v2421_v4 = vshll.u32 %v7731_v28, 16  ;;  %v9041_v25 = vld [vmem:[%s9191_s6 + $0x30] sm:$0xff]  }
  0xa5   : > { %8709 = vmatpush3.bf16.msra.mxu1 %v9635_v41  ;;  %8644 = vmatprep.mubr.msk.bf16.mxu1 %vm730_vm2, %v9040_v2  ;;  %v10109_v26 = vrot.slane %v2362_v27, 4  ;;  %v10111_v53 = vrot.slane %v2376_v22, 4  ;;  %v10113_v30 = vrot.slane %v2403_v9, 5  ;;  %v2427_v41 = vshll.u32 %v10086_v38, 16  ;;  %v10119_v7 = vld [vmem:[%s9191_s6 + $0xac] sm:$0xf] }
  0xa6   : > { %8710 = vmatprep.subr.bf16.mxu1 %v9047_v62  ;;  %8747 = vmatpush3.bf16.msra.mxu0 %v9049_v32  ;;  %v2409_v43 = vrot.slane %v2407_v44, 4  ;;  %v2420_v2 = vrot.slane %v2418_v13, 4  ;;  %v2423_v42 = vrot.slane %v2421_v4, 5  ;;  %v2431_v5 = vshrl.u32 %v10086_v38, 16  ;;  %12759 = vst [vmem:[#allocation11_spill] sm:$0xff] %v10119_v7  ;;  %v9042_v22 = vld [vmem:[%s9191_s6 + $0x3c] sm:$0xff]  }
  0xa7   : > { %8816 = vmatprep.subr.bf16.mxu0 %v10091_v40  ;;  %v10123_v32 = vcombine.low %v2334_v46, %v2344_v63  ;;  %v10125_v55 = vrot.slane %v2386_v31, 4  ;;  %v10127_v28 = vrot.slane %v2389_v54, 5  ;;  %v2413_v27 = vshll.u32 %v10107_v1, 16  ;;  %v10134_v9 = vld [vmem:[%s9191_s6 + $0xa4] sm:$0x1] }
  0xa8   : > { %v2400_v37 = vor.u32 %v2399_v6, %v2396_v61  ;;  %12760 = vst [vmem:[#allocation13_spill] sm:$0xff] %v10134_v9  ;;  %v10136_v44 = vrot.slane %v2427_v41, 5  ;;  %v2433_v46 = vrot.slane %v2431_v5, 4  ;;  %v2442_v63 = vshrl.u32 %v7734_v16, 16  ;;  %v10156_v13 = vld [vmem:[%s9191_s6 + $0xb0] sm:$0x1] }
  0xa9   : > { %8681 = vmatmul.mubr.msk.bf16.gmra.mxu0 %vm730_vm2, %v9965_v17  ;;  %8711 = vmatpush3.bf16.msra.mxu1 %v9047_v62  ;;  %v2445_v62 = vshll.u32 %v7734_v16, 16  ;;  %v2451_v54 = vshll.u32 %v10119_v7, 16  ;;  %v2410_v61 = vor.u32 %v2409_v43, %v10113_v30  ;;  %v2424_v6 = vor.u32 %v2423_v42, %v2420_v2  ;;  %12761 = vst [vmem:[#allocation14_spill] sm:$0xff] %v10156_v13  ;;  %v7737_v41 = vld [vmem:[%s9191_s6 + $0xb4] sm:$0xf] }
  0xaa   : > { %8684 = vmatprep.mubr.msk.bf16.mxu0 %vm730_vm2, %v9984_v39  ;;  %8780 = vmatprep.subr.bf16.mxu1 %v10102_v36  ;;  %v2444_v4 = vrot.slane %v2442_v63, 4  ;;  %v2437_v16 = vshll.u32 %v10134_v9, 16  ;;  %v2455_v17 = vshrl.u32 %v10119_v7, 16  ;;  %v10165_v36 = vld [vmem:[%s9191_s6 + $0xb8] sm:$0xf]  ;;  %v2392_v43 = vsel %vm9231_vm3, %v10125_v55, %v10127_v28 }
  0xab   : > { %v2447_v5 = vrot.slane %v2445_v62, 5  ;;  %v10161_v31 = vrot.slane %v2451_v54, 5  ;;  %12762 = vst [vmem:[#allocation5_spill] sm:$0xff] %v10165_v36  ;;  %v10172_v2 = vrot.slane %v2400_v37, 4  ;;  %v10174_v42 = vrot.slane %v2413_v27, 5  ;;  %v9043_v27 = vld [vmem:[%s9191_s6 + $0x48] sm:$0xff]  }
  0xac   : > { %8645 = vmatmul.mubr.msk.bf16.gmra.mxu1 %vm730_vm2, %v9041_v25  ;;  %v2434_v25 = vor.u32 %v2433_v46, %v10136_v44  ;;  %v2457_v63 = vrot.slane %v2455_v17, 4  ;;  %v2461_v62 = vshll.u32 %v10156_v13, 16  ;;  %v10179_v54 = vld [vmem:[%s9191_s6 + $0xbc] sm:$0x1]  ;;  %v2466_v39 = vshrl.u32 %v7737_v41, 16 }
  0xad   : > { %8648 = vmatprep.mubr.msk.bf16.mxu1 %vm730_vm2, %v9042_v22  ;;  %v2469_v22 = vshll.u32 %v7737_v41, 16  ;;  %v2411_v40 = vrot.slane %v2410_v61, 4  ;;  %v2448_v7 = vor.u32 %v2447_v5, %v2444_v4  ;;  %v2475_v9 = vshll.u32 %v10165_v36, 16  ;;  %v7740_v28 = vld [vmem:[%s9191_s6 + $0xc0] sm:$0xf]  ;;  %v9044_v41 = vld [vmem:[%s9191_s6 + $0x54] sm:$0xff]  }
  0xae   : > { %v2479_v55 = vshrl.u32 %v10165_v36, 16  ;;  %v2425_v37 = vrot.slane %v2424_v6, 4  ;;  %v2439_v38 = vrot.slane %v2437_v16, 5  ;;  %v2458_v46 = vor.u32 %v2457_v63, %v10161_v31  ;;  %v10187_v13 = vld [vmem:[%s9191_s6 + $0xc4] sm:$0xf] }
  0xaf   : > { %v2468_v17 = vrot.slane %v2466_v39, 4  ;;  %v2471_v61 = vrot.slane %v2469_v22, 5  ;;  %v2477_v4 = vrot.slane %v2475_v9, 5  ;;  %v2485_v1 = vshll.u32 %v10179_v54, 16 }
  0xb0   : > { %v2481_v5 = vrot.slane %v2479_v55, 4  ;;  %v2435_v6 = vrot.slane %v2434_v25, 4  ;;  %v2463_v16 = vrot.slane %v2461_v62, 5  ;;  %v2490_v36 = vshrl.u32 %v7740_v28, 16 }
  0xb1   : > { %8685 = vmatmul.mubr.msk.bf16.gmra.mxu0 %vm730_vm2, %v10061_v23  ;;  %v2493_v63 = vshll.u32 %v7740_v28, 16  ;;  %v2449_v39 = vrot.slane %v2448_v7, 4  ;;  %v2472_v20 = vor.u32 %v2471_v61, %v2468_v17  ;;  %v2499_v23 = vshll.u32 %v10187_v13, 16  ;;  %v9045_v61 = vld [vmem:[%s9191_s6 + $0x60] sm:$0xff]  }
  0xb2   : > { %8688 = vmatprep.mubr.msk.bf16.mxu0 %vm730_vm2, %v10063_v11  ;;  %v2482_v52 = vor.u32 %v2481_v5, %v2477_v4  ;;  %v2459_v9 = vrot.slane %v2458_v46, 4  ;;  %v2492_v22 = vrot.slane %v2490_v36, 4  ;;  %v2503_v11 = vshrl.u32 %v10187_v13, 16 }
  0xb3   : > { %v2495_v55 = vrot.slane %v2493_v63, 5  ;;  %v2473_v25 = vrot.slane %v2472_v20, 4  ;;  %v2487_v7 = vrot.slane %v2485_v1, 5  ;;  %v10202_v28 = vrot.slane %v2499_v23, 5 }
  0xb4   : > { %8649 = vmatmul.mubr.msk.bf16.gmra.mxu1 %vm730_vm2, %v9043_v27  ;;  %v2483_v62 = vrot.slane %v2482_v52, 4  ;;  %v12763_v27 = vsel %vm9231_vm3, %v10109_v26, %v10083_v0  ;;  %v12764_v36 = vsel %vm9231_vm3, %v10094_v19, %v10043_v18  ;;  %v2509_v20 = vshll.u32 %v10196_v60, 16  ;;  %v7783_v26 = vld [vmem:[%s9191_s6 + $0x24] sm:$0xe] }
  0xb5   : > { %8652 = vmatprep.mubr.msk.bf16.mxu1 %vm730_vm2, %v9044_v41  ;;  %v7756_v46 = vcombine.low %v12764_v36, %v12763_v27  ;;  %v2496_v17 = vor.u32 %v2495_v55, %v2492_v22  ;;  %v2505_v41 = vrot.slane %v2503_v11, 4  ;;  %v12765_v52 = vsel %vm9231_vm3, %v10111_v53, %v10057_v56 }
  0xb6   : > { %v7757_v1 = vcombine.low %v12765_v52, %v2392_v43  ;;  %v2406_v0 = vsel %vm9231_vm3, %v10172_v2, %v10113_v30  ;;  %v2416_v18 = vsel %vm9231_vm3, %v2411_v40, %v10174_v42  ;;  %v2430_v19 = vsel %vm9231_vm3, %v2425_v37, %v10136_v44  ;;  %v10241_v2 = vld [vmem:[%s9191_s6 + $0xc] sm:$0xe]  ;;  %v7784_v37 = vld [vmem:[%s9191_s6 + $0x30] sm:$0xe] }
  0xb7   : > { %v2440_v56 = vsel %vm9231_vm3, %v2435_v6, %v2439_v38  ;;  %v2454_v53 = vsel %vm9231_vm3, %v2449_v39, %v10161_v31  ;;  %v2464_v30 = vsel %vm9231_vm3, %v2459_v9, %v2463_v16  ;;  %v2506_v43 = vor.u32 %v2505_v41, %v10202_v28  ;;  %v9046_v40 = vld [vmem:[%s9191_s6 + $0x6c] sm:$0xff]   ;;  %v7785_v9 = vld [vmem:[%s9191_s6 + $0x3c] sm:$0xe] }
  0xb8   : > { %v2478_v44 = vsel %vm9231_vm3, %v2473_v25, %v2477_v4  ;;  %v2488_v38 = vsel %vm9231_vm3, %v2483_v62, %v2487_v7  ;;  %v10250_v42 = vrot.slane %v2496_v17, 4  ;;  %v2885_v31 = vrot.slane %v9739_v33, 5  ;;  %v7786_v25 = vld [vmem:[%s9191_s6 + $0x48] sm:$0xe]  ;;  %v9055_v33 = vld [vmem:[%s9191_s6 + $0xc0] sm:$0xff]  }
  0xb9   : > { %8689 = vmatmul.mubr.msk.bf16.gmra.mxu0 %vm730_vm2, %v10074_v3  ;;  %v10256_v5 = vcombine.low %v2406_v0, %v2416_v18  ;;  %v10258_v3 = vrot.slane %v2506_v43, 4  ;;  %v10260_v6 = vrot.slane %v2509_v20, 5  ;;  %v7799_v16 = vrot.slane %v7783_v26, 9  ;;  %v7787_v20 = vld [vmem:[%s9191_s6 + $0x54] sm:$0xe]  ;;  %v9048_v26 = vld [vmem:[%s9191_s6 + $0x78] sm:$0xff]  }
  0xba   : > { %8692 = vmatprep.mubr.msk.bf16.mxu0 %vm730_vm2, %v10123_v32  ;;  %v10262_v4 = vcombine.low %v2430_v19, %v2440_v56  ;;  %v10264_v63 = vcombine.low %v2454_v53, %v2464_v30  ;;  %v7797_v39 = vrot.slane %v10241_v2, 9  ;;  %v2899_v23 = vrot.slane %v9790_v47, 5  ;;  %v7788_v53 = vld [vmem:[%s9191_s6 + $0x60] sm:$0xe] }
  0xbb   : > { %v10270_v32 = vcombine.low %v2478_v44, %v2488_v38  ;;  %v2888_v22 = vrot.slane %v9766_v8, 5  ;;  %v2902_v55 = vrot.slane %v9808_v21, 5  ;;  %v7800_v11 = vrot.slane %v7784_v37, 9  ;;  %v7789_v37 = vld [vmem:[%s9191_s6 + $0x6c] sm:$0xe] }
  0xbc   : > { %8653 = vmatmul.mubr.msk.bf16.gmra.mxu1 %vm730_vm2, %v9045_v61  ;;  %v2502_v47 = vsel %vm9231_vm3, %v10250_v42, %v10202_v28  ;;  %v10282_v62 = vrot.slane %v2885_v31, 4  ;;  %v10286_v7 = vsel %vm9517_vm6, %v7799_v16, %v2899_v23  ;;  %v2901_v21 = vrot.slane %v2899_v23, 4  ;;  %v9056_v42 = vld [vmem:[%s9191_s6 + $0x18] sm:$0xff]  }
  0xbd   : > { %8656 = vmatprep.mubr.msk.bf16.mxu1 %vm730_vm2, %v9046_v40  ;;  %v2512_v27 = vsel %vm9231_vm3, %v10258_v3, %v10260_v6  ;;  %v2906_v36 = vrot.slane %v9821_v58, 5  ;;  %v2909_v17 = vrot.slane %v9853_v10, 5  ;;  %v7801_v41 = vrot.slane %v7785_v9, 9  ;;  %v7790_v9 = vld [vmem:[%s9191_s6 + $0x78] sm:$0xe] }
  0xbe   : > { %v10297_v52 = vsel %vm9517_vm6, %v2901_v21, %v2902_v55  ;;  %v2913_v0 = vrot.slane %v9837_v14, 5  ;;  %v2916_v18 = vrot.slane %v9869_v50, 5  ;;  %v7802_v19 = vrot.slane %v7786_v25, 9  ;;  %v9050_v14 = vld [vmem:[%s9191_s6 + $0x84] sm:$0xff]   ;;  %v7782_v6 = vld [vmem:[%s9191_s6 + $0x18] sm:$0xe] }
  0xbf   : > { %v7819_v61 = vcombine.low %v10286_v7, %v10297_v52  ;;  %v10306_v58 = vsel %vm9517_vm6, %v7800_v11, %v2906_v36  ;;  %v2908_v10 = vrot.slane %v2906_v36, 4  ;;  %v2920_v56 = vrot.slane %v9879_v59, 5 }
  0xc0   : > { %v10314_v50 = vsel %vm9517_vm6, %v7801_v41, %v2913_v0  ;;  %v2915_v30 = vrot.slane %v2913_v0, 4  ;;  %v2923_v43 = vrot.slane %v9909_v12, 5  ;;  %v7803_v40 = vrot.slane %v7787_v20, 9  ;;  %v7791_v41 = vld [vmem:[%s9191_s6 + $0x84] sm:$0xe] }
  0xc1   : > { %8693 = vmatmul.mubr.msk.bf16.gmra.mxu0 %vm730_vm2, %v7756_v46  ;;  %v10320_v44 = vsel %vm9517_vm6, %v2908_v10, %v2909_v17  ;;  %v10324_v59 = vsel %vm9517_vm6, %v7802_v19, %v2920_v56  ;;  %v2922_v46 = vrot.slane %v2920_v56, 4  ;;  %v2927_v38 = vrot.slane %v9896_v48, 5  ;;  %v7792_v56 = vld [vmem:[%s9191_s6 + $0x90] sm:$0xe] }
  0xc2   : > { %8696 = vmatprep.mubr.msk.bf16.mxu0 %vm730_vm2, %v7757_v1  ;;  %v7820_v16 = vcombine.low %v10306_v58, %v10320_v44  ;;  %v10332_v12 = vsel %vm9517_vm6, %v2915_v30, %v2916_v18  ;;  %v2930_v1 = vrot.slane %v9933_v57, 5  ;;  %v7804_v23 = vrot.slane %v7788_v53, 9  ;;  %v9051_v53 = vld [vmem:[%s9191_s6 + $0x90] sm:$0xff]  }
  0xc3   : > { %v7821_v55 = vcombine.low %v10314_v50, %v10332_v12  ;;  %v10341_v48 = vsel %vm9517_vm6, %v2922_v46, %v2923_v43  ;;  %v10345_v11 = vsel %vm9517_vm6, %v7803_v40, %v2927_v38  ;;  %v2929_v25 = vrot.slane %v2927_v38, 4  ;;  %v12766_v38 = vld [vmem:[#allocation6_spill] sm:$0xff] }
  0xc4   : > { %8657 = vmatmul.mubr.msk.bf16.gmra.mxu1 %vm730_vm2, %v9048_v26  ;;  %v7822_v57 = vcombine.low %v10324_v59, %v10341_v48  ;;  %v2934_v21 = vrot.slane %v9913_v49, 5  ;;  %v2937_v36 = vrot.slane %v9962_v35, 5  ;;  %v7805_v17 = vrot.slane %v7789_v37, 9  ;;  %v9065_v59 = vld [vmem:[%s9191_s6 + $0x6c] sm:$0xff]   ;;  %v9066_v48 = vld [vmem:[%s9191_s6 + $0x78] sm:$0xff]  }
  0xc5   : > { %8660 = vmatprep.mubr.msk.bf16.mxu1 %vm730_vm2, %v9050_v14  ;;  %v10355_v20 = vsel %vm9517_vm6, %v2929_v25, %v2930_v1  ;;  %v2941_v0 = vrot.slane %v9952_v24, 5  ;;  %v2944_v18 = vrot.slane %v9978_v34, 5  ;;  %v7806_v19 = vrot.slane %v7790_v9, 9  ;;  %v9052_v14 = vld [vmem:[%s9191_s6 + $0x9c] sm:$0xff]  }
  0xc6   : > { %v10363_v49 = vsel %vm9517_vm6, %v7804_v23, %v2934_v21  ;;  %v2936_v35 = vrot.slane %v2934_v21, 4  ;;  %v2948_v10 = vrot.slane %v9988_v15, 5  ;;  %v2951_v30 = vrot.slane %v10013_v51, 5  ;;  %v7793_v1 = vld [vmem:[%s9191_s6 + $0x9c] sm:$0xe] }
  0xc7   : > { %v10371_v24 = vsel %vm9517_vm6, %v7805_v17, %v2941_v0  ;;  %v2943_v34 = vrot.slane %v2941_v0, 4  ;;  %v7807_v43 = vrot.slane %v7791_v41, 9  ;;  %v2955_v37 = vrot.slane %v12766_v38, 5  ;;  %v7794_v23 = vld [vmem:[%s9191_s6 + $0xa8] sm:$0xe]  ;;  %v12767_v9 = vld [vmem:[#allocation9_spill] sm:$0xff] }
  0xc8   : > { %v10378_v40 = vsel %vm9517_vm6, %v2936_v35, %v2937_v36  ;;  %v10382_v15 = vsel %vm9517_vm6, %v7806_v19, %v2948_v10  ;;  %v2950_v46 = vrot.slane %v2948_v10, 4  ;;  %v2958_v25 = vrot.slane %v12767_v9, 5  ;;  %v12769_v35 = vld [vmem:[#allocation12_spill] sm:$0xff]  ;;  %v12771_v38 = vld [vmem:[#allocation13_spill] sm:$0xff]  ;;  %v9053_v36 = vld [vmem:[%s9191_s6 + $0xa8] sm:$0xff]  }
  0xc9   : > { %8697 = vmatmul.mubr.msk.bf16.gmra.mxu0 %vm730_vm2, %v10256_v5  ;;  %v10393_v5 = vsel %vm9517_vm6, %v2943_v34, %v2944_v18  ;;  %v7808_v21 = vrot.slane %v7792_v56, 9  ;;  %v2957_v41 = vrot.slane %v2955_v37, 4  ;;  %v12768_v18 = vld [vmem:[#allocation7_spill] sm:$0xff]  ;;  %v2965_v10 = vrot.slane %v12769_v35, 5  ;;  %v7795_v34 = vld [vmem:[%s9191_s6 + $0xb4] sm:$0xe] }
  0xca   : > { %8700 = vmatprep.mubr.msk.bf16.mxu0 %vm730_vm2, %v10262_v4  ;;  %v10400_v17 = vsel %vm9517_vm6, %v2950_v46, %v2951_v30  ;;  %v10404_v4 = vsel %vm9517_vm6, %v7807_v43, %v2955_v37  ;;  %v2962_v19 = vrot.slane %v12768_v18, 5  ;;  %v7809_v56 = vrot.slane %v7793_v1, 9  ;;  %v12770_v43 = vld [vmem:[#allocation8_spill] sm:$0xff]  ;;  %v12772_v35 = vld [vmem:[#allocation11_spill] sm:$0xff]  ;;  %v7796_v0 = vld [vmem:[%s9191_s6 + $0xc0] sm:$0xe] }
  0xcb   : > { %v10415_v30 = vsel %vm9517_vm6, %v2957_v41, %v2958_v25  ;;  %v2969_v46 = vrot.slane %v12770_v43, 5  ;;  %v7810_v37 = vrot.slane %v7794_v23, 9  ;;  %v12773_v43 = vld [vmem:[#allocation14_spill] sm:$0xff]  ;;  %v7811_v23 = vrot.slane %v7795_v34, 9 }
  0xcc   : > { %8661 = vmatmul.mubr.msk.bf16.gmra.mxu1 %vm730_vm2, %v9051_v53  ;;  %v2972_v53 = vrot.slane %v12771_v38, 5  ;;  %v10423_v1 = vsel %vm9517_vm6, %v7808_v21, %v2962_v19  ;;  %v2964_v18 = vrot.slane %v2962_v19, 4  ;;  %v2979_v38 = vrot.slane %v12773_v43, 5 }
  0xcd   : > { %8664 = vmatprep.mubr.msk.bf16.mxu1 %vm730_vm2, %v9052_v14  ;;  %v2976_v14 = vrot.slane %v12772_v35, 5  ;;  %v10429_v25 = vsel %vm9517_vm6, %v7809_v56, %v2969_v46  ;;  %v2971_v41 = vrot.slane %v2969_v46, 4  ;;  %v12774_v35 = vld [vmem:[#allocation5_spill] sm:$0xff]  ;;  %v9054_v56 = vld [vmem:[%s9191_s6 + $0xb4] sm:$0xff]   ;;  %v2886_v3 = vsel %vm9517_vm6, %v7797_v39, %v2885_v31 }
  0xce   : > { %v10435_v9 = vsel %vm9517_vm6, %v2964_v18, %v2965_v10  ;;  %v2983_v51 = vrot.slane %v12774_v35, 5  ;;  %v2986_v10 = vrot.slane %v10179_v54, 5  ;;  %v7812_v18 = vrot.slane %v7796_v0, 9  ;;  %v9060_v35 = vld [vmem:[%s9191_s6 + $0x30] sm:$0xff]  }
  0xcf   : > { %v10439_v21 = vsel %vm9517_vm6, %v7810_v37, %v2976_v14  ;;  %v2978_v19 = vrot.slane %v2976_v14, 4  ;;  %v10449_v46 = vsel %vm9517_vm6, %v2971_v41, %v2972_v53  ;;  %v2990_v0 = vrot.slane %v10187_v13, 5  ;;  %v9118_v41 = vld [vmem:[%s9191_s6 + $0x1c] sm:$0xf] }
  0xd0   : > { %v10462_v14 = vsel %vm9517_vm6, %v7811_v23, %v2983_v51  ;;  %v2985_v53 = vrot.slane %v2983_v51, 4  ;;  %v2892_v43 = vrot.slane %v9118_v41, 5  ;;  %v2889_v28 = vsel %vm9517_vm6, %v10282_v62, %v2888_v22  ;;  %v9119_v22 = vld [vmem:[%s9191_s6 + $0x20] sm:$0x1]  ;;  %v12775_v41 = vld [vmem:[#allocation4_spill] sm:$0xff] }
  0xd1   : > { %8701 = vmatmul.mubr.msk.bf16.gmra.mxu0 %vm730_vm2, %v10264_v63  ;;  %v10458_v63 = vsel %vm9517_vm6, %v2978_v19, %v2979_v38  ;;  %v10489_v51 = vsel %vm9517_vm6, %v7812_v18, %v2990_v0  ;;  %v7817_v8 = vcombine.low %v2886_v3, %v2889_v28  ;;  %v7798_v31 = vrot.slane %v7782_v6, 9  ;;  %v9058_v19 = vld [vmem:[%s9191_s6 + $0x24] sm:$0xff]   ;;  %v10527_v18 = vld [vmem:[%s9191_s6 + $0x1c] sm:$0xf] }
  0xd2   : > { %8704 = vmatprep.mubr.msk.bf16.mxu0 %vm730_vm2, %v10270_v32  ;;  %v2993_v32 = vrot.slane %v10196_v60, 5  ;;  %v10472_v38 = vsel %vm9517_vm6, %v2985_v53, %v2986_v10  ;;  %v7762_v60 = vcombine.low %v2502_v47, %v2512_v27  ;;  %v2894_v39 = vrot.slane %v2892_v43, 4  ;;  %v7921_v10 = vld [vmem:[%s9191_s6 + $0x18] sm:$0xf] }
  0xd3   : > { %v2895_v62 = vrot.slane %v9119_v22, 5  ;;  %v2893_v27 = vsel %vm9517_vm6, %v7798_v31, %v2892_v43  ;;  %v9067_v43 = vld [vmem:[%s12674_s1 + $0x70] sm:$0xff]   ;;  %v3730_v3 = vshll.u32 %v10527_v18, 16  ;;  %v3734_v28 = vshrl.u32 %v10527_v18, 16  ;;  %v12776_v31 = vld [vmem:[#allocation10_spill] sm:$0xff] }
  0xd4   : > { %8665 = vmatmul.mubr.msk.bf16.gmra.mxu1 %vm730_vm2, %v9053_v36  ;;  %v2992_v36 = vrot.slane %v2990_v0, 4  ;;  %v7924_v0 = vld [vmem:[%s9191_s6 + $0x24] sm:$0xf]  ;;  %v9062_v22 = vld [vmem:[%s9191_s6 + $0x48] sm:$0xff]  }
  0xd5   : > { %8668 = vmatprep.mubr.msk.bf16.mxu1 %vm730_vm2, %v9054_v56  ;;  %v2896_v23 = vsel %vm9517_vm6, %v2894_v39, %v2895_v62  ;;  %v9069_v56 = vld [vmem:[%s12674_s1 + $0x80] sm:$0xff]   ;;  %v3748_v6 = vshll.u32 %v7924_v0, 16 }
  0xd6   : > { %v10506_v47 = vsel %vm9517_vm6, %v2992_v36, %v2993_v32  ;;  %v7818_v53 = vcombine.low %v2893_v27, %v2896_v23  ;;  %v10532_v32 = vld [vmem:[%s9191_s6 + $0x28] sm:$0xf]  ;;  %v3724_v36 = vshll.u32 %v7921_v10, 16  ;;  %v9061_v39 = vld [vmem:[%s9191_s6 + $0x3c] sm:$0xff]  }
  0xd7   : > { %v10552_v62 = vld [vmem:[%s9191_s6 + $0x20] sm:$0x1] }
  0xd8   : > { %v3726_v23 = vrot.slane %v3724_v36, 5  ;;  %v10566_v36 = vld [vmem:[%s9191_s6 + $0x34] sm:$0xf] }
  0xd9   : > { %8705 = vmatmul.mubr.msk.bf16.gmra.mxu0 %vm730_vm2, %v7762_v60  ;;  %v3721_v60 = vshrl.u32 %v7921_v10, 16 }
  0xda   : > { %8748 = vmatprep.mubr.msk.bf16.mxu0 %vm730_vm2, %v9056_v42  ;;  %v3745_v42 = vshrl.u32 %v7924_v0, 16  ;;  %v7927_v0 = vld [vmem:[%s9191_s6 + $0x30] sm:$0xf] }
  0xdb   : > { %v3723_v27 = vrot.slane %v3721_v60, 4  ;;  %v7926_v60 = vld [vmem:[%s9191_s6 + $0x2c] sm:$0x1] }
  0xdc   : > { %8669 = vmatmul.mubr.msk.bf16.gmra.mxu1 %vm730_vm2, %v9055_v33  ;;  %v3754_v33 = vshll.u32 %v10532_v32, 16  ;;  %v3747_v10 = vrot.slane %v3745_v42, 4  ;;  %v8007_v42 = vld [vmem:[%s9191_s6 + $0x18] sm:$0xe]  ;;  %v4486_v12 = vrot.slane %v7926_v60, 5 }
  0xdd   : > { %8712 = vmatprep.mubr.msk.bf16.mxu1 %vm730_vm2, %v7817_v8  ;;  %v3758_v8 = vshrl.u32 %v10532_v32, 16  ;;  %v8023_v44 = vrot.slane %v8007_v42, 9 }
  0xde   : > { %v10557_v7 = vrot.slane %v3754_v33, 5  ;;  %v3772_v33 = vshll.u32 %v7927_v0, 16 }
  0xdf   : > { %v3760_v52 = vrot.slane %v3758_v8, 4 }
  0xe0   : > { %v3774_v13 = vrot.slane %v3772_v33, 5 }
  0xe1   : > { %8749 = vmatmul.mubr.msk.bf16.vlgmr.msra.gmra.mxu0 %vm730_vm2, %v9058_v19  ;;  %v10554_v19 = vrot.slane %v3730_v3, 5  ;;  %v3727_v3 = vor.u32 %v3726_v23, %v3723_v27  ;;  %v3778_v27 = vshll.u32 %v10566_v36, 16  ;;  %v3782_v23 = vshrl.u32 %v10566_v36, 16 }
  0xe2   : > { %8817 = vmatpush3.bf16.msra.mxu0 %v12775_v41  ;;  %8752 = vmatprep.mubr.msk.bf16.mxu0 %vm730_vm2, %v9060_v35  ;;  %v3736_v35 = vrot.slane %v3734_v28, 4  ;;  %v4476_v41 = vrot.slane %v10527_v18, 5 }
  0xe3   : > { %8818 = vmatprep.subr.bf16.mxu0 %v9069_v56  ;;  %v10596_v42 = vrot.slane %v3778_v27, 5  ;;  %v7930_v27 = vld [vmem:[%s9191_s6 + $0x3c] sm:$0xf] }
  0xe4   : > { %8713 = vmatmul.mubr.msk.bf16.vlgmr.msra.gmra.mxu1 %vm730_vm2, %v7818_v53  ;;  %v3750_v53 = vrot.slane %v3748_v6, 5  ;;  %v3737_v28 = vor.u32 %v3736_v35, %v10554_v19  ;;  %v3769_v6 = vshrl.u32 %v7927_v0, 16  ;;  %v3728_v0 = vrot.slane %v3727_v3, 4 }
  0xe5   : > { %8781 = vmatpush3.bf16.msra.mxu1 %v12776_v31  ;;  %8716 = vmatprep.mubr.msk.bf16.mxu1 %vm730_vm2, %v7819_v61  ;;  %v10560_v61 = vpop.f32.mrf.mxu0  ;;  %v3761_v31 = vor.u32 %v3760_v52, %v10557_v7 }
  0xe6   : > { %8782 = vmatprep.subr.bf16.mxu1 %v9067_v43  ;;  %8819 = vmatpush3.bf16.msra.mxu0 %v9069_v56  ;;  %v3740_v56 = vshll.u32 %v10552_v62, 16  ;;  %v3751_v8 = vor.u32 %v3750_v53, %v3747_v10  ;;  %v4479_v10 = vrot.slane %v10552_v62, 5  ;;  %v9064_v53 = vld [vmem:[%s9191_s6 + $0x60] sm:$0xff]   ;;  %v3738_v52 = vrot.slane %v3737_v28, 4 }
  0xe7   : > { %v10587_v35 = vpop.f32.mrf.mxu0  ;;  %v3771_v2 = vrot.slane %v3769_v6, 4  ;;  %v3762_v34 = vrot.slane %v3761_v31, 4  ;;  %v3784_v62 = vrot.slane %v3782_v23, 4  ;;  %v10603_v28 = vsel %vm9517_vm6, %v8023_v44, %v4476_v41  ;;  %v10630_v23 = vld [vmem:[%s9191_s6 + $0x40] sm:$0xf] }
  0xe8   : > { %v3742_v58 = vrot.slane %v3740_v56, 5  ;;  %v3752_v54 = vrot.slane %v3751_v8, 4  ;;  %v10594_v56 = vld [vmem:[%s9191_s6 + $0x38] sm:$0x1]  ;;  %v3733_v6 = vsel %vm9231_vm3, %v3728_v0, %v10554_v19  ;;  %v3796_v44 = vshll.u32 %v7930_v27, 16 }
  0xe9   : > { %8753 = vmatmul.mubr.msk.bf16.gmra.mxu0 %vm730_vm2, %v9061_v39  ;;  %8783 = vmatpush3.bf16.msra.mxu1 %v9067_v43  ;;  %v4483_v43 = vrot.slane %v10532_v32, 5  ;;  %v3764_v39 = vshll.u32 %v7926_v60, 16  ;;  %v9063_v32 = vld [vmem:[%s9191_s6 + $0x54] sm:$0xff]   ;;  %v10599_v3 = vpop.f32.mrf.mxu0  ;;  %v8009_v60 = vld [vmem:[%s9191_s6 + $0x30] sm:$0xe]  ;;  %v3775_v31 = vor.u32 %v3774_v13, %v3771_v2  ;;  %v3785_v13 = vor.u32 %v3784_v62, %v10596_v42 }
  0xea   : > { %8756 = vmatprep.mubr.msk.bf16.mxu0 %vm730_vm2, %v9062_v22  ;;  %v10576_v18 = vpop.f32.mrf.mxu1  ;;  %v8008_v22 = vld [vmem:[%s9191_s6 + $0x24] sm:$0xe]  ;;  %v3743_v33 = vsel %vm9231_vm3, %v3738_v52, %v3742_v58  ;;  %v8025_v2 = vrot.slane %v8009_v60, 9  ;;  %v10666_v0 = vld [vmem:[%s9191_s6 + $0x44] sm:$0x1]  ;;  %v3806_v52 = vshrl.u32 %v10630_v23, 16 }
  0xeb   : > { %12777 = vst [vmem:[#allocation6_spill] sm:$0xff] %v10576_v18  ;;  %v8024_v37 = vrot.slane %v8008_v22, 9  ;;  %v4485_v50 = vrot.slane %v4483_v43, 4  ;;  %v3766_v26 = vrot.slane %v3764_v39, 5  ;;  %v3788_v22 = vshll.u32 %v10594_v56, 16 }
  0xec   : > { %8717 = vmatmul.mubr.msk.bf16.gmra.mxu1 %vm730_vm2, %v7820_v16  ;;  %v4478_v16 = vrot.slane %v4476_v41, 4  ;;  %v3757_v41 = vsel %vm9231_vm3, %v3752_v54, %v10557_v7  ;;  %v4490_v7 = vrot.slane %v10566_v36, 5  ;;  %v10655_v58 = vrot.slane %v3775_v31, 4 }
  0xed   : > { %8720 = vmatprep.mubr.msk.bf16.mxu1 %vm730_vm2, %v7821_v55  ;;  %v10591_v55 = vpop.f32.mrf.mxu1  ;;  %v10621_v39 = vsel %vm9517_vm6, %v8024_v37, %v4483_v43  ;;  %v10625_v19 = vsel %vm9517_vm6, %v4485_v50, %v4486_v12  ;;  %v3767_v37 = vsel %vm9231_vm3, %v3762_v34, %v3766_v26  ;;  %v12780_v43 = vcombine.low %v10345_v11, %v10355_v20  ;;  %v7933_v34 = vld [vmem:[%s9191_s6 + $0x48] sm:$0xf]  ;;  %v10659_v20 = vld [vmem:[%s9191_s6 + $0x4c] sm:$0xf] }
  0xee   : > { %12778 = vst [vmem:[#allocation9_spill] sm:$0xff] %v10591_v55  ;;  %v10614_v8 = vsel %vm9517_vm6, %v4478_v16, %v4479_v10  ;;  %v3793_v36 = vshrl.u32 %v7930_v27, 16  ;;  %v3802_v11 = vshll.u32 %v10630_v23, 16  ;;  %v10661_v16 = vcombine.low %v3757_v41, %v3767_v37 }
  0xef   : > { %v10636_v54 = vpop.f32.mrf.mxu1  ;;  %v3786_v12 = vrot.slane %v3785_v13, 4  ;;  %v10673_v62 = vsel %vm9517_vm6, %v8025_v2, %v4490_v7  ;;  %v4492_v60 = vrot.slane %v4490_v7, 4  ;;  %v3817_v41 = vshrl.u32 %v7933_v34, 16  ;;  %v10683_v13 = vld [vmem:[%s9191_s6 + $0x58] sm:$0xf] }
  0xf0   : > { %12779 = vst [vmem:[#allocation7_spill] sm:$0xff] %v10636_v54  ;;  %v3826_v27 = vshll.u32 %v10659_v20, 16  ;;  %v3830_v37 = vshrl.u32 %v10659_v20, 16  ;;  %v3795_v2 = vrot.slane %v3793_v36, 4  ;;  %v3798_v7 = vrot.slane %v3796_v44, 5  ;;  %v9068_v54 = vld [vmem:[%s9191_s6 + $0x84] sm:$0xff]  }
  0xf1   : > { %8757 = vmatmul.mubr.msk.bf16.gmra.mxu0 %vm730_vm2, %v9063_v32  ;;  %v10650_v32 = vcombine.low %v3733_v6, %v3743_v33  ;;  %v10669_v50 = vpop.f32.mrf.mxu1  ;;  %v4493_v6 = vrot.slane %v10594_v56, 5  ;;  %v7936_v33 = vld [vmem:[%s9191_s6 + $0x54] sm:$0xf]  ;;  %v3781_v56 = vsel %vm9231_vm3, %v10655_v58, %v10596_v42  ;;  %v4497_v10 = vrot.slane %v10630_v23, 5 }
  0xf2   : > { %8760 = vmatprep.mubr.msk.bf16.mxu0 %vm730_vm2, %v9064_v53  ;;  %v3790_v53 = vrot.slane %v3788_v22, 5  ;;  %12781 = vst [vmem:[#allocation12_spill] sm:$0xff] %v10669_v50  ;;  %v3820_v22 = vshll.u32 %v7933_v34, 16  ;;  %v8010_v34 = vld [vmem:[%s9191_s6 + $0x3c] sm:$0xe]  ;;  %v3841_v26 = vshrl.u32 %v7936_v33, 16  ;;  %v12785_v44 = vcombine.low %v10371_v24, %v10393_v5 }
  0xf3   : > { %v3844_v50 = vshll.u32 %v7936_v33, 16  ;;  %v10703_v42 = vsel %vm9517_vm6, %v4492_v60, %v4493_v6  ;;  %v3812_v58 = vshll.u32 %v10666_v0, 16  ;;  %v3850_v36 = vshll.u32 %v10683_v13, 16  ;;  %v9070_v33 = vld [vmem:[%s9191_s6 + $0x90] sm:$0xff]  }
  0xf4   : > { %8721 = vmatmul.mubr.msk.bf16.gmra.mxu1 %vm730_vm2, %v7822_v57  ;;  %v10648_v57 = vpop.f32.mrf.mxu0  ;;  %v3854_v23 = vshrl.u32 %v10683_v13, 16  ;;  %v10717_v60 = vrot.slane %v3826_v27, 5  ;;  %v3832_v6 = vrot.slane %v3830_v37, 4  ;;  %v8026_v18 = vrot.slane %v8010_v34, 9  ;;  %v10741_v34 = vld [vmem:[%s9191_s6 + $0x5c] sm:$0x1] }
  0xf5   : > { %8724 = vmatprep.mubr.msk.bf16.mxu1 %vm730_vm2, %v12780_v43  ;;  %v10690_v43 = vrot.slane %v3802_v11, 5  ;;  %v3819_v11 = vrot.slane %v3817_v41, 4  ;;  %v4500_v24 = vrot.slane %v10666_v0, 5  ;;  %v7939_v41 = vld [vmem:[%s9191_s6 + $0x60] sm:$0xf] }
  0xf6   : > { %v10678_v31 = vpop.f32.mrf.mxu0  ;;  %v3868_v27 = vshll.u32 %v7939_v41, 16 }
  0xf7   : > { %12782 = vst [vmem:[#allocation8_spill] sm:$0xff] %v10678_v31  ;;  %v3846_v31 = vrot.slane %v3844_v50, 5  ;;  %v3833_v50 = vor.u32 %v3832_v6, %v10717_v60  ;;  %v10757_v6 = vld [vmem:[%s9191_s6 + $0x64] sm:$0xf] }
  0xf9   : > { %8761 = vmatmul.mubr.msk.bf16.gmra.mxu0 %vm730_vm2, %v9065_v59  ;;  %v3808_v59 = vrot.slane %v3806_v52, 4  ;;  %v3822_v52 = vrot.slane %v3820_v22, 5 }
  0xfa   : > { %8764 = vmatprep.mubr.msk.bf16.mxu0 %vm730_vm2, %v9066_v48  ;;  %v12783_v48 = vcombine.low %v10363_v49, %v10378_v40  ;;  %v10699_v55 = vpop.f32.mrf.mxu1  ;;  %v10712_v49 = vpop.f32.mrf.mxu0  ;;  %v10715_v40 = vld [vmem:[%s9191_s6 + $0x50] sm:$0x1] }
  0xfb   : > { %12784 = vst [vmem:[#allocation13_spill] sm:$0xff] %v10699_v55  ;;  %12786 = vst [vmem:[#allocation11_spill] sm:$0xff] %v10712_v49  ;;  %v3799_v55 = vor.u32 %v3798_v7, %v3795_v2  ;;  %v3809_v5 = vor.u32 %v3808_v59, %v10690_v43  ;;  %v3843_v49 = vrot.slane %v3841_v26, 4  ;;  %v3836_v37 = vshll.u32 %v10715_v40, 16  ;;  %v8011_v7 = vld [vmem:[%s9191_s6 + $0x48] sm:$0xe] }
  0xfc   : > { %8725 = vmatmul.mubr.msk.bf16.gmra.mxu1 %vm730_vm2, %v12783_v48  ;;  %v3791_v48 = vsel %vm9231_vm3, %v3786_v12, %v3790_v53  ;;  %v10725_v22 = vpop.f32.mrf.mxu1  ;;  %v10730_v53 = vrot.slane %v3850_v36, 5  ;;  %v3856_v12 = vrot.slane %v3854_v23, 4  ;;  %v10733_v0 = vpop.f32.mrf.mxu0  ;;  %v3823_v26 = vor.u32 %v3822_v52, %v3819_v11 }
  0xfd   : > { %8728 = vmatprep.mubr.msk.bf16.mxu1 %vm730_vm2, %v12785_v44  ;;  %v4499_v44 = vrot.slane %v4497_v10, 4  ;;  %12787 = vst [vmem:[#allocation14_spill] sm:$0xff] %v10725_v22  ;;  %v10735_v2 = vcombine.low %v3781_v56, %v3791_v48  ;;  %v4504_v59 = vrot.slane %v10659_v20, 5  ;;  %v10744_v36 = vrot.slane %v3799_v55, 4 }
  0xfe   : > { %v10746_v23 = vrot.slane %v3812_v58, 5  ;;  %v3810_v56 = vrot.slane %v3809_v5, 4  ;;  %v10750_v11 = vsel %vm9517_vm6, %v8026_v18, %v4497_v10  ;;  %v3847_v52 = vor.u32 %v3846_v31, %v3843_v49  ;;  %v10763_v58 = vpop.f32.mrf.mxu1  ;;  %v9071_v31 = vld [vmem:[%s9191_s6 + $0x9c] sm:$0xff]   ;;  %v10772_v49 = vpop.f32.mrf.mxu0  ;;  %v9072_v5 = vld [vmem:[%s9191_s6 + $0xa8] sm:$0xff]  }
  0xff   : > { %v10754_v20 = vsel %vm9517_vm6, %v4499_v44, %v4500_v24  ;;  %v12788_v55 = vcombine.low %v10382_v15, %v10400_v17  ;;  %12789 = vst [vmem:[#allocation5_spill] sm:$0xff] %v10763_v58  ;;  %v8027_v48 = vrot.slane %v8011_v7, 9  ;;  %v3857_v18 = vor.u32 %v3856_v12, %v10730_v53  ;;  %12791 = vst [vmem:[#allocation4_spill] sm:$0xff] %v10772_v49 }
 0x100   : > { %v3860_v10 = vshll.u32 %v10741_v34, 16  ;;  %v12790_v24 = vcombine.low %v10404_v4, %v10415_v30  ;;  %v3824_v15 = vrot.slane %v3823_v26, 4  ;;  %v3834_v17 = vrot.slane %v3833_v50, 4  ;;  %v10787_v50 = vpop.f32.mrf.mxu1 }
 0x101   : > { %8765 = vmatmul.mubr.msk.bf16.gmra.mxu0 %vm730_vm2, %v9068_v54  ;;  %v3865_v54 = vshrl.u32 %v7939_v41, 16  ;;  %v4506_v44 = vrot.slane %v4504_v59, 4  ;;  %v4507_v41 = vrot.slane %v10715_v40, 5  ;;  %v3870_v12 = vrot.slane %v3868_v27, 5  ;;  %12792 = vst [vmem:[#allocation10_spill] sm:$0xff] %v10787_v50 }
 0x102   : > { %8768 = vmatprep.mubr.msk.bf16.mxu0 %vm730_vm2, %v9070_v33  ;;  %v3838_v33 = vrot.slane %v3836_v37, 5  ;;  %v8012_v37 = vld [vmem:[%s9191_s6 + $0x54] sm:$0xe]  ;;  %v3878_v58 = vshrl.u32 %v10757_v6, 16  ;;  %v3805_v4 = vsel %vm9231_vm3, %v10744_v36, %v10690_v43  ;;  %v3815_v30 = vsel %vm9231_vm3, %v3810_v56, %v10746_v23  ;;  %v7942_v36 = vld [vmem:[%s9191_s6 + $0x6c] sm:$0xf] }
 0x103   : > { %v3867_v7 = vrot.slane %v3865_v54, 4  ;;  %v3848_v26 = vrot.slane %v3847_v52, 4  ;;  %v4511_v40 = vrot.slane %v10683_v13, 5  ;;  %v10793_v54 = vsel %vm9517_vm6, %v8027_v48, %v4504_v59  ;;  %v10809_v48 = vld [vmem:[%s9191_s6 + $0x68] sm:$0x1] }
 0x104   : > { %8729 = vmatmul.mubr.msk.bf16.gmra.mxu1 %vm730_vm2, %v12788_v55  ;;  %v3874_v55 = vshll.u32 %v10757_v6, 16  ;;  %v3862_v43 = vrot.slane %v3860_v10, 5  ;;  %v3829_v13 = vsel %vm9231_vm3, %v3824_v15, %v10717_v60  ;;  %v3839_v56 = vsel %vm9231_vm3, %v3834_v17, %v3838_v33  ;;  %v10817_v15 = vld [vmem:[%s9191_s6 + $0x70] sm:$0xf] }
 0x105   : > { %8732 = vmatprep.mubr.msk.bf16.mxu1 %vm730_vm2, %v12790_v24  ;;  %v3858_v24 = vrot.slane %v3857_v18, 4  ;;  %v10806_v52 = vsel %vm9517_vm6, %v4506_v44, %v4507_v41  ;;  %v8028_v59 = vrot.slane %v8012_v37, 9  ;;  %v8013_v18 = vld [vmem:[%s9191_s6 + $0x60] sm:$0xe]  ;;  %v4514_v10 = vrot.slane %v10741_v34, 5 }
 0x106   : > { %v10814_v27 = vrot.slane %v3874_v55, 5  ;;  %v3880_v60 = vrot.slane %v3878_v58, 4  ;;  %v3853_v33 = vsel %vm9231_vm3, %v3848_v26, %v10730_v53  ;;  %v4513_v17 = vrot.slane %v4511_v40, 4 }
 0x107   : > { %v10797_v23 = vpop.f32.mrf.mxu0  ;;  %v3889_v44 = vshrl.u32 %v7942_v36, 16  ;;  %v3892_v41 = vshll.u32 %v7942_v36, 16  ;;  %v3863_v58 = vsel %vm9231_vm3, %v3858_v24, %v3862_v43  ;;  %v3884_v37 = vshll.u32 %v10809_v48, 16  ;;  %v9074_v36 = vld [vmem:[%s9191_s6 + $0xc0] sm:$0xff]  }
 0x108   : > { %12793 = vst [vmem:[#allocation15_spill] sm:$0xff] %v10797_v23  ;;  %v4518_v53 = vrot.slane %v10757_v6, 5  ;;  %v10839_v55 = vcombine.low %v3805_v4, %v3815_v30  ;;  %v10841_v26 = vcombine.low %v3829_v13, %v3839_v56  ;;  %v3898_v24 = vshll.u32 %v10817_v15, 16  ;;  %v7945_v30 = vld [vmem:[%s9191_s6 + $0x78] sm:$0xf] }
 0x109   : > { %8769 = vmatmul.mubr.msk.bf16.gmra.mxu0 %vm730_vm2, %v9071_v31  ;;  %v3871_v31 = vor.u32 %v3870_v12, %v3867_v7  ;;  %v8029_v7 = vrot.slane %v8013_v18, 9  ;;  %v12796_v12 = vcombine.low %v10429_v25, %v10449_v46  ;;  %v3902_v43 = vshrl.u32 %v10817_v15, 16  ;;  %v10863_v18 = vld [vmem:[%s9191_s6 + $0x74] sm:$0x1]  ;;  %v10866_v6 = vld [vmem:[%s9191_s6 + $0x7c] sm:$0xf] }
 0x10a   : > { %8772 = vmatprep.mubr.msk.bf16.mxu0 %vm730_vm2, %v9072_v5  ;;  %v12794_v5 = vcombine.low %v10423_v1, %v10435_v9  ;;  %v9073_v9 = vld [vmem:[%s9191_s6 + $0xb4] sm:$0xff]   ;;  %v10837_v1 = vpop.f32.mrf.mxu0  ;;  %v10850_v25 = vsel %vm9517_vm6, %v8028_v59, %v4511_v40  ;;  %v3881_v4 = vor.u32 %v3880_v60, %v10814_v27  ;;  %v10856_v13 = vcombine.low %v3853_v33, %v3863_v58  ;;  %v7948_v33 = vld [vmem:[%s9191_s6 + $0x84] sm:$0xf] }
 0x10b   : > { %12797 = vst [vmem:[#allocation17_spill] sm:$0xff] %v10837_v1  ;;  %v10852_v46 = vrot.slane %v3871_v31, 4  ;;  %v10860_v56 = vsel %vm9517_vm6, %v4513_v17, %v4514_v10  ;;  %v10870_v59 = vrot.slane %v3884_v37, 5  ;;  %v10874_v31 = vsel %vm9517_vm6, %v8029_v7, %v4518_v53  ;;  %v8014_v7 = vld [vmem:[%s9191_s6 + $0x6c] sm:$0xe] }
 0x10c   : > { %8733 = vmatmul.mubr.msk.bf16.gmra.mxu1 %vm730_vm2, %v12794_v5  ;;  %v10826_v34 = vpop.f32.mrf.mxu1  ;;  %12798 = vst [vmem:[#allocation18_spill] sm:$0xff] %v10856_v13  ;;  %v3891_v5 = vrot.slane %v3889_v44, 4  ;;  %v4520_v60 = vrot.slane %v4518_v53, 4  ;;  %v4521_v10 = vrot.slane %v10809_v48, 5  ;;  %v10879_v17 = vpop.f32.mrf.mxu0  ;;  %v10881_v44 = vrot.slane %v3898_v24, 5 }
 0x10d   : > { %12795 = vst [vmem:[#allocation16_spill] sm:$0xff] %v10826_v34  ;;  %8736 = vmatprep.mubr.msk.bf16.mxu1 %vm730_vm2, %v12796_v12  ;;  %v3894_v12 = vrot.slane %v3892_v41, 5  ;;  %12800 = vst [vmem:[#allocation20_spill] sm:$0xff] %v10879_v17  ;;  %v3904_v41 = vrot.slane %v3902_v43, 4  ;;  %v3913_v58 = vshrl.u32 %v7945_v30, 16  ;;  %v3916_v50 = vshll.u32 %v7945_v30, 16 }
 0x10e   : > { %v10868_v40 = vpop.f32.mrf.mxu1  ;;  %v10891_v48 = vrot.slane %v3881_v4, 4  ;;  %v3922_v53 = vshll.u32 %v10866_v6, 16  ;;  %v4525_v43 = vrot.slane %v10817_v15, 5  ;;  %v3937_v30 = vshrl.u32 %v7948_v33, 16  ;;  %v8015_v13 = vld [vmem:[%s9191_s6 + $0x78] sm:$0xe] }
 0x10f   : > { %12799 = vst [vmem:[#allocation19_spill] sm:$0xff] %v10868_v40  ;;  %v10884_v40 = vld [vmem:[%s9191_s6 + $0x88] sm:$0xf]  ;;  %v3895_v24 = vor.u32 %v3894_v12, %v3891_v5  ;;  %v3940_v34 = vshll.u32 %v7948_v33, 16  ;;  %v10905_v4 = vsel %vm9517_vm6, %v4520_v60, %v4521_v10  ;;  %v3908_v22 = vshll.u32 %v10863_v18, 16  ;;  %v10910_v12 = vpop.f32.mrf.mxu0 }
 0x110   : > { %v10901_v37 = vpop.f32.mrf.mxu1  ;;  %v3946_v5 = vshll.u32 %v10884_v40, 16  ;;  %v3950_v15 = vshrl.u32 %v10884_v40, 16  ;;  %12803 = vst [vmem:[#allocation22_spill] sm:$0xff] %v10910_v12  ;;  %v3905_v33 = vor.u32 %v3904_v41, %v10881_v44  ;;  %v7947_v60 = vld [vmem:[%s9191_s6 + $0x80] sm:$0x1]  ;;  %v3915_v10 = vrot.slane %v3913_v58, 4 }
 0x111   : > { %8773 = vmatmul.mubr.msk.bf16.gmra.mxu0 %vm730_vm2, %v9073_v9  ;;  %v3926_v9 = vshrl.u32 %v10866_v6, 16  ;;  %12802 = vst [vmem:[#allocation21_spill] sm:$0xff] %v10901_v37  ;;  %v3918_v37 = vrot.slane %v3916_v50, 5  ;;  %v4528_v17 = vrot.slane %v10863_v18, 5  ;;  %v10920_v1 = vrot.slane %v3922_v53, 5 }
 0x112   : > { %8776 = vmatprep.mubr.msk.bf16.mxu0 %vm730_vm2, %v9074_v36  ;;  %v12801_v36 = vcombine.low %v10439_v21, %v10458_v63  ;;  %v12804_v21 = vcombine.low %v10462_v14, %v10472_v38  ;;  %v9075_v63 = vld [vmem:[%s9191_s6 + $0xcc] sm:$0xff]   ;;  %v4532_v12 = vrot.slane %v10866_v6, 5  ;;  %v10924_v49 = vrot.slane %v3895_v24, 4  ;;  %v10926_v41 = vpop.f32.mrf.mxu1 }
 0x113   : > { %v3928_v23 = vrot.slane %v3926_v9, 4  ;;  %v4527_v14 = vrot.slane %v4525_v43, 4  ;;  %v3939_v38 = vrot.slane %v3937_v30, 4  ;;  %12805 = vst [vmem:[#allocation23_spill] sm:$0xff] %v10926_v41  ;;  %v3887_v50 = vsel %vm9231_vm3, %v10891_v48, %v10870_v59  ;;  %v10935_v58 = vld [vmem:[%s9191_s6 + $0x8c] sm:$0x1] }
 0x114   : > { %8737 = vmatmul.mubr.msk.bf16.gmra.mxu1 %vm730_vm2, %v12801_v36  ;;  %v8030_v36 = vrot.slane %v8014_v7, 9  ;;  %v10932_v18 = vrot.slane %v3908_v22, 5  ;;  %v10937_v7 = vrot.slane %v3946_v5, 5  ;;  %v3952_v6 = vrot.slane %v3950_v15, 4  ;;  %v7951_v41 = vld [vmem:[%s9191_s6 + $0x90] sm:$0xf] }
 0x115   : > { %8740 = vmatprep.mubr.msk.bf16.mxu1 %vm730_vm2, %v12804_v21  ;;  %v3942_v21 = vrot.slane %v3940_v34, 5  ;;  %v3906_v34 = vrot.slane %v3905_v33, 4  ;;  %v3919_v9 = vor.u32 %v3918_v37, %v3915_v10  ;;  %v3932_v24 = vshll.u32 %v7947_v60, 16 }
 0x116   : > { %v8031_v30 = vrot.slane %v8015_v13, 9  ;;  %v12806_v22 = vcombine.low %v10603_v28, %v10614_v8  ;;  %v10949_v59 = vsel %vm9517_vm6, %v8030_v36, %v4525_v43  ;;  %v3929_v48 = vor.u32 %v3928_v23, %v10920_v1  ;;  %v10964_v43 = vld [vmem:[%s9191_s6 + $0x94] sm:$0xf] }
 0x117   : > { %v4534_v5 = vrot.slane %v4532_v12, 4  ;;  %v4535_v15 = vrot.slane %v7947_v60, 5  ;;  %v3901_v13 = vsel %vm9231_vm3, %v10924_v49, %v10881_v44  ;;  %v10960_v28 = vsel %vm9517_vm6, %v4527_v14, %v4528_v17  ;;  %v8016_v60 = vld [vmem:[%s9191_s6 + $0x84] sm:$0xe] }
 0x118   : > { %v3943_v8 = vor.u32 %v3942_v21, %v3939_v38  ;;  %v3956_v37 = vshll.u32 %v10935_v58, 16  ;;  %v12807_v23 = vcombine.low %v10489_v51, %v10506_v47  ;;  %v3953_v36 = vor.u32 %v3952_v6, %v10937_v7 }
 0x119   : > { %v10939_v53 = vpop.f32.mrf.mxu0  ;;  %8777 = vmatmul.mubr.msk.bf16.gmra.mxu0 %vm730_vm2, %v9075_v63  ;;  %v4539_v49 = vrot.slane %v10884_v40, 5  ;;  %v3961_v44 = vshrl.u32 %v7951_v41, 16  ;;  %v3964_v17 = vshll.u32 %v7951_v41, 16  ;;  %v3911_v14 = vsel %vm9231_vm3, %v3906_v34, %v10932_v18 }
 0x11a   : > { %8820 = vmatprep.mubr.msk.bf16.mxu0 %vm730_vm2, %v12806_v22  ;;  %v3920_v38 = vrot.slane %v3919_v9, 4  ;;  %v3934_v51 = vrot.slane %v3932_v24, 5  ;;  %v10984_v47 = vsel %vm9517_vm6, %v8031_v30, %v4532_v12  ;;  %v3930_v40 = vrot.slane %v3929_v48, 4 }
 0x11b   : > { %v10952_v63 = vpop.f32.mrf.mxu0  ;;  %v10990_v41 = vsel %vm9517_vm6, %v4534_v5, %v4535_v15  ;;  %v3970_v6 = vshll.u32 %v10964_v43, 16  ;;  %v3944_v18 = vrot.slane %v3943_v8, 4  ;;  %v3958_v34 = vrot.slane %v3956_v37, 5 }
 0x11c   : > { %v10966_v33 = vpop.f32.mrf.mxu1  ;;  %8741 = vmatmul.mubr.msk.bf16.gmra.mxu1 %vm730_vm2, %v12807_v23  ;;  %v8032_v9 = vrot.slane %v8016_v60, 9  ;;  %v4542_v12 = vrot.slane %v10935_v58, 5  ;;  %v3954_v30 = vrot.slane %v3953_v36, 4  ;;  %v4541_v48 = vrot.slane %v4539_v49, 4 }
 0x11d   : > { %v10975_v10 = vpop.f32.mrf.mxu0  ;;  %8784 = vmatprep.mubr.msk.bf16.mxu1 %vm730_vm2, %v10650_v32  ;;  %v3974_v32 = vshrl.u32 %v10964_v43, 16  ;;  %v3963_v23 = vrot.slane %v3961_v44, 4  ;;  %v3966_v5 = vrot.slane %v3964_v17, 5  ;;  %v8048_v8 = vcombine.low %v10850_v25, %v10860_v56 }
 0x11e   : > { %v10986_v21 = vpop.f32.mrf.mxu1  ;;  %v12810_v58 = vsel %vm9231_vm3, %v10852_v46, %v10814_v27  ;;  %v12811_v44 = vcombine.low %v10673_v62, %v10703_v42  ;;  %v3925_v27 = vsel %vm9231_vm3, %v3920_v38, %v10920_v1  ;;  %v3935_v46 = vsel %vm9231_vm3, %v3930_v40, %v3934_v51  ;;  %v11045_v38 = vld [vmem:[%s9191_s6 + $0xa0] sm:$0xf]  ;;  %v7957_v62 = vld [vmem:[%s9191_s6 + $0xa8] sm:$0xf] }
 0x11f   : > { %12808 = vst [vmem:[#allocation24_spill] sm:$0xff] %v10986_v21  ;;  %v10994_v22 = vpop.f32.mrf.mxu0  ;;  %v12809_v21 = vcombine.low %v10621_v39, %v10625_v19  ;;  %v11010_v37 = vcombine.low %v12810_v58, %v3887_v50  ;;  %v11017_v39 = vld [vmem:[%s9191_s6 + $0x98] sm:$0x1]  ;;  %v11030_v50 = vrot.slane %v3970_v6, 5  ;;  %v3976_v17 = vrot.slane %v3974_v32, 4 }
 0x120   : > { %v10997_v24 = vpop.f32.mrf.mxu1  ;;  %v11033_v60 = vcombine.low %v3901_v13, %v3911_v14  ;;  %v3949_v42 = vsel %vm9231_vm3, %v3944_v18, %v10937_v7  ;;  %v11042_v1 = vsel %vm9517_vm6, %v8032_v9, %v4539_v49  ;;  %v3959_v13 = vsel %vm9231_vm3, %v3954_v30, %v3958_v34  ;;  %v8017_v18 = vld [vmem:[%s9191_s6 + $0x90] sm:$0xe] }
 0x121   : > { %v8606_v15 = vpop.f32.mrf.mxu0  ;;  %8821 = vmatmul.mubr.msk.bf16.vlgmr.msra.gmra.mxu0 %vm730_vm2, %v12809_v21  ;;  %v7954_v21 = vld [vmem:[%s9191_s6 + $0x9c] sm:$0xf]  ;;  %v11053_v14 = vsel %vm9517_vm6, %v4541_v48, %v4542_v12  ;;  %v3967_v40 = vor.u32 %v3966_v5, %v3963_v23  ;;  %v3980_v7 = vshll.u32 %v11017_v39, 16  ;;  %v11059_v32 = vcombine.low %v3925_v27, %v3935_v46 }
 0x122   : > { %v11019_v19 = vpop.f32.mrf.mxu1  ;;  %8824 = vmatprep.mubr.msk.bf16.mxu0 %vm730_vm2, %v12811_v44  ;;  %v3988_v9 = vshll.u32 %v7954_v21, 16  ;;  %v3977_v30 = vor.u32 %v3976_v17, %v11030_v50  ;;  %v4546_v12 = vrot.slane %v10964_v43, 5  ;;  %v3994_v48 = vshll.u32 %v11045_v38, 16 }
 0x123   : > { %v1551_v58 = vpop.f32.mrf.mxu0  ;;  %v3998_v23 = vshrl.u32 %v11045_v38, 16  ;;  %v11069_v44 = vcombine.low %v3949_v42, %v3959_v13  ;;  %v3982_v17 = vrot.slane %v3980_v7, 5  ;;  %v8033_v43 = vrot.slane %v8017_v18, 9 }
 0x124   : > { %v8570_v51 = vpop.f32.mrf.mxu1  ;;  %8785 = vmatmul.mubr.msk.bf16.vlgmr.msra.gmra.mxu1 %vm730_vm2, %v10661_v16  ;;  %v3985_v16 = vshrl.u32 %v7954_v21, 16  ;;  %v11073_v21 = vrot.slane %v3967_v40, 4  ;;  %v12812_v42 = vcombine.low %v10750_v11, %v10754_v20  ;;  %v11085_v40 = vld [vmem:[%s9191_s6 + $0xac] sm:$0xf]  ;;  %v4548_v18 = vrot.slane %v4546_v12, 4 }
 0x125   : > { %v1123_v6 = vadd.f32 %v8570_v51, %v10560_v61  ;;  %v8607_v49 = vpop.f32.mrf.mxu0  ;;  %8788 = vmatprep.mubr.msk.bf16.mxu1 %vm730_vm2, %v10735_v2  ;;  %v4549_v51 = vrot.slane %v11017_v39, 5  ;;  %v12813_v39 = vcombine.low %v10793_v54, %v10806_v52  ;;  %v11107_v52 = vsel %vm9517_vm6, %v8033_v43, %v4546_v12 }
 0x126   : > { %v1114_v34 = vpop.f32.mrf.mxu1  ;;  %v3987_v13 = vrot.slane %v3985_v16, 4  ;;  %v11097_v16 = vld [vmem:[%s9191_s6 + $0xa4] sm:$0x1]  ;;  %v3973_v54 = vsel %vm9231_vm3, %v11073_v21, %v11030_v50  ;;  %v4553_v50 = vrot.slane %v11045_v38, 5 }
 0x127   : > { %v11066_v61 = vadd.f32 %v8606_v15, %v1123_v6  ;;  %v1115_v5 = vadd.f32 %v1114_v34, %v10587_v35  ;;  %v1554_v2 = vpop.f32.mrf.mxu0  ;;  %v3990_v6 = vrot.slane %v3988_v9, 5  ;;  %v11091_v34 = vrot.slane %v3994_v48, 5 }
 0x128   : > { %v8571_v46 = vpop.f32.mrf.mxu1  ;;  %v4009_v9 = vshrl.u32 %v7957_v62, 16  ;;  %v11122_v43 = vsel %vm9517_vm6, %v4548_v18, %v4549_v51 }
 0x129   : > { %v11077_v36 = vadd.f32 %v1551_v58, %v1115_v5  ;;  %v1126_v35 = vadd.f32 %v8571_v46, %v10599_v3  ;;  %v8610_v15 = vpop.f32.mrf.mxu0  ;;  %8825 = vmatmul.mubr.msk.bf16.gmra.mxu0 %vm730_vm2, %v12812_v42  ;;  %v3978_v58 = vrot.slane %v3977_v30, 4  ;;  %v4000_v3 = vrot.slane %v3998_v23, 4 }
 0x12a   : > { %v1117_v7 = vpop.f32.mrf.mxu1  ;;  %8828 = vmatprep.mubr.msk.bf16.mxu0 %vm730_vm2, %v12813_v39  ;;  %v4012_v46 = vshll.u32 %v7957_v62, 16  ;;  %v12814_v62 = vld [vmem:[#allocation8_spill] sm:$0xff]  ;;  %v4011_v38 = vrot.slane %v4009_v9, 4 }
 0x12b   : > { %v11093_v5 = vadd.f32 %v8607_v49, %v1126_v35  ;;  %v1118_v11 = vadd.f32 %v1117_v7, %v10648_v57  ;;  %v1567_v20 = vpop.f32.mrf.mxu0  ;;  %v4018_v57 = vshll.u32 %v11085_v40, 16  ;;  %v4022_v49 = vshrl.u32 %v11085_v40, 16  ;;  %v8018_v35 = vld [vmem:[%s9191_s6 + $0x9c] sm:$0xe] }
 0x12c   : > { %v8574_v42 = vpop.f32.mrf.mxu1  ;;  %8789 = vmatmul.mubr.msk.bf16.gmra.mxu1 %vm730_vm2, %v10839_v55  ;;  %v3991_v55 = vor.u32 %v3990_v6, %v3987_v13  ;;  %v3983_v12 = vsel %vm9231_vm3, %v3978_v58, %v3982_v17  ;;  %v4004_v7 = vshll.u32 %v11097_v16, 16  ;;  %v4014_v6 = vrot.slane %v4012_v46, 5 }
 0x12d   : > { %v11111_v30 = vadd.f32 %v1554_v2, %v1118_v11  ;;  %v1139_v48 = vadd.f32 %v8574_v42, %v12814_v62  ;;  %v8611_v23 = vpop.f32.mrf.mxu0  ;;  %8792 = vmatprep.mubr.msk.bf16.mxu1 %vm730_vm2, %v10841_v26  ;;  %v4001_v2 = vor.u32 %v4000_v3, %v11091_v34  ;;  %v12815_v11 = vld [vmem:[#allocation11_spill] sm:$0xff]  ;;  %v8034_v62 = vrot.slane %v8018_v35, 9 }
 0x12e   : > { %v1130_v21 = vpop.f32.mrf.mxu1  ;;  %v4556_v17 = vrot.slane %v11097_v16, 5  ;;  %v11130_v58 = vrot.slane %v4018_v57, 5  ;;  %v4024_v51 = vrot.slane %v4022_v49, 4  ;;  %v11139_v9 = vrot.slane %v3991_v55, 4  ;;  %v8019_v16 = vld [vmem:[%s9191_s6 + $0xa8] sm:$0xe] }
 0x12f   : > { %v11126_v39 = vadd.f32 %v8610_v15, %v1139_v48  ;;  %v1131_v26 = vadd.f32 %v1130_v21, %v12815_v11  ;;  %v1570_v13 = vpop.f32.mrf.mxu0  ;;  %v4555_v46 = vrot.slane %v4553_v50, 4  ;;  %v11142_v48 = vld [vmem:[%s9191_s6 + $0xb0] sm:$0x1]  ;;  %v11153_v56 = vrot.slane %v4001_v2, 4  ;;  %v12817_v55 = vld [vmem:[#allocation4_spill] sm:$0xff] }
 0x130   : > { %v8575_v42 = vpop.f32.mrf.mxu1  ;;  %v4015_v11 = vor.u32 %v4014_v6, %v4011_v38  ;;  %v4025_v2 = vor.u32 %v4024_v51, %v11130_v58  ;;  %v12819_v38 = vld [vmem:[#allocation15_spill] sm:$0xff] }
 0x131   : > { %v11132_v18 = vadd.f32 %v1567_v20, %v1131_v26  ;;  %v1142_v3 = vadd.f32 %v8575_v42, %v10733_v0  ;;  %v8614_v15 = vpop.f32.mrf.mxu0  ;;  %8829 = vmatmul.mubr.msk.bf16.gmra.mxu0 %vm730_vm2, %v8048_v8  ;;  %v12816_v20 = vcombine.low %v10874_v31, %v10905_v4  ;;  %v11149_v0 = vcombine.low %v3973_v54, %v3983_v12  ;;  %v7960_v31 = vld [vmem:[%s9191_s6 + $0xb4] sm:$0xf]  ;;  %v12818_v54 = vld [vmem:[#allocation18_spill] sm:$0xff] }
 0x132   : > { %v1133_v57 = vpop.f32.mrf.mxu1  ;;  %v11155_v8 = vrot.slane %v4004_v7, 5  ;;  %v4560_v26 = vrot.slane %v11085_v40, 5  ;;  %v11166_v12 = vsel %vm9517_vm6, %v8034_v62, %v4553_v50  ;;  %v8035_v7 = vrot.slane %v8019_v16, 9  ;;  %v11189_v16 = vld [vmem:[%s9191_s6 + $0xb8] sm:$0xf] }
 0x133   : > { %8832 = vmatprep.mubr.msk.bf16.mxu0 %vm730_vm2, %v12816_v20  ;;  %v11157_v49 = vadd.f32 %v8611_v23, %v1142_v3  ;;  %v1134_v35 = vadd.f32 %v1133_v57, %v12817_v55  ;;  %v1583_v21 = vpop.f32.mrf.mxu0  ;;  %v4028_v23 = vshll.u32 %v11142_v48, 16  ;;  %v3997_v50 = vsel %vm9231_vm3, %v11139_v9, %v11091_v34  ;;  %v12820_v34 = vld [vmem:[#allocation17_spill] sm:$0xff] }
 0x134   : > { %v8578_v4 = vpop.f32.mrf.mxu1  ;;  %8793 = vmatmul.mubr.msk.bf16.gmra.mxu1 %vm730_vm2, %v12818_v54  ;;  %v11181_v62 = vsel %vm9517_vm6, %v4555_v46, %v4556_v17  ;;  %v4563_v3 = vrot.slane %v11142_v48, 5  ;;  %v4036_v57 = vshll.u32 %v7960_v31, 16  ;;  %v4016_v17 = vrot.slane %v4015_v11, 4 }
 0x135   : > { %v11170_v42 = vadd.f32 %v1570_v13, %v1134_v35  ;;  %v1155_v6 = vadd.f32 %v8578_v4, %v12819_v38  ;;  %v8615_v40 = vpop.f32.mrf.mxu0  ;;  %8796 = vmatprep.mubr.msk.bf16.mxu1 %vm730_vm2, %v11010_v37  ;;  %v4007_v13 = vsel %vm9231_vm3, %v11153_v56, %v11155_v8  ;;  %v4033_v37 = vshrl.u32 %v7960_v31, 16  ;;  %v7963_v35 = vld [vmem:[%s9191_s6 + $0xc0] sm:$0xf] }
 0x136   : > { %v1146_v51 = vpop.f32.mrf.mxu1  ;;  %v4562_v46 = vrot.slane %v4560_v26, 4  ;;  %v4026_v8 = vrot.slane %v4025_v2, 4  ;;  %v4030_v48 = vrot.slane %v4028_v23, 5  ;;  %v11199_v54 = vsel %vm9517_vm6, %v8035_v7, %v4560_v26  ;;  %v11214_v23 = vld [vmem:[%s9191_s6 + $0xc4] sm:$0xf] }
 0x137   : > { %v11191_v20 = vadd.f32 %v8614_v15, %v1155_v6  ;;  %v1147_v9 = vadd.f32 %v1146_v51, %v12820_v34  ;;  %v1586_v55 = vpop.f32.mrf.mxu0  ;;  %v12821_v15 = vld [vmem:[#allocation20_spill] sm:$0xff]  ;;  %v12822_v11 = vcombine.low %v10949_v59, %v10960_v28  ;;  %v11209_v51 = vld [vmem:[%s9191_s6 + $0xbc] sm:$0x1]  ;;  %v4042_v34 = vshll.u32 %v11189_v16, 16 }
 0x138   : > { %v8579_v4 = vpop.f32.mrf.mxu1  ;;  %v4046_v2 = vshrl.u32 %v11189_v16, 16  ;;  %v4035_v7 = vrot.slane %v4033_v37, 4  ;;  %v4057_v59 = vshrl.u32 %v7963_v35, 16  ;;  %v4060_v28 = vshll.u32 %v7963_v35, 16  ;;  %v8020_v37 = vld [vmem:[%s9191_s6 + $0xb4] sm:$0xe] }
 0x139   : > { %v11201_v31 = vadd.f32 %v1583_v21, %v1147_v9  ;;  %v1158_v38 = vadd.f32 %v8579_v4, %v12821_v15  ;;  %v8618_v6 = vpop.f32.mrf.mxu0  ;;  %8833 = vmatmul.mubr.msk.bf16.gmra.mxu0 %vm730_vm2, %v12822_v11  ;;  %v12823_v21 = vcombine.low %v10984_v47, %v10990_v41  ;;  %v4038_v9 = vrot.slane %v4036_v57, 5  ;;  %v12824_v15 = vld [vmem:[#allocation22_spill] sm:$0xff] }
 0x13a   : > { %v1149_v26 = vpop.f32.mrf.mxu1  ;;  %v4021_v25 = vsel %vm9231_vm3, %v4016_v17, %v11130_v58  ;;  %v11228_v27 = vsel %vm9517_vm6, %v4562_v46, %v4563_v3  ;;  %v4031_v41 = vsel %vm9231_vm3, %v4026_v8, %v4030_v48  ;;  %v4066_v57 = vshll.u32 %v11214_v23, 16 }
 0x13b   : > { %8836 = vmatprep.mubr.msk.bf16.mxu0 %vm730_vm2, %v12823_v21  ;;  %v11220_v4 = vadd.f32 %v8615_v40, %v1158_v38  ;;  %v1150_v11 = vadd.f32 %v1149_v26, %v12824_v15  ;;  %v1599_v56 = vpop.f32.mrf.mxu0  ;;  %v4052_v40 = vshll.u32 %v11209_v51, 16  ;;  %v4070_v35 = vshrl.u32 %v11214_v23, 16 }
 0x13c   : > { %v8582_v47 = vpop.f32.mrf.mxu1  ;;  %8797 = vmatmul.mubr.msk.bf16.gmra.mxu1 %vm730_vm2, %v11033_v60  ;;  %v11243_v17 = vrot.slane %v4042_v34, 5  ;;  %v4048_v60 = vrot.slane %v4046_v2, 4  ;;  %v4039_v8 = vor.u32 %v4038_v9, %v4035_v7  ;;  %v4567_v48 = vrot.slane %v11189_v16, 5 }
 0x13d   : > { %v11238_v38 = vadd.f32 %v1586_v55, %v1150_v11  ;;  %v1171_v58 = vadd.f32 %v8582_v47, %v10939_v53  ;;  %v8619_v3 = vpop.f32.mrf.mxu0  ;;  %8800 = vmatprep.mubr.msk.bf16.mxu1 %vm730_vm2, %v11059_v32  ;;  %v4059_v26 = vrot.slane %v4057_v59, 4  ;;  %v4062_v21 = vrot.slane %v4060_v28, 5 }
 0x13e   : > { %v1162_v46 = vpop.f32.mrf.mxu1  ;;  %v11249_v11 = vcombine.low %v3997_v50, %v4007_v13  ;;  %v8036_v47 = vrot.slane %v8020_v37, 9  ;;  %v11251_v34 = vcombine.low %v4021_v25, %v4031_v41  ;;  %v8055_v2 = vcombine.low %v11199_v54, %v11228_v27  ;;  %v7965_v27 = vld [vmem:[%s9191_s6 + $0xc8] sm:$0x1]  ;;  %v7966_v54 = vld [vmem:[%s9191_s6 + $0xcc] sm:$0xf] }
 0x13f   : > { %v11246_v15 = vadd.f32 %v8618_v6, %v1171_v58  ;;  %v1163_v55 = vadd.f32 %v1162_v46, %v10952_v63  ;;  %v1602_v53 = vpop.f32.mrf.mxu0  ;;  %v11255_v7 = vrot.slane %v4066_v57, 5  ;;  %v4072_v16 = vrot.slane %v4070_v35, 4  ;;  %v11277_v41 = vld [vmem:[%s9191_s6 + $0xd0] sm:$0xf] }
 0x140   : > { %v8583_v32 = vpop.f32.mrf.mxu1  ;;  %v12825_v50 = vcombine.low %v11042_v1, %v11053_v14  ;;  %v11264_v25 = vrot.slane %v4052_v40, 5  ;;  %v4570_v13 = vrot.slane %v11209_v51, 5  ;;  %v4049_v28 = vor.u32 %v4048_v60, %v11243_v17 }
 0x141   : > { %v11257_v6 = vadd.f32 %v1599_v56, %v1163_v55  ;;  %v1174_v9 = vadd.f32 %v8583_v32, %v10975_v10  ;;  %v8622_v63 = vpop.f32.mrf.mxu0  ;;  %v12826_v56 = vcombine.low %v11107_v52, %v11122_v43  ;;  %v11273_v10 = vrot.slane %v4039_v8, 4  ;;  %v8021_v52 = vld [vmem:[%s9191_s6 + $0xc0] sm:$0xe] }
 0x142   : > { %8837 = vmatmul.mubr.msk.bf16.gmra.mxu0 %vm730_vm2, %v12825_v50  ;;  %v1165_v59 = vpop.f32.mrf.mxu1  ;;  %v4569_v1 = vrot.slane %v4567_v48, 4  ;;  %v4063_v14 = vor.u32 %v4062_v21, %v4059_v26  ;;  %v11284_v57 = vsel %vm9517_vm6, %v8036_v47, %v4567_v48  ;;  %v4574_v43 = vrot.slane %v11214_v23, 5 }
 0x143   : > { %8840 = vmatprep.mubr.msk.bf16.mxu0 %vm730_vm2, %v12826_v56  ;;  %v11279_v40 = vadd.f32 %v8619_v3, %v1174_v9  ;;  %v1166_v51 = vadd.f32 %v1165_v59, %v10994_v22  ;;  %v1615_v37 = vpop.f32.mrf.mxu0  ;;  %v4073_v58 = vor.u32 %v4072_v16, %v11255_v7  ;;  %v4076_v60 = vshll.u32 %v7965_v27, 16  ;;  %v12828_v22 = vld [vmem:[#allocation6_spill] sm:$0xff]  ;;  %v12829_v9 = vld [vmem:[#allocation9_spill] sm:$0xff] }
 0x144   : > { %v8586_v35 = vpop.f32.mrf.mxu1  ;;  %8801 = vmatmul.mubr.msk.bf16.gmra.mxu1 %vm730_vm2, %v11069_v44  ;;  %v4081_v46 = vshrl.u32 %v7966_v54, 16  ;;  %v4084_v3 = vshll.u32 %v7966_v54, 16  ;;  %v4090_v48 = vshll.u32 %v11277_v41, 16  ;;  %v4094_v23 = vshrl.u32 %v11277_v41, 16 }
 0x145   : > { %v11291_v8 = vadd.f32 %v1602_v53, %v1166_v51  ;;  %v1187_v26 = vadd.f32 %v8586_v35, %v12828_v22  ;;  %v8623_v21 = vpop.f32.mrf.mxu0  ;;  %8804 = vmatprep.mubr.msk.bf16.mxu1 %vm730_vm2, %v11149_v0  ;;  %v4050_v47 = vrot.slane %v4049_v28, 4  ;;  %v4571_v44 = vsel %vm9517_vm6, %v4569_v1, %v4570_v13  ;;  %v12830_v13 = vld [vmem:[#allocation7_spill] sm:$0xff] }
 0x146   : > { %v1178_v55 = vpop.f32.mrf.mxu1  ;;  %v4064_v32 = vrot.slane %v4063_v14, 4  ;;  %v8037_v16 = vrot.slane %v8021_v52, 9  ;;  %v4576_v59 = vrot.slane %v4574_v43, 4  ;;  %v4577_v0 = vrot.slane %v7965_v27, 5  ;;  %v7968_v52 = vld [vmem:[%s9191_s6 + $0xd4] sm:$0x1] }
 0x147   : > { %12827 = vst [vmem:[#allocation8_spill] sm:$0xff] %v11291_v8  ;;  %v11300_v53 = vadd.f32 %v8622_v63, %v1187_v26  ;;  %v1179_v50 = vadd.f32 %v1178_v55, %v12829_v9  ;;  %v11303_v54 = vpop.f32.mrf.mxu0  ;;  %v4074_v51 = vrot.slane %v4073_v58, 4  ;;  %v4078_v35 = vrot.slane %v4076_v60, 5 }
 0x148   : > { %v8587_v56 = vpop.f32.mrf.mxu1  ;;  %v4083_v22 = vrot.slane %v4081_v46, 4  ;;  %v4086_v8 = vrot.slane %v4084_v3, 5  ;;  %v12831_v63 = vcombine.low %v11166_v12, %v11181_v62  ;;  %v11313_v26 = vrot.slane %v4090_v48, 5  ;;  %v8022_v3 = vld [vmem:[%s9191_s6 + $0xcc] sm:$0xe] }
 0x149   : > { %v11305_v28 = vadd.f32 %v1615_v37, %v1179_v50  ;;  %v1190_v1 = vadd.f32 %v8587_v56, %v12830_v13  ;;  %v8626_v14 = vpop.f32.mrf.mxu0  ;;  %v4096_v27 = vrot.slane %v4094_v23, 4  ;;  %v4581_v58 = vrot.slane %v11277_v41, 5 }
 0x14a   : > { %8841 = vmatmul.mubr.msk.bf16.gmra.mxu0 %vm730_vm2, %v12831_v63  ;;  %v11315_v55 = vpop.f32.mrf.mxu1  ;;  %v4045_v12 = vsel %vm9231_vm3, %v11273_v10, %v11243_v17  ;;  %v4575_v62 = vsel %vm9517_vm6, %v8037_v16, %v4574_v43  ;;  %v4578_v46 = vsel %vm9517_vm6, %v4576_v59, %v4577_v0  ;;  %v8056_v41 = vcombine.low %v11284_v57, %v4571_v44  ;;  %v12832_v43 = vld [vmem:[#allocation13_spill] sm:$0xff]  ;;  %v12833_v59 = vld [vmem:[#allocation14_spill] sm:$0xff] }
 0x14b   : > { %8844 = vmatprep.mubr.msk.bf16.mxu0 %vm730_vm2, %v8055_v2  ;;  %v11319_v37 = vadd.f32 %v8623_v21, %v1190_v1  ;;  %v1631_v60 = vpop.f32.mrf.mxu0  ;;  %v4055_v2 = vsel %vm9231_vm3, %v4050_v47, %v11264_v25  ;;  %v4069_v17 = vsel %vm9231_vm3, %v4064_v32, %v11255_v7  ;;  %v4100_v10 = vshll.u32 %v7968_v52, 16  ;;  %v9076_v25 = vld [vmem:[%s12677_s4 + $0x18] sm:$0xff]  }
 0x14c   : > { %v8590_v48 = vpop.f32.mrf.mxu1  ;;  %8805 = vmatmul.mubr.msk.bf16.gmra.mxu1 %vm730_vm2, %v11249_v11  ;;  %v4079_v11 = vsel %vm9231_vm3, %v4074_v51, %v4078_v35  ;;  %v4087_v16 = vor.u32 %v4086_v8, %v4083_v22  ;;  %v4097_v9 = vor.u32 %v4096_v27, %v11313_v26  ;;  %v8057_v47 = vcombine.low %v4575_v62, %v4578_v46  ;;  %v9077_v8 = vld [vmem:[%s12677_s4 + $0x8] sm:$0xff]   ;;  %v12834_v1 = vld [vmem:[#allocation5_spill] sm:$0xff] }
 0x14d   : > { %v1203_v21 = vadd.f32 %v8590_v48, %v12832_v43  ;;  %v8627_v23 = vpop.f32.mrf.mxu0  ;;  %8808 = vmatprep.mubr.msk.bf16.mxu1 %vm730_vm2, %v11251_v34  ;;  %v8038_v7 = vrot.slane %v8022_v3, 9  ;;  %v4583_v44 = vrot.slane %v4581_v58, 4  ;;  %v4584_v32 = vrot.slane %v7968_v52, 5  ;;  %8852 = vmatprep.subr.bf16.mxu1 %v9076_v25 }
 0x14e   : > { %v1194_v57 = vpop.f32.mrf.mxu1  ;;  %v7986_v51 = vcombine.low %v4045_v12, %v4055_v2  ;;  %v7987_v35 = vcombine.low %v4069_v17, %v4079_v11  ;;  %v4102_v22 = vrot.slane %v4100_v10, 5  ;;  %8853 = vmatpush3.bf16.msra.mxu1 %v9076_v25  ;;  %v4088_v52 = vrot.slane %v4087_v16, 4  ;;  %8888 = vmatprep.subr.bf16.mxu0 %v9077_v8  ;;  %v12835_v2 = vld [vmem:[#allocation16_spill] sm:$0xff] }
 0x14f   : > { %v11348_v50 = vadd.f32 %v8626_v14, %v1203_v21  ;;  %v1195_v0 = vadd.f32 %v1194_v57, %v12833_v59  ;;  %v11351_v34 = vpop.f32.mrf.mxu0  ;;  %v4098_v27 = vrot.slane %v4097_v9, 4  ;;  %v4582_v12 = vsel %vm9517_vm6, %v8038_v7, %v4581_v58  ;;  %8889 = vmatpush3.bf16.msra.mxu0 %v9077_v8 }
 0x150   : > { %v8591_v56 = vpop.f32.mrf.mxu1  ;;  %v4585_v46 = vsel %vm9517_vm6, %v4583_v44, %v4584_v32  ;;  %v4093_v10 = vsel %vm9231_vm3, %v4088_v52, %v11313_v26 }
 0x151   : > { %v11356_v13 = vadd.f32 %v1631_v60, %v1195_v0  ;;  %v1206_v63 = vadd.f32 %v8591_v56, %v12834_v1  ;;  %v8630_v14 = vpop.f32.mrf.mxu0  ;;  %v4103_v45 = vsel %vm9231_vm3, %v4098_v27, %v4102_v22  ;;  %v8058_v58 = vcombine.low %v4582_v12, %v4585_v46  ;;  %v12838_v22 = vld [vmem:[#allocation24_spill] sm:$0xff] }
 0x152   : > { %8845 = vmatmul.mubr.msk.bf16.gmra.mxu0 %vm730_vm2, %v8056_v41  ;;  %v11360_v62 = vpop.f32.mrf.mxu1  ;;  %v7988_v25 = vcombine.low %v4093_v10, %v4103_v45 }
 0x153   : > { %8848 = vmatprep.mubr.msk.bf16.mxu0 %vm730_vm2, %v8057_v47  ;;  %v11367_v60 = vadd.f32 %v8627_v23, %v1206_v63  ;;  %v1647_v3 = vpop.f32.mrf.mxu0  ;;  %v12836_v23 = vld [vmem:[#allocation19_spill] sm:$0xff]  ;;  %v12837_v47 = vld [vmem:[#allocation21_spill] sm:$0xff] }
 0x154   : > { %v8594_v48 = vpop.f32.mrf.mxu1  ;;  %8809 = vmatmul.mubr.msk.bf16.gmra.mxu1 %vm730_vm2, %v7986_v51 }
 0x155   : > { %v1219_v41 = vadd.f32 %v8594_v48, %v12835_v2  ;;  %v8631_v17 = vpop.f32.mrf.mxu0  ;;  %8812 = vmatprep.mubr.msk.bf16.mxu1 %vm730_vm2, %v7987_v35 }
 0x156   : > { %v1210_v43 = vpop.f32.mrf.mxu1 }
 0x157   : > { %v11377_v21 = vadd.f32 %v8630_v14, %v1219_v41  ;;  %v1211_v11 = vadd.f32 %v1210_v43, %v12836_v23  ;;  %v11380_v16 = vpop.f32.mrf.mxu0 }
 0x158   : > { %v8595_v9 = vpop.f32.mrf.mxu1 }
 0x159   : > { %v11382_v57 = vadd.f32 %v1647_v3, %v1211_v11  ;;  %v1222_v7 = vadd.f32 %v8595_v9, %v12837_v47  ;;  %v8634_v44 = vpop.f32.mrf.mxu0 }
 0x15a   : > { %8849 = vmatmul.mubr.msk.bf16.gmra.mxu0 %vm730_vm2, %v8058_v58  ;;  %v11386_v26 = vpop.f32.mrf.mxu1 }
 0x15b   : > { %v11388_v32 = vadd.f32 %v8631_v17, %v1222_v7  ;;  %v1663_v59 = vpop.f32.mrf.mxu0 }
 0x15c   : > { %v8598_v0 = vpop.f32.mrf.mxu1  ;;  %8813 = vmatmul.mubr.msk.bf16.gmra.mxu1 %vm730_vm2, %v7988_v25 }
 0x15d   : > { %v1235_v8 = vadd.f32 %v8598_v0, %v10966_v33  ;;  %v8635_v56 = vpop.f32.mrf.mxu0 }
 0x15e   : > { %v1226_v51 = vpop.f32.mrf.mxu1 }
 0x15f   : > { %v11392_v35 = vadd.f32 %v8634_v44, %v1235_v8  ;;  %v1227_v1 = vadd.f32 %v1226_v51, %v12838_v22  ;;  %v11395_v63 = vpop.f32.mrf.mxu0 }
 0x160   : > { %v8599_v14 = vpop.f32.mrf.mxu1 }
 0x161   : > { %v11397_v52 = vadd.f32 %v1663_v59, %v1227_v1  ;;  %v1238_v27 = vadd.f32 %v8599_v14, %v10997_v24  ;;  %v8678_v12 = vpop.f32.mrf.mxu0 }
 0x162   : > { %v11400_v46 = vpop.f32.mrf.mxu1 }
 0x163   : > { %v11402_v3 = vadd.f32 %v8635_v56, %v1238_v27  ;;  %v2660_v48 = vpop.f32.mrf.mxu0 }
 0x164   : > { %v8642_v33 = vpop.f32.mrf.mxu1 }
 0x165   : > { %v2051_v2 = vadd.f32 %v8642_v33, %v11066_v61  ;;  %v8679_v41 = vpop.f32.mrf.mxu0 }
 0x166   : > { %v1922_v17 = vpop.f32.mrf.mxu1 }
 0x167   : > { %v11405_v10 = vadd.f32 %v8678_v12, %v2051_v2  ;;  %v2049_v45 = vadd.f32 %v1922_v17, %v11077_v36  ;;  %v11408_v58 = vpop.f32.mrf.mxu0  ;;  %v9130_v36 = vmov 0  }
 0x168   : > { %v8643_v43 = vpop.f32.mrf.mxu1  ;;  %5011 = vst.msk [vmem:[#allocation2 + $0xc] sm:$0xf] %vm5002_vm7, %v9130_v36  ;;  %5003 = vst.msk [vmem:[#allocation2] sm:$0xf] %vm5002_vm7, %v9130_v36 }
 0x169   : > { %v11410_v23 = vadd.f32 %v2660_v48, %v2049_v45  ;;  %v2052_v24 = vadd.f32 %v8643_v43, %v11093_v5  ;;  %v8682_v11 = vpop.f32.mrf.mxu0  ;;  %5004 = vst.msk [vmem:[#allocation2 + $0x4] sm:$0xf] %vm5002_vm7, %v9130_v36  ;;  %5012 = vst.msk [vmem:[#allocation2 + $0x10] sm:$0xf] %vm5002_vm7, %v9130_v36 }
 0x16a   : > { %v11413_v9 = vpop.f32.mrf.mxu1  ;;  %5016 = vst.msk [vmem:[#allocation2 + $0x18] sm:$0xf] %vm5002_vm7, %v9130_v36  ;;  %5017 = vst.msk [vmem:[#allocation2 + $0x1c] sm:$0xf] %vm5002_vm7, %v9130_v36 }
 0x16b   : > { %v11415_v25 = vadd.f32 %v8679_v41, %v2052_v24  ;;  %v2676_v47 = vpop.f32.mrf.mxu0  ;;  %5021 = vst.msk [vmem:[#allocation2 + $0x24] sm:$0xf] %vm5002_vm7, %v9130_v36  ;;  %5022 = vst.msk [vmem:[#allocation2 + $0x28] sm:$0xf] %vm5002_vm7, %v9130_v36 }
 0x16c   : > { %v8646_v61 = vpop.f32.mrf.mxu1  ;;  %5026 = vst.msk [vmem:[#allocation2 + $0x30] sm:$0xf] %vm5002_vm7, %v9130_v36  ;;  %5027 = vst.msk [vmem:[#allocation2 + $0x34] sm:$0xf] %vm5002_vm7, %v9130_v36 }
 0x16d   : > { %v2055_v7 = vadd.f32 %v8646_v61, %v11126_v39  ;;  %v8683_v44 = vpop.f32.mrf.mxu0  ;;  %5031 = vst.msk [vmem:[#allocation2 + $0x3c] sm:$0xf] %vm5002_vm7, %v9130_v36  ;;  %5032 = vst.msk [vmem:[#allocation2 + $0x40] sm:$0xf] %vm5002_vm7, %v9130_v36 }
 0x16e   : > { %v1938_v59 = vpop.f32.mrf.mxu1  ;;  %5036 = vst.msk [vmem:[#allocation2 + $0x48] sm:$0xf] %vm5002_vm7, %v9130_v36  ;;  %5037 = vst.msk [vmem:[#allocation2 + $0x4c] sm:$0xf] %vm5002_vm7, %v9130_v36 }
 0x16f   : > { %5041 = vst.msk [vmem:[#allocation2 + $0x54] sm:$0xf] %vm5002_vm7, %v9130_v36  ;;  %5042 = vst.msk [vmem:[#allocation2 + $0x58] sm:$0xf] %vm5002_vm7, %v9130_v36  ;;  %v11452_v5 = vadd.f32 %v8682_v11, %v2055_v7  ;;  %v2053_v39 = vadd.f32 %v1938_v59, %v11132_v18  ;;  %v11455_v0 = vpop.f32.mrf.mxu0 }
 0x170   : > { %5046 = vst.msk [vmem:[#allocation2 + $0x60] sm:$0xf] %vm5002_vm7, %v9130_v36  ;;  %5047 = vst.msk [vmem:[#allocation2 + $0x64] sm:$0xf] %vm5002_vm7, %v9130_v36  ;;  %v8647_v8 = vpop.f32.mrf.mxu1 }
 0x171   : > { %5051 = vst.msk [vmem:[#allocation2 + $0x6c] sm:$0xf] %vm5002_vm7, %v9130_v36  ;;  %5052 = vst.msk [vmem:[#allocation2 + $0x70] sm:$0xf] %vm5002_vm7, %v9130_v36  ;;  %v11457_v56 = vadd.f32 %v2676_v47, %v2053_v39  ;;  %v2056_v51 = vadd.f32 %v8647_v8, %v11157_v49  ;;  %v8686_v22 = vpop.f32.mrf.mxu0  ;;  %v9078_v49 = vld [vmem:[%s12677_s4 + $0x10] sm:$0xff]  }
 0x172   : > { %5056 = vst.msk [vmem:[#allocation2 + $0x78] sm:$0xf] %vm5002_vm7, %v9130_v36  ;;  %5057 = vst.msk [vmem:[#allocation2 + $0x7c] sm:$0xf] %vm5002_vm7, %v9130_v36  ;;  %v11460_v1 = vpop.f32.mrf.mxu1  ;;  %8854 = vmatprep.subr.bf16.mxu1 %v9078_v49 }
 0x173   : > { %5061 = vst.msk [vmem:[#allocation2 + $0x84] sm:$0xf] %vm5002_vm7, %v9130_v36  ;;  %5062 = vst.msk [vmem:[#allocation2 + $0x88] sm:$0xf] %vm5002_vm7, %v9130_v36  ;;  %v11462_v14 = vadd.f32 %v8683_v44, %v2056_v51  ;;  %v2692_v27 = vpop.f32.mrf.mxu0  ;;  %8855 = vmatpush3.bf16.msra.mxu1 %v9078_v49 }
 0x174   : > { %5066 = vst.msk [vmem:[#allocation2 + $0x90] sm:$0xf] %vm5002_vm7, %v9130_v36  ;;  %5067 = vst.msk [vmem:[#allocation2 + $0x94] sm:$0xf] %vm5002_vm7, %v9130_v36  ;;  %v8650_v12 = vpop.f32.mrf.mxu1 }
 0x175   : > { %5071 = vst.msk [vmem:[#allocation2 + $0x9c] sm:$0xf] %vm5002_vm7, %v9130_v36  ;;  %5072 = vst.msk [vmem:[#allocation2 + $0xa0] sm:$0xf] %vm5002_vm7, %v9130_v36  ;;  %v2059_v48 = vadd.f32 %v8650_v12, %v11191_v20  ;;  %v8687_v33 = vpop.f32.mrf.mxu0 }
 0x176   : > { %5076 = vst.msk [vmem:[#allocation2 + $0xa8] sm:$0xf] %vm5002_vm7, %v9130_v36  ;;  %5077 = vst.msk [vmem:[#allocation2 + $0xac] sm:$0xf] %vm5002_vm7, %v9130_v36  ;;  %v1954_v2 = vpop.f32.mrf.mxu1 }
 0x177   : > { %5081 = vst.msk [vmem:[#allocation2 + $0xb4] sm:$0xf] %vm5002_vm7, %v9130_v36  ;;  %5082 = vst.msk [vmem:[#allocation2 + $0xb8] sm:$0xf] %vm5002_vm7, %v9130_v36  ;;  %v11465_v41 = vadd.f32 %v8686_v22, %v2059_v48  ;;  %v2057_v18 = vadd.f32 %v1954_v2, %v11201_v31  ;;  %v11468_v17 = vpop.f32.mrf.mxu0  ;;  %v9079_v31 = vld [vmem:[%s12677_s4] sm:$0xff]   ;;  %v12845_v2 = vmov 0 }
 0x178   : > { %5086 = vst.msk [vmem:[#allocation2 + $0xc0] sm:$0xf] %vm5002_vm7, %v9130_v36  ;;  %5087 = vst.msk [vmem:[#allocation2 + $0xc4] sm:$0xf] %vm5002_vm7, %v9130_v36  ;;  %v8651_v45 = vpop.f32.mrf.mxu1  ;;  %8890 = vmatprep.subr.bf16.mxu0 %v9079_v31  ;;  %v12846_v2 = vsel %vm11496_vm10, 4294967295, %v12845_v2 }
 0x179   : > { %12839 = vst [vmem:[#allocation11_spill] sm:$0xff] %v11465_v41  ;;  %v11473_v43 = vadd.f32 %v2692_v27, %v2057_v18  ;;  %v2060_v24 = vadd.f32 %v8651_v45, %v11220_v4  ;;  %v8690_v11 = vpop.f32.mrf.mxu0  ;;  %8891 = vmatpush3.bf16.msra.mxu0 %v9079_v31  ;;  %12847 = vst [vmem:[#allocation22_spill] sm:$0xff] %v12846_v2 }
 0x17a   : > { %v11476_v20 = vpop.f32.mrf.mxu1 }
 0x17b   : > { %12840 = vst [vmem:[#allocation4_spill] sm:$0xff] %v11473_v43  ;;  %v11481_v47 = vadd.f32 %v8687_v33, %v2060_v24  ;;  %v2708_v61 = vpop.f32.mrf.mxu0 }
 0x17c   : > { %v8654_v7 = vpop.f32.mrf.mxu1 }
 0x17d   : > { %12841 = vst [vmem:[#allocation18_spill] sm:$0xff] %v11481_v47  ;;  %v2063_v44 = vadd.f32 %v8654_v7, %v11246_v15  ;;  %v8691_v59 = vpop.f32.mrf.mxu0  ;;  %v5013_v7 = vld [vmem:[#allocation2 + $0x14] sm:$0x1] }
 0x17e   : > { %v1970_v36 = vpop.f32.mrf.mxu1 }
 0x17f   : > { %v11484_v4 = vadd.f32 %v8690_v11, %v2063_v44  ;;  %v2061_v39 = vadd.f32 %v1970_v36, %v11257_v6  ;;  %v11487_v8 = vpop.f32.mrf.mxu0  ;;  %v5008_v6 = vld [vmem:[#allocation2 + $0x8] sm:$0x1] }
 0x180   : > { %v8655_v51 = vpop.f32.mrf.mxu1  ;;  %v5009_v49 = vsel %vm11496_vm10, 0, %v5008_v6 }
 0x181   : > { %12842 = vst [vmem:[#allocation15_spill] sm:$0xff] %v11484_v4  ;;  %v11489_v22 = vadd.f32 %v2708_v61, %v2061_v39  ;;  %v2064_v27 = vadd.f32 %v8655_v51, %v11279_v40  ;;  %v8694_v12 = vpop.f32.mrf.mxu0  ;;  %5010 = vst [vmem:[#allocation2 + $0x8] sm:$0x1] %v5009_v49 }
 0x182   : > { %v11492_v48 = vpop.f32.mrf.mxu1 }
 0x183   : > { %12843 = vst [vmem:[#allocation17_spill] sm:$0xff] %v11489_v22  ;;  %v11494_v15 = vadd.f32 %v8691_v59, %v2064_v27  ;;  %v2724_v33 = vpop.f32.mrf.mxu0  ;;  %v5014_v59 = vsel %vm11496_vm10, 0, %v5013_v7 }
 0x184   : > { %v8658_v18 = vpop.f32.mrf.mxu1  ;;  %5015 = vst [vmem:[#allocation2 + $0x14] sm:$0x1] %v5014_v59 }
 0x185   : > { %12844 = vst [vmem:[#allocation20_spill] sm:$0xff] %v11494_v15  ;;  %v2067_v45 = vadd.f32 %v8658_v18, %v11300_v53  ;;  %v8695_v24 = vpop.f32.mrf.mxu0 }
 0x186   : > { %v1986_v40 = vpop.f32.mrf.mxu1 }
 0x187   : > { %v11503_v11 = vadd.f32 %v8694_v12, %v2067_v45  ;;  %v2065_v31 = vadd.f32 %v1986_v40, %v11305_v28  ;;  %v11506_v61 = vpop.f32.mrf.mxu0 }
 0x188   : > { %v8659_v44 = vpop.f32.mrf.mxu1 }
 0x189   : > { %12848 = vst [vmem:[#allocation6_spill] sm:$0xff] %v11503_v11  ;;  %v11510_v36 = vadd.f32 %v2724_v33, %v2065_v31  ;;  %v2068_v39 = vadd.f32 %v8659_v44, %v11319_v37  ;;  %v8698_v51 = vpop.f32.mrf.mxu0 }
 0x18a   : > { %v11513_v53 = vpop.f32.mrf.mxu1 }
 0x18b   : > { %12849 = vst [vmem:[#allocation9_spill] sm:$0xff] %v11510_v36  ;;  %v11515_v27 = vadd.f32 %v8695_v24, %v2068_v39  ;;  %v2740_v12 = vpop.f32.mrf.mxu0 }
 0x18c   : > { %v8662_v6 = vpop.f32.mrf.mxu1 }
 0x18d   : > { %12850 = vst [vmem:[#allocation7_spill] sm:$0xff] %v11515_v27  ;;  %v2071_v28 = vadd.f32 %v8662_v6, %v11348_v50  ;;  %v8699_v18 = vpop.f32.mrf.mxu0  ;;  %v5018_v27 = vld [vmem:[#allocation2 + $0x20] sm:$0x1] }
 0x18e   : > { %v2002_v49 = vpop.f32.mrf.mxu1 }
 0x18f   : > { %v11518_v45 = vadd.f32 %v8698_v51, %v2071_v28  ;;  %v2069_v40 = vadd.f32 %v2002_v49, %v11356_v13  ;;  %v11521_v33 = vpop.f32.mrf.mxu0 }
 0x190   : > { %v8663_v31 = vpop.f32.mrf.mxu1 }
 0x191   : > { %v11523_v37 = vadd.f32 %v2740_v12, %v2069_v40  ;;  %v2072_v7 = vadd.f32 %v8663_v31, %v11367_v60  ;;  %v8702_v44 = vpop.f32.mrf.mxu0  ;;  %v5023_v12 = vld [vmem:[#allocation2 + $0x2c] sm:$0x1] }
 0x192   : > { %v11526_v24 = vpop.f32.mrf.mxu1  ;;  %v5024_v60 = vsel %vm11496_vm10, 0, %v5023_v12 }
 0x193   : > { %v11528_v59 = vadd.f32 %v8699_v18, %v2072_v7  ;;  %v2756_v39 = vpop.f32.mrf.mxu0  ;;  %5025 = vst [vmem:[#allocation2 + $0x2c] sm:$0x1] %v5024_v60 }
 0x194   : > { %v8666_v50 = vpop.f32.mrf.mxu1 }
 0x195   : > { %v2075_v6 = vadd.f32 %v8666_v50, %v11377_v21  ;;  %v8703_v51 = vpop.f32.mrf.mxu0 }
 0x196   : > { %v2018_v28 = vpop.f32.mrf.mxu1 }
 0x197   : > { %v11531_v29 = vadd.f32 %v8702_v44, %v2075_v6  ;;  %v2073_v13 = vadd.f32 %v2018_v28, %v11382_v57  ;;  %v11534_v49 = vpop.f32.mrf.mxu0  ;;  %v9084_v57 = vld [vmem:[%s12677_s4 + $0x28] sm:$0xff]   ;;  %v5019_v44 = vsel %vm11496_vm10, 0, %v5018_v27 }
 0x198   : > { %v8667_v40 = vpop.f32.mrf.mxu1  ;;  %5020 = vst [vmem:[#allocation2 + $0x20] sm:$0x1] %v5019_v44  ;;  %8924 = vmatprep.subr.bf16.mxu1 %v9084_v57 }
 0x199   : > { %v11538_v31 = vadd.f32 %v2756_v39, %v2073_v13  ;;  %v2076_v18 = vadd.f32 %v8667_v40, %v11388_v32  ;;  %v8706_v7 = vpop.f32.mrf.mxu0 }
 0x19a   : > { %v11541_v21 = vpop.f32.mrf.mxu1 }
 0x19b   : > { %v11548_v50 = vadd.f32 %v8703_v51, %v2076_v18  ;;  %v2772_v6 = vpop.f32.mrf.mxu0 }
 0x19c   : > { %v8670_v39 = vpop.f32.mrf.mxu1 }
 0x19d   : > { %v2079_v32 = vadd.f32 %v8670_v39, %v11392_v35  ;;  %v8707_v28 = vpop.f32.mrf.mxu0  ;;  %v11566_v35 = vld [vmem:[%s12677_s4 + $0x38] sm:$0xff]  }
 0x19e   : > { %v2034_v13 = vpop.f32.mrf.mxu1  ;;  %12853 = vst [vmem:[#allocation5_spill] sm:$0xff] %v11566_v35  ;;  %8960 = vmatprep.subr.bf16.mxu0 %v11566_v35 }
 0x19f   : > { %v11551_v12 = vadd.f32 %v8706_v7, %v2079_v32  ;;  %v2077_v40 = vadd.f32 %v2034_v13, %v11397_v52  ;;  %v11554_v60 = vpop.f32.mrf.mxu0  ;;  %v5028_v32 = vld [vmem:[#allocation2 + $0x38] sm:$0x1] }
 0x1a0   : > { %v8671_v36 = vpop.f32.mrf.mxu1  ;;  %v5029_v13 = vsel %vm11496_vm10, 0, %v5028_v32 }
 0x1a1   : > { %12851 = vst [vmem:[#allocation13_spill] sm:$0xff] %v11551_v12  ;;  %v11556_v11 = vadd.f32 %v2772_v6, %v2077_v40  ;;  %v2080_v27 = vadd.f32 %v8671_v36, %v11402_v3  ;;  %v11559_v51 = vpop.f32.mrf.mxu0  ;;  %v5033_v3 = vld [vmem:[#allocation2 + $0x44] sm:$0x1]  ;;  %5030 = vst [vmem:[#allocation2 + $0x38] sm:$0x1] %v5029_v13 }
 0x1a2   : > { %v11561_v18 = vpop.f32.mrf.mxu1  ;;  %v5034_v6 = vsel %vm11496_vm10, 0, %v5033_v3  ;;  %v5043_v13 = vld [vmem:[#allocation2 + $0x5c] sm:$0x1] }
 0x1a3   : > { %12852 = vst [vmem:[#allocation14_spill] sm:$0xff] %v11556_v11  ;;  %v11568_v7 = vadd.f32 %v8707_v28, %v2080_v27  ;;  %v11570_v57 = vpop.f32.mrf.mxu0  ;;  %5035 = vst [vmem:[#allocation2 + $0x44] sm:$0x1] %v5034_v6 }
 0x1a4   : > { %v11572_v52 = vpop.f32.mrf.mxu1 }
 0x1a5   : > { %12854 = vst [vmem:[#allocation16_spill] sm:$0xff] %v11568_v7  ;;  %v11575_v44 = vpop.f32.mrf.mxu0 }
 0x1a6   : > { %v11577_v36 = vpop.f32.mrf.mxu1 }
 0x1a7   : > { %v11581_v39 = vpop.f32.mrf.mxu0 }
 0x1a8   : > { %12855 = vst [vmem:[#allocation19_spill] sm:$0xff] %v11581_v39  ;;  %v11583_v28 = vpop.f32.mrf.mxu1 }
 0x1a9   : > { %v11587_v40 = vpop.f32.mrf.mxu0 }
 0x1aa   : > { %12856 = vst [vmem:[#allocation21_spill] sm:$0xff] %v11587_v40  ;;  %v11589_v27 = vpop.f32.mrf.mxu1 }
 0x1ab   : > { %v11591_v35 = vpop.f32.mrf.mxu0 }
 0x1ac   : > { %12857 = vst [vmem:[#allocation24_spill] sm:$0xff] %v11591_v35  ;;  %v11593_v7 = vpop.f32.mrf.mxu1  ;;  %v5044_v35 = vsel %vm11496_vm10, 0, %v5043_v13 }
 0x1ad   : > { %v11595_v15 = vpop.f32.mrf.mxu0  ;;  %5045 = vst [vmem:[#allocation2 + $0x5c] sm:$0x1] %v5044_v35 }
 0x1ae   : > { %12858 = vst [vmem:[#allocation25_spill] sm:$0xff] %v11595_v15  ;;  %v11597_v3 = vpop.f32.mrf.mxu1  ;;  %v5038_v15 = vld [vmem:[#allocation2 + $0x50] sm:$0x1] }
 0x1af   : > { %v11599_v11 = vpop.f32.mrf.mxu0 }
 0x1b0   : > { %12859 = vst [vmem:[#allocation26_spill] sm:$0xff] %v11599_v11  ;;  %v11601_v6 = vpop.f32.mrf.mxu1  ;;  %v5039_v11 = vsel %vm11496_vm10, 0, %v5038_v15 }
 0x1b1   : > { %v11603_v22 = vpop.f32.mrf.mxu0  ;;  %5040 = vst [vmem:[#allocation2 + $0x50] sm:$0x1] %v5039_v11  ;;  %v5053_v11 = vld [vmem:[#allocation2 + $0x74] sm:$0x1] }
 0x1b2   : > { %12860 = vst [vmem:[#allocation27_spill] sm:$0xff] %v11603_v22  ;;  %v11605_v32 = vpop.f32.mrf.mxu1 }
 0x1b3   : > { %12861 = vst [vmem:[#allocation28_spill] sm:$0xff] %v11605_v32  ;;  %v11607_v4 = vpop.f32.mrf.mxu0  ;;  %v5063_v32 = vld [vmem:[#allocation2 + $0x8c] sm:$0x1] }
 0x1b4   : > { %12862 = vst [vmem:[#allocation29_spill] sm:$0xff] %v11607_v4  ;;  %v11609_v12 = vpop.f32.mrf.mxu1 }
 0x1b5   : > { %12863 = vst [vmem:[#allocation30_spill] sm:$0xff] %v11609_v12  ;;  %v11613_v47 = vpop.f32.mrf.mxu0 }
 0x1b6   : > { %12864 = vst [vmem:[#allocation31_spill] sm:$0xff] %v11613_v47  ;;  %v11615_v43 = vpop.f32.mrf.mxu1 }
 0x1b7   : > { %12865 = vst [vmem:[#allocation32_spill] sm:$0xff] %v11615_v43  ;;  %v11619_v22 = vpop.f32.mrf.mxu0 }
 0x1b8   : > { %12866 = vst [vmem:[#allocation33_spill] sm:$0xff] %v11619_v22  ;;  %v11621_v40 = vpop.f32.mrf.mxu1 }
 0x1b9   : > { %12867 = vst [vmem:[#allocation34_spill] sm:$0xff] %v11621_v40  ;;  %v11623_v4 = vpop.f32.mrf.mxu0 }
 0x1ba   : > { %12868 = vst [vmem:[#allocation35_spill] sm:$0xff] %v11623_v4  ;;  %v11625_v12 = vpop.f32.mrf.mxu1  ;;  %v5054_v4 = vsel %vm11496_vm10, 0, %v5053_v11 }
 0x1bb   : > { %12869 = vst [vmem:[#allocation36_spill] sm:$0xff] %v11625_v12  ;;  %v11627_v41 = vpop.f32.mrf.mxu0  ;;  %5055 = vst [vmem:[#allocation2 + $0x74] sm:$0x1] %v5054_v4  ;;  %v12885_v4 = vld [vmem:[#allocation12_spill] sm:$0xff] }
 0x1bc   : > { %12870 = vst [vmem:[#allocation37_spill] sm:$0xff] %v11627_v41  ;;  %v11629_v13 = vpop.f32.mrf.mxu1  ;;  %v5048_v41 = vld [vmem:[#allocation2 + $0x68] sm:$0x1] }
 0x1bd   : > { %12871 = vst [vmem:[#allocation38_spill] sm:$0xff] %v11629_v13  ;;  %v11631_v47 = vpop.f32.mrf.mxu0 }
 0x1be   : > { %12872 = vst [vmem:[#allocation39_spill] sm:$0xff] %v11631_v47  ;;  %v11633_v35 = vpop.f32.mrf.mxu1  ;;  %v5049_v47 = vsel %vm11496_vm10, 0, %v5048_v41  ;;  %v5064_v41 = vsel %vm11496_vm10, 0, %v5063_v32  ;;  %v2058_v32 = vadd.f32 %v11476_v20, %v11238_v38 }
 0x1bf   : > { %12873 = vst [vmem:[#allocation40_spill] sm:$0xff] %v11633_v35  ;;  %v11635_v43 = vpop.f32.mrf.mxu0  ;;  %5050 = vst [vmem:[#allocation2 + $0x68] sm:$0x1] %v5049_v47 }
 0x1c0   : > { %12874 = vst [vmem:[#allocation41_spill] sm:$0xff] %v11635_v43  ;;  %v11637_v15 = vpop.f32.mrf.mxu1  ;;  %5065 = vst [vmem:[#allocation2 + $0x8c] sm:$0x1] %v5064_v41  ;;  %v5288_v41 = vld [vmem:[#allocation2 + $0x14] sm:$0x1] }
 0x1c1   : > { %12875 = vst [vmem:[#allocation42_spill] sm:$0xff] %v11637_v15  ;;  %v11639_v22 = vpop.f32.mrf.mxu0 }
 0x1c2   : > { %12876 = vst [vmem:[#allocation43_spill] sm:$0xff] %v11639_v22  ;;  %v11641_v40 = vpop.f32.mrf.mxu1  ;;  %v12882_v22 = vld [vmem:[#allocation10_spill] sm:$0xff] }
 0x1c3   : > { %12877 = vst [vmem:[#allocation44_spill] sm:$0xff] %v11641_v40  ;;  %v11645_v12 = vpop.f32.mrf.mxu0  ;;  %v1198_v40 = vadd.f32 %v11360_v62, %v12882_v22  ;;  %v1230_v62 = vadd.f32 %v11400_v46, %v11019_v19 }
 0x1c4   : > { %12878 = vst [vmem:[#allocation45_spill] sm:$0xff] %v11645_v12  ;;  %v11647_v13 = vpop.f32.mrf.mxu1 }
 0x1c5   : > { %12879 = vst [vmem:[#allocation46_spill] sm:$0xff] %v11647_v13  ;;  %v11651_v43 = vpop.f32.mrf.mxu0  ;;  %v1182_v13 = vadd.f32 %v11315_v55, %v12885_v4  ;;  %v1699_v47 = vadd.f32 %v11351_v34, %v1198_v40  ;;  %v2054_v55 = vadd.f32 %v11460_v1, %v11170_v42  ;;  %v12887_v40 = vld [vmem:[#allocation8_spill] sm:$0xff]  ;;  %v5287_v42 = vld [vmem:[#allocation2 + $0x8] sm:$0x1]  ;;  %v1707_v38 = vadd.f32 %v11395_v63, %v1230_v62  ;;  %v5290_v62 = vld [vmem:[#allocation2 + $0x2c] sm:$0x1] }
 0x1c6   : > { %12880 = vst [vmem:[#allocation47_spill] sm:$0xff] %v11651_v43  ;;  %v11653_v15 = vpop.f32.mrf.mxu1  ;;  %v12886_v43 = vld [vmem:[#allocation23_spill] sm:$0xff] }
 0x1c7   : > { %12881 = vst [vmem:[#allocation48_spill] sm:$0xff] %v11653_v15  ;;  %v11657_v35 = vpop.f32.mrf.mxu0  ;;  %v1214_v15 = vadd.f32 %v11386_v26, %v12886_v43  ;;  %v2070_v26 = vadd.f32 %v11526_v24, %v1699_v47  ;;  %v1695_v43 = vadd.f32 %v11303_v54, %v1182_v13  ;;  %v2792_v47 = vadd.f32 %v11455_v0, %v2054_v55 }
 0x1c8   : > { %12883 = vst [vmem:[#allocation10_spill] sm:$0xff] %v11657_v35  ;;  %v11659_v11 = vpop.f32.mrf.mxu1  ;;  %v5058_v35 = vld [vmem:[#allocation2 + $0x80] sm:$0x1]  ;;  %v11693_v54 = vadd.f32 %v11468_v17, %v2058_v32 }
 0x1c9   : > { %12884 = vst [vmem:[#allocation49_spill] sm:$0xff] %v11659_v11  ;;  %v8770_v12 = vpop.f32.mrf.mxu0  ;;  %v2050_v11 = vadd.f32 %v11413_v9, %v11111_v30  ;;  %v5059_v34 = vsel %vm11496_vm10, 0, %v5058_v35  ;;  %v2062_v30 = vadd.f32 %v11492_v48, %v12887_v40  ;;  %v1703_v1 = vadd.f32 %v11380_v16, %v1214_v15 }
 0x1ca   : > { %v11663_v39 = vpop.f32.mrf.mxu1  ;;  %5060 = vst [vmem:[#allocation2 + $0x80] sm:$0x1] %v5059_v34  ;;  %v2066_v48 = vadd.f32 %v11513_v53, %v1695_v43  ;;  %v2808_v16 = vadd.f32 %v11521_v33, %v2070_v26  ;;  %v5323_v15 = vshll.u32 %v5287_v42, 16  ;;  %v5073_v34 = vld [vmem:[#allocation2 + $0xa4] sm:$0x1]  ;;  %v2078_v33 = vadd.f32 %v11561_v18, %v1707_v38 }
 0x1cb   : > { %v3593_v22 = vpop.f32.mrf.mxu0  ;;  %v2074_v0 = vadd.f32 %v11541_v21, %v1703_v1  ;;  %v5074_v53 = vsel %vm11496_vm10, 0, %v5073_v34  ;;  %v5068_v26 = vld [vmem:[#allocation2 + $0x98] sm:$0x1]  ;;  %v3269_v21 = vadd.f32 %v11577_v36, %v11410_v23  ;;  %v5395_v43 = vshll.u32 %v5290_v62, 16  ;;  %v12890_v62 = vld [vmem:[#allocation11_spill] sm:$0xff] }
 0x1cc   : > { %v8734_v4 = vpop.f32.mrf.mxu1  ;;  %5075 = vst [vmem:[#allocation2 + $0xa4] sm:$0x1] %v5074_v53  ;;  %v5069_v40 = vsel %vm11496_vm10, 0, %v5068_v26  ;;  %v11716_v18 = vadd.f32 %v11506_v61, %v2066_v48  ;;  %v11721_v42 = vrot.slane %v5323_v15, 5  ;;  %v3272_v23 = vadd.f32 %v11583_v28, %v11415_v25 }
 0x1cd   : > { %v3291_v19 = vadd.f32 %v8734_v4, %v11518_v45  ;;  %v8771_v46 = vpop.f32.mrf.mxu0  ;;  %v2788_v45 = vadd.f32 %v11408_v58, %v2050_v11  ;;  %v5289_v4 = vld [vmem:[#allocation2 + $0x20] sm:$0x1]  ;;  %v11701_v58 = vadd.f32 %v11487_v8, %v2062_v30  ;;  %v5347_v11 = vshll.u32 %v5288_v41, 16  ;;  %5070 = vst [vmem:[#allocation2 + $0x98] sm:$0x1] %v5069_v40 }
 0x1ce   : > { %v3222_v9 = vpop.f32.mrf.mxu1  ;;  %v5371_v32 = vshll.u32 %v5289_v4, 16  ;;  %v3271_v8 = vadd.f32 %v11572_v52, %v11405_v10  ;;  %v2812_v10 = vadd.f32 %v11534_v49, %v2074_v0  ;;  %v11730_v61 = vadd.f32 %v11554_v60, %v2078_v33  ;;  %v5291_v41 = vld [vmem:[#allocation2 + $0x38] sm:$0x1]  ;;  %v12895_v33 = vld [vmem:[#allocation18_spill] sm:$0xff] }
 0x1cf   : > { %v11687_v20 = vadd.f32 %v8770_v12, %v3291_v19  ;;  %v3289_v35 = vadd.f32 %v3222_v9, %v11523_v37  ;;  %v3596_v24 = vpop.f32.mrf.mxu0  ;;  %v3270_v52 = vadd.f32 %v11589_v27, %v2788_v45  ;;  %v11727_v1 = vrot.slane %v5347_v11, 5  ;;  %v5292_v45 = vld [vmem:[#allocation2 + $0x44] sm:$0x1]  ;;  %v12894_v11 = vld [vmem:[#allocation32_spill] sm:$0xff] }
 0x1d0   : > { %v8735_v13 = vpop.f32.mrf.mxu1  ;;  %v11738_v49 = vadd.f32 %v11559_v51, %v3271_v8  ;;  %v11741_v25 = vadd.f32 %v11570_v57, %v3269_v21  ;;  %v3275_v28 = vadd.f32 %v11593_v7, %v11452_v5  ;;  %v11745_v60 = vrot.slane %v5395_v43, 5  ;;  %v12889_v7 = vld [vmem:[#allocation28_spill] sm:$0xff] }
 0x1d1   : > { %v11697_v63 = vadd.f32 %v3593_v22, %v3289_v35  ;;  %v3292_v12 = vadd.f32 %v8735_v13, %v11528_v59  ;;  %v8774_v37 = vpop.f32.mrf.mxu0  ;;  %v3276_v48 = vadd.f32 %v11601_v6, %v11462_v14  ;;  %v11755_v57 = vadd.f32 %v11575_v44, %v3272_v23  ;;  %v12893_v44 = vld [vmem:[#allocation4_spill] sm:$0xff]  ;;  %v5293_v23 = vld [vmem:[#allocation2 + $0x50] sm:$0x1] }
 0x1d2   : > { %v3225_v17 = vpop.f32.mrf.mxu1  ;;  %v5419_v15 = vshll.u32 %v5291_v41, 16  ;;  %v5443_v0 = vshll.u32 %v5292_v45, 16  ;;  %v3277_v53 = vadd.f32 %v12894_v11, %v12893_v44  ;;  %v12898_v8 = vld [vmem:[#allocation24_spill] sm:$0xff]  ;;  %v12903_v41 = vld [vmem:[#allocation38_spill] sm:$0xff]  ;;  %v12910_v44 = vld [vmem:[#allocation31_spill] sm:$0xff] }
 0x1d3   : > { %v11707_v22 = vadd.f32 %v8771_v46, %v3292_v12  ;;  %v3290_v55 = vadd.f32 %v3225_v17, %v2808_v16  ;;  %v3609_v59 = vpop.f32.mrf.mxu0  ;;  %v12888_v16 = vld [vmem:[#allocation19_spill] sm:$0xff]  ;;  %v3274_v12 = vadd.f32 %v12889_v7, %v2792_v47  ;;  %v12897_v47 = vld [vmem:[#allocation36_spill] sm:$0xff]  ;;  %v12907_v7 = vld [vmem:[#allocation14_spill] sm:$0xff] }
 0x1d4   : > { %v8738_v19 = vpop.f32.mrf.mxu1  ;;  %v11758_v5 = vadd.f32 %v12888_v16, %v3270_v52  ;;  %v12901_v52 = vld [vmem:[#allocation26_spill] sm:$0xff] }
 0x1d5   : > { %v11718_v46 = vadd.f32 %v3596_v24, %v3290_v55  ;;  %v3295_v30 = vadd.f32 %v8738_v19, %v11531_v29  ;;  %v8775_v9 = vpop.f32.mrf.mxu0  ;;  %v11735_v24 = vrot.slane %v5371_v32, 5  ;;  %v12896_v55 = vld [vmem:[#allocation34_spill] sm:$0xff]  ;;  %v3278_v32 = vadd.f32 %v12897_v47, %v11693_v54  ;;  %v12899_v19 = vld [vmem:[#allocation25_spill] sm:$0xff]  ;;  %v12912_v47 = vld [vmem:[#allocation20_spill] sm:$0xff] }
 0x1d6   : > { %v3238_v36 = vpop.f32.mrf.mxu1  ;;  %v11778_v43 = vadd.f32 %v12899_v19, %v3276_v48  ;;  %v12904_v54 = vld [vmem:[#allocation17_spill] sm:$0xff]  ;;  %v12906_v48 = vld [vmem:[#allocation27_spill] sm:$0xff] }
 0x1d7   : > { %v11732_v38 = vadd.f32 %v8774_v37, %v3295_v30  ;;  %v3293_v29 = vadd.f32 %v3238_v36, %v11538_v31  ;;  %v3612_v35 = vpop.f32.mrf.mxu0  ;;  %v3273_v31 = vadd.f32 %v11597_v3, %v11457_v56  ;;  %v12891_v56 = vld [vmem:[#allocation30_spill] sm:$0xff]  ;;  %v12900_v30 = vld [vmem:[#allocation13_spill] sm:$0xff]  ;;  %v11784_v36 = vadd.f32 %v12901_v52, %v3274_v12 }
 0x1d8   : > { %v8739_v27 = vpop.f32.mrf.mxu1  ;;  %v3279_v3 = vadd.f32 %v12891_v56, %v12890_v62  ;;  %v11798_v56 = vrot.slane %v5443_v0, 5  ;;  %v5294_v12 = vld [vmem:[#allocation2 + $0x5c] sm:$0x1]  ;;  %v5295_v52 = vld [vmem:[#allocation2 + $0x68] sm:$0x1] }
 0x1d9   : > { %v11751_v13 = vadd.f32 %v3609_v59, %v3293_v29  ;;  %v3296_v51 = vadd.f32 %v8739_v27, %v11548_v50  ;;  %v8778_v4 = vpop.f32.mrf.mxu0  ;;  %v12892_v50 = vld [vmem:[#allocation21_spill] sm:$0xff]  ;;  %v3280_v59 = vadd.f32 %v12896_v55, %v12895_v33  ;;  %v11775_v21 = vadd.f32 %v12898_v8, %v3273_v31  ;;  %v12902_v29 = vld [vmem:[#allocation15_spill] sm:$0xff]  ;;  %v12905_v27 = vld [vmem:[#allocation40_spill] sm:$0xff] }
 0x1da   : > { %v3241_v37 = vpop.f32.mrf.mxu1  ;;  %v11766_v17 = vadd.f32 %v12892_v50, %v3275_v28  ;;  %v3283_v28 = vadd.f32 %v12903_v41, %v12902_v29  ;;  %v3281_v45 = vadd.f32 %v12905_v27, %v12904_v54  ;;  %v11793_v16 = vadd.f32 %v12906_v48, %v3279_v3  ;;  %12908 = vst [vmem:[#allocation12_spill] sm:$0xff] %v11798_v56  ;;  %v12911_v33 = vld [vmem:[#allocation33_spill] sm:$0xff]  ;;  %v12914_v8 = vld [vmem:[#allocation44_spill] sm:$0xff]  ;;  %v12919_v27 = vld [vmem:[#allocation46_spill] sm:$0xff] }
 0x1db   : > { %v11763_v34 = vadd.f32 %v8775_v9, %v3296_v51  ;;  %v3294_v14 = vadd.f32 %v3241_v37, %v2812_v10  ;;  %v3625_v6 = vpop.f32.mrf.mxu0  ;;  %v11790_v51 = vrot.slane %v5419_v15, 5  ;;  %v11804_v11 = vadd.f32 %v12910_v44, %v3280_v59  ;;  %v5296_v29 = vld [vmem:[#allocation2 + $0x74] sm:$0x1]  ;;  %v12916_v59 = vld [vmem:[#allocation35_spill] sm:$0xff]  ;;  %v12923_v44 = vld [vmem:[#allocation49_spill] sm:$0xff] }
 0x1dc   : > { %v8742_v26 = vpop.f32.mrf.mxu1  ;;  %v11807_v15 = vadd.f32 %v12911_v33, %v3278_v32  ;;  %v5467_v3 = vshll.u32 %v5293_v23, 16  ;;  %v3282_v19 = vadd.f32 %v12914_v8, %v11701_v58  ;;  %v11817_v41 = vadd.f32 %v12916_v59, %v3283_v28  ;;  %v12917_v32 = vld [vmem:[#allocation37_spill] sm:$0xff]  ;;  %v12918_v23 = vld [vmem:[#allocation6_spill] sm:$0xff]  ;;  %v12921_v58 = vld [vmem:[#allocation48_spill] sm:$0xff] }
 0x1dd   : > { %v11780_v40 = vadd.f32 %v3612_v35, %v3294_v14  ;;  %v3299_v9 = vadd.f32 %v8742_v26, %v12900_v30  ;;  %v8779_v10 = vpop.f32.mrf.mxu0  ;;  %v12909_v14 = vld [vmem:[#allocation29_spill] sm:$0xff]  ;;  %v12915_v30 = vld [vmem:[#allocation16_spill] sm:$0xff]  ;;  %v11820_v54 = vadd.f32 %v12917_v32, %v3281_v45  ;;  %v3286_v45 = vadd.f32 %v11663_v39, %v11716_v18  ;;  %v12926_v32 = vld [vmem:[#allocation39_spill] sm:$0xff] }
 0x1de   : > { %v3254_v31 = vpop.f32.mrf.mxu1  ;;  %v11801_v50 = vadd.f32 %v12909_v14, %v3277_v53  ;;  %v12920_v14 = vld [vmem:[#allocation9_spill] sm:$0xff]  ;;  %v5515_v59 = vshll.u32 %v5295_v52, 16  ;;  %v12929_v39 = vld [vmem:[#allocation43_spill] sm:$0xff] }
 0x1df   : > { %v11795_v35 = vadd.f32 %v8778_v4, %v3299_v9  ;;  %v3297_v37 = vadd.f32 %v3254_v31, %v12907_v7  ;;  %v3628_v62 = vpop.f32.mrf.mxu0  ;;  %v12913_v4 = vld [vmem:[#allocation42_spill] sm:$0xff]  ;;  %v3287_v31 = vadd.f32 %v12919_v27, %v12918_v23  ;;  %v5491_v7 = vshll.u32 %v5294_v12, 16  ;;  %v12927_v27 = vld [vmem:[#allocation41_spill] sm:$0xff] }
 0x1e0   : > { %v8743_v55 = vpop.f32.mrf.mxu1  ;;  %v3284_v26 = vadd.f32 %v12913_v4, %v12912_v47  ;;  %v5298_v4 = vld [vmem:[#allocation2 + $0x8c] sm:$0x1]  ;;  %v5539_v12 = vshll.u32 %v5296_v29, 16 }
 0x1e1   : > { %v11813_v0 = vadd.f32 %v3625_v6, %v3297_v37  ;;  %v3300_v9 = vadd.f32 %v8743_v55, %v12915_v30  ;;  %v8822_v53 = vpop.f32.mrf.mxu0  ;;  %v3285_v6 = vadd.f32 %v12921_v58, %v12920_v14  ;;  %v12922_v37 = vld [vmem:[#allocation7_spill] sm:$0xff]  ;;  %v11833_v30 = vrot.slane %v5467_v3, 5  ;;  %v5300_v58 = vld [vmem:[#allocation2 + $0xa4] sm:$0x1] }
 0x1e2   : > { %v3257_v48 = vpop.f32.mrf.mxu1  ;;  %v3288_v33 = vadd.f32 %v12923_v44, %v12922_v37  ;;  %v11836_v23 = vadd.f32 %v12926_v32, %v3284_v26  ;;  %v11839_v14 = vadd.f32 %v12927_v27, %v3282_v19  ;;  %v5078_v37 = vld [vmem:[#allocation2 + $0xb0] sm:$0x1]  ;;  %v11845_v18 = vadd.f32 %v12929_v39, %v3287_v31  ;;  %v12931_v19 = vld [vmem:[#allocation45_spill] sm:$0xff]  ;;  %v5299_v27 = vld [vmem:[#allocation2 + $0x98] sm:$0x1] }
 0x1e3   : > { %v11828_v55 = vadd.f32 %v8779_v10, %v3300_v9  ;;  %v3298_v47 = vadd.f32 %v3257_v48, %v11730_v61  ;;  %v4733_v28 = vpop.f32.mrf.mxu0  ;;  %12925 = vst [vmem:[#allocation8_spill] sm:$0xff] %v11833_v30  ;;  %v5297_v48 = vld [vmem:[#allocation2 + $0x80] sm:$0x1]  ;;  %v11847_v52 = vrot.slane %v5491_v7, 5  ;;  %v5587_v29 = vshll.u32 %v5298_v4, 16  ;;  %v12933_v7 = vld [vmem:[#allocation10_spill] sm:$0xff] }
 0x1e4   : > { %v8786_v8 = vpop.f32.mrf.mxu1  ;;  %v5079_v26 = vsel %vm11496_vm10, 0, %v5078_v37  ;;  %v11852_v44 = vadd.f32 %v12931_v19, %v3285_v6  ;;  %v6635_v31 = vld [vmem:[#allocation2 + $0x14] sm:$0x1]  ;;  %v6638_v39 = vld [vmem:[#allocation2 + $0x20] sm:$0x1]  ;;  %v11866_v37 = vrot.slane %v5539_v12, 5 }
 0x1e5   : > { %12924 = vst [vmem:[#allocation23_spill] sm:$0xff] %v11828_v55  ;;  %v11841_v10 = vadd.f32 %v3628_v62, %v3298_v47  ;;  %v4380_v61 = vadd.f32 %v8786_v8, %v11738_v49  ;;  %v8823_v9 = vpop.f32.mrf.mxu0  ;;  %12930 = vst [vmem:[#allocation28_spill] sm:$0xff] %v11847_v52  ;;  %v12932_v62 = vld [vmem:[#allocation47_spill] sm:$0xff]  ;;  %v11859_v52 = vadd.f32 %v12933_v7, %v3286_v45  ;;  %v11864_v4 = vld [vmem:[%s12675_s2] ss:$0 sm:$0xff]  ;;  %v11874_v19 = vrot.slane %v5515_v59, 5 }
 0x1e6   : > { %v4251_v3 = vpop.f32.mrf.mxu1  ;;  %v11855_v47 = vadd.f32 %v12932_v62, %v3288_v33  ;;  %5080 = vst [vmem:[#allocation2 + $0xb0] sm:$0x1] %v5079_v26  ;;  %12934 = vst [vmem:[#allocation11_spill] sm:$0xff] %v11866_v37  ;;  %v5563_v33 = vshll.u32 %v5297_v48, 16  ;;  %v6641_v62 = vld [vmem:[#allocation2 + $0x2c] sm:$0x1] }
 0x1e7   : > { %12928 = vst [vmem:[#allocation19_spill] sm:$0xff] %v11841_v10  ;;  %v4862_v49 = vadd.f32 %v8822_v53, %v4380_v61  ;;  %v4378_v8 = vadd.f32 %v4251_v3, %v11741_v25  ;;  %v4736_v32 = vpop.f32.mrf.mxu0  ;;  %v5635_v53 = vshll.u32 %v5300_v58, 16  ;;  %v11871_v25 = vld [vmem:[%s12676_s3] ss:$0 sm:$0xff]  ;;  %v11876_v30 = vrot.slane %v5587_v29, 5 }
 0x1e8   : > { %v8787_v6 = vpop.f32.mrf.mxu1  ;;  %v5611_v12 = vshll.u32 %v5299_v27, 16  ;;  %v6701_v37 = vshll.u32 %v6635_v31, 16  ;;  %v6725_v48 = vshll.u32 %v6638_v39, 16  ;;  %v5083_v58 = vld [vmem:[#allocation2 + $0xbc] sm:$0x1] }
 0x1e9   : > { %v4894_v61 = vmax.f32 %v4862_v49, 0.0  ;;  %v4860_v3 = vadd.f32 %v4733_v28, %v4378_v8  ;;  %v4381_v45 = vadd.f32 %v8787_v6, %v11755_v57  ;;  %v8826_v26 = vpop.f32.mrf.mxu0  ;;  %v11880_v57 = vrot.slane %v5563_v33, 5 }
 0x1ea   : > { %v4254_v7 = vpop.f32.mrf.mxu1  ;;  %v11882_v59 = vrot.slane %v5635_v53, 5  ;;  %v5084_v29 = vsel %vm11496_vm10, 0, %v5083_v58  ;;  %v6749_v6 = vshll.u32 %v6641_v62, 16  ;;  %v11891_v33 = vrot.slane %v6701_v37, 5 }
 0x1eb   : > { %v4933_v49 = vmul.f32 %v11864_v4, %v4894_v61  ;;  %v4892_v10 = vmax.f32 %v4860_v3, 0.0  ;;  %v4863_v56 = vadd.f32 %v8823_v9, %v4381_v45  ;;  %v4379_v55 = vadd.f32 %v4254_v7, %v11758_v5  ;;  %v4749_v28 = vpop.f32.mrf.mxu0  ;;  %5085 = vst [vmem:[#allocation2 + $0xbc] sm:$0x1] %v5084_v29 }
 0x1ec   : > { %v8790_v8 = vpop.f32.mrf.mxu1  ;;  %v11889_v45 = vrot.slane %v5611_v12, 5  ;;  %v11893_v7 = vrot.slane %v6725_v48, 5  ;;  %v6644_v12 = vld [vmem:[#allocation2 + $0x38] sm:$0x1] }
 0x1ed   : > { %v4972_v27 = vadd.f32 %v11871_v25, %v4933_v49  ;;  %v4931_v31 = vmul.f32 %v11864_v4, %v4892_v10  ;;  %v4895_v39 = vmax.f32 %v4863_v56, 0.0  ;;  %v4861_v61 = vadd.f32 %v4736_v32, %v4379_v55  ;;  %v8827_v3 = vpop.f32.mrf.mxu0  ;;  %v5301_v53 = vld [vmem:[#allocation2 + $0xb0] sm:$0x1] }
 0x1ee   : > { %v4384_v5 = vadd.f32 %v8790_v8, %v11766_v17  ;;  %v4267_v9 = vpop.f32.mrf.mxu1  ;;  %v5659_v17 = vshll.u32 %v5301_v53, 16  ;;  %v11898_v8 = vrot.slane %v6749_v6, 5 }
 0x1ef   : > { %v8264_v58 = vpack.c.bf16 %v4972_v27, %v4972_v27  ;;  %v4970_v62 = vadd.f32 %v11871_v25, %v4931_v31  ;;  %v4934_v49 = vmul.f32 %v11864_v4, %v4895_v39  ;;  %v4893_v10 = vmax.f32 %v4861_v61, 0.0  ;;  %v4752_v56 = vpop.f32.mrf.mxu0  ;;  %v6647_v61 = vld [vmem:[#allocation2 + $0x44] sm:$0x1] }
 0x1f0   : > { %v4866_v55 = vadd.f32 %v8826_v26, %v4384_v5  ;;  %v4382_v32 = vadd.f32 %v4267_v9, %v11775_v21  ;;  %v8791_v29 = vpop.f32.mrf.mxu1  ;;  %12935 = vst [vmem:[#allocation30_spill] sm:$0xff] %v11898_v8  ;;  %v11904_v21 = vrot.slane %v5659_v17, 5  ;;  %v6773_v9 = vshll.u32 %v6644_v12, 16 }
 0x1f1   : > { %5221 = vst.msk [vmem:[#allocation2 + $0xc] sm:$0xf] %vm5002_vm7, %v8264_v58  ;;  %v8262_v37 = vpack.c.bf16 %v4970_v62, %v4970_v62  ;;  %v4973_v48 = vadd.f32 %v11871_v25, %v4934_v49  ;;  %v4932_v27 = vmul.f32 %v11864_v4, %v4893_v10  ;;  %v4385_v31 = vadd.f32 %v8791_v29, %v11778_v43  ;;  %v8830_v39 = vpop.f32.mrf.mxu0 }
 0x1f2   : > { %v4898_v2 = vmax.f32 %v4866_v55, 0.0  ;;  %v4864_v26 = vadd.f32 %v4749_v28, %v4382_v32  ;;  %v4270_v5 = vpop.f32.mrf.mxu1  ;;  %v5302_v8 = vld [vmem:[#allocation2 + $0xbc] sm:$0x1]  ;;  %v11910_v55 = vrot.slane %v6773_v9, 5  ;;  %v6797_v28 = vshll.u32 %v6647_v61, 16 }
 0x1f3   : > { %5219 = vst.msk [vmem:[#allocation2] sm:$0xf] %vm5002_vm7, %v8262_v37  ;;  %v8265_v6 = vpack.c.bf16 %v4973_v48, %v4973_v48  ;;  %v4971_v53 = vadd.f32 %v11871_v25, %v4932_v27  ;;  %v4867_v58 = vadd.f32 %v8827_v3, %v4385_v31  ;;  %v4383_v62 = vadd.f32 %v4270_v5, %v11784_v36  ;;  %v4765_v49 = vpop.f32.mrf.mxu0 }
 0x1f4   : > { %v4937_v10 = vmul.f32 %v11864_v4, %v4898_v2  ;;  %v4896_v43 = vmax.f32 %v4864_v26, 0.0  ;;  %v8794_v29 = vpop.f32.mrf.mxu1  ;;  %v5683_v2 = vshll.u32 %v5302_v8, 16  ;;  %v11916_v31 = vrot.slane %v6797_v28, 5  ;;  %v11918_v26 = vld [vmem:[#allocation2 + $0x50] sm:$0x1] }
 0x1f5   : > { %5222 = vst.msk [vmem:[#allocation2 + $0x10] sm:$0xf] %vm5002_vm7, %v8265_v6  ;;  %v8263_v32 = vpack.c.bf16 %v4971_v53, %v4971_v53  ;;  %v4899_v17 = vmax.f32 %v4867_v58, 0.0  ;;  %v4865_v12 = vadd.f32 %v4752_v56, %v4383_v62  ;;  %v4388_v37 = vadd.f32 %v8794_v29, %v11793_v16  ;;  %v8831_v48 = vpop.f32.mrf.mxu0  ;;  %12937 = vst [vmem:[#allocation4_spill] sm:$0xff] %v11918_v26 }
 0x1f6   : > { %v4976_v3 = vadd.f32 %v11871_v25, %v4937_v10  ;;  %v4935_v36 = vmul.f32 %v11864_v4, %v4896_v43  ;;  %v4283_v27 = vpop.f32.mrf.mxu1  ;;  %12936 = vst [vmem:[#allocation21_spill] sm:$0xff] %v11916_v31  ;;  %v11926_v8 = vrot.slane %v5683_v2, 5 }
 0x1f7   : > { %5220 = vst.msk [vmem:[#allocation2 + $0x4] sm:$0xf] %vm5002_vm7, %v8263_v32  ;;  %v4938_v61 = vmul.f32 %v11864_v4, %v4899_v17  ;;  %v4897_v5 = vmax.f32 %v4865_v12, 0.0  ;;  %v4870_v9 = vadd.f32 %v8830_v39, %v4388_v37  ;;  %v4386_v56 = vadd.f32 %v4283_v27, %v11801_v50  ;;  %v4768_v16 = vpop.f32.mrf.mxu0 }
 0x1f8   : > { %v8268_v6 = vpack.c.bf16 %v4976_v3, %v4976_v3  ;;  %v4974_v53 = vadd.f32 %v11871_v25, %v4935_v36  ;;  %v8795_v58 = vpop.f32.mrf.mxu1  ;;  %v11924_v62 = vld [vmem:[#allocation2 + $0xc] sm:$0xf] }
 0x1f9   : > { %v4977_v43 = vadd.f32 %v11871_v25, %v4938_v61  ;;  %v4936_v29 = vmul.f32 %v11864_v4, %v4897_v5  ;;  %v4902_v28 = vmax.f32 %v4870_v9, 0.0  ;;  %v4868_v32 = vadd.f32 %v4765_v49, %v4386_v56  ;;  %v8834_v39 = vpop.f32.mrf.mxu0 }
 0x1fa   : > { %5225 = vst.msk [vmem:[#allocation2 + $0x24] sm:$0xf] %vm5002_vm7, %v8268_v6  ;;  %v8266_v50 = vpack.c.bf16 %v4974_v53, %v4974_v53  ;;  %v4389_v17 = vadd.f32 %v8795_v58, %v11804_v11  ;;  %v4286_v12 = vpop.f32.mrf.mxu1  ;;  %v11933_v37 = vld [vmem:[#allocation2] sm:$0xf]  ;;  %v5328_v3 = vshrl.u32 %v11924_v62, 16  ;;  %v5331_v36 = vshll.u32 %v11924_v62, 16 }
 0x1fb   : > { %v8269_v27 = vpack.c.bf16 %v4977_v43, %v4977_v43  ;;  %v4975_v2 = vadd.f32 %v11871_v25, %v4936_v29  ;;  %v4941_v61 = vmul.f32 %v11864_v4, %v4902_v28  ;;  %v4900_v5 = vmax.f32 %v4868_v32, 0.0  ;;  %v4781_v49 = vpop.f32.mrf.mxu0 }
 0x1fc   : > { %5223 = vst.msk [vmem:[#allocation2 + $0x18] sm:$0xf] %vm5002_vm7, %v8266_v50  ;;  %v4871_v9 = vadd.f32 %v8831_v48, %v4389_v17  ;;  %v4387_v56 = vadd.f32 %v4286_v12, %v11807_v15  ;;  %v8798_v11 = vpop.f32.mrf.mxu1  ;;  %v5304_v6 = vshrl.u32 %v11933_v37, 16  ;;  %v5307_v53 = vshll.u32 %v11933_v37, 16 }
 0x1fd   : > { %5226 = vst.msk [vmem:[#allocation2 + $0x28] sm:$0xf] %vm5002_vm7, %v8269_v27  ;;  %v8267_v58 = vpack.c.bf16 %v4975_v2, %v4975_v2  ;;  %v4980_v43 = vadd.f32 %v11871_v25, %v4941_v61  ;;  %v4939_v29 = vmul.f32 %v11864_v4, %v4900_v5  ;;  %v4392_v28 = vadd.f32 %v8798_v11, %v11817_v41  ;;  %v8835_v32 = vpop.f32.mrf.mxu0 }
 0x1fe   : > { %v4903_v10 = vmax.f32 %v4871_v9, 0.0  ;;  %v4869_v50 = vadd.f32 %v4768_v16, %v4387_v56  ;;  %v4299_v48 = vpop.f32.mrf.mxu1  ;;  %v5252_v17 = vld [vmem:[#allocation2 + $0x4] sm:$0xf]  ;;  %v11947_v15 = vrot.slane %v5304_v6, 4  ;;  %v11949_v12 = vrot.slane %v5307_v53, 5 }
 0x1ff   : > { %5224 = vst.msk [vmem:[#allocation2 + $0x1c] sm:$0xf] %vm5002_vm7, %v8267_v58  ;;  %v8272_v31 = vpack.c.bf16 %v4980_v43, %v4980_v43  ;;  %v4978_v27 = vadd.f32 %v11871_v25, %v4939_v29  ;;  %v4874_v2 = vadd.f32 %v8834_v39, %v4392_v28  ;;  %v4390_v61 = vadd.f32 %v4299_v48, %v11820_v54  ;;  %v4784_v5 = vpop.f32.mrf.mxu0 }
 0x200   : > { %v4942_v41 = vmul.f32 %v11864_v4, %v4903_v10  ;;  %v4901_v11 = vmax.f32 %v4869_v50, 0.0  ;;  %v8799_v9 = vpop.f32.mrf.mxu1  ;;  %v5313_v16 = vshll.u32 %v5252_v17, 16  ;;  %v5317_v56 = vshrl.u32 %v5252_v17, 16 }
 0x201   : > { %5229 = vst.msk [vmem:[#allocation2 + $0x3c] sm:$0xf] %vm5002_vm7, %v8272_v31  ;;  %v8270_v6 = vpack.c.bf16 %v4978_v27, %v4978_v27  ;;  %v4906_v53 = vmax.f32 %v4874_v2, 0.0  ;;  %v4872_v26 = vadd.f32 %v4781_v49, %v4390_v61  ;;  %v4393_v58 = vadd.f32 %v8799_v9, %v11836_v23  ;;  %v5254_v27 = vld [vmem:[#allocation2 + $0x10] sm:$0xf] }
 0x202   : > { %v8838_v43 = vpop.f32.mrf.mxu0  ;;  %v4981_v29 = vadd.f32 %v11871_v25, %v4942_v41  ;;  %v4940_v39 = vmul.f32 %v11864_v4, %v4901_v11  ;;  %v11959_v54 = vrot.slane %v5313_v16, 5  ;;  %v11961_v28 = vrot.slane %v5317_v56, 4  ;;  %v4302_v10 = vpop.f32.mrf.mxu1 }
 0x203   : > { %5227 = vst.msk [vmem:[#allocation2 + $0x30] sm:$0xf] %vm5002_vm7, %v8270_v6  ;;  %v4945_v50 = vmul.f32 %v11864_v4, %v4906_v53  ;;  %v4904_v31 = vmax.f32 %v4872_v26, 0.0  ;;  %v4875_v48 = vadd.f32 %v8835_v32, %v4393_v58  ;;  %v8149_v49 = vcombine.low %v11933_v37, %v5252_v17 }
 0x204   : > { %v4797_v23 = vpop.f32.mrf.mxu0  ;;  %v8273_v2 = vpack.c.bf16 %v4981_v29, %v4981_v29  ;;  %v4979_v61 = vadd.f32 %v11871_v25, %v4940_v39  ;;  %v4391_v41 = vadd.f32 %v4302_v10, %v11839_v14  ;;  %v11968_v11 = vrot.slane %v5328_v3, 4  ;;  %v8802_v9 = vpop.f32.mrf.mxu1 }
 0x205   : > { %v4984_v16 = vadd.f32 %v11871_v25, %v4945_v50  ;;  %v4943_v56 = vmul.f32 %v11864_v4, %v4904_v31  ;;  %v4907_v6 = vmax.f32 %v4875_v48, 0.0  ;;  %8892 = vmatprep.mubr.msk.bf16.mxu0 %vm730_vm2, %v8149_v49  ;;  %v11973_v26 = vrot.slane %v5331_v36, 5  ;;  %v5255_v50 = vld [vmem:[#allocation2 + $0x18] sm:$0xf]  ;;  %v9095_v36 = vld [vmem:[%s12677_s4 + $0x30] sm:$0xff]  }
 0x206   : > { %v8839_v37 = vpop.f32.mrf.mxu0  ;;  %5230 = vst.msk [vmem:[#allocation2 + $0x40] sm:$0xf] %vm5002_vm7, %v8273_v2  ;;  %v8271_v32 = vpack.c.bf16 %v4979_v61, %v4979_v61  ;;  %v4873_v17 = vadd.f32 %v4784_v5, %v4391_v41  ;;  %v5337_v53 = vshll.u32 %v5254_v27, 16  ;;  %v5341_v58 = vshrl.u32 %v5254_v27, 16  ;;  %v4315_v14 = vpop.f32.mrf.mxu1  ;;  %v5256_v61 = vld [vmem:[#allocation2 + $0x1c] sm:$0xf] }
 0x207   : > { %v8276_v3 = vpack.c.bf16 %v4984_v16, %v4984_v16  ;;  %v4982_v29 = vadd.f32 %v11871_v25, %v4943_v56  ;;  %v4946_v39 = vmul.f32 %v11864_v4, %v4907_v6  ;;  %v8150_v10 = vcombine.low %v11924_v62, %v5254_v27 }
 0x208   : > { %5228 = vst.msk [vmem:[#allocation2 + $0x34] sm:$0xf] %vm5002_vm7, %v8271_v32  ;;  %v4905_v31 = vmax.f32 %v4873_v17, 0.0  ;;  %v11983_v48 = vrot.slane %v5337_v53, 5  ;;  %v11985_v5 = vrot.slane %v5341_v58, 4  ;;  %v4396_v49 = vadd.f32 %v8802_v9, %v11845_v18  ;;  %v8803_v2 = vpop.f32.mrf.mxu1  ;;  %v4800_v41 = vpop.f32.mrf.mxu0  ;;  %v12938_v9 = vld [vmem:[#allocation5_spill] sm:$0xff] }
 0x209   : > { %5233 = vst.msk [vmem:[#allocation2 + $0x54] sm:$0xf] %vm5002_vm7, %v8276_v3  ;;  %v8274_v62 = vpack.c.bf16 %v4982_v29, %v4982_v29  ;;  %v4985_v27 = vadd.f32 %v11871_v25, %v4946_v39  ;;  %8893 = vmatmul.mubr.msk.bf16.vlgmr.msra.gmra.mxu0 %vm730_vm2, %v8150_v10  ;;  %v4394_v16 = vadd.f32 %v4315_v14, %v11852_v44  ;;  %v5352_v17 = vshrl.u32 %v5255_v50, 16 }
 0x20a   : > { %v4397_v56 = vadd.f32 %v8803_v2, %v11855_v47  ;;  %v4944_v6 = vmul.f32 %v11864_v4, %v4905_v31  ;;  %v4878_v32 = vadd.f32 %v8838_v43, %v4396_v49  ;;  %v5355_v53 = vshll.u32 %v5255_v50, 16  ;;  %v4318_v18 = vpop.f32.mrf.mxu1  ;;  %8961 = vmatpush3.bf16.msra.mxu0 %v12938_v9  ;;  %v12001_v31 = vpop.f32.mrf.mxu0 }
 0x20b   : > { %5231 = vst.msk [vmem:[#allocation2 + $0x48] sm:$0xf] %vm5002_vm7, %v8274_v62  ;;  %v8277_v58 = vpack.c.bf16 %v4985_v27, %v4985_v27  ;;  %v4876_v3 = vadd.f32 %v4797_v23, %v4394_v16  ;;  %v5361_v39 = vshll.u32 %v5256_v61, 16  ;;  %8962 = vmatprep.subr.bf16.mxu0 %v9095_v36  ;;  %v11997_v14 = vrot.slane %v5352_v17, 4 }
 0x20c   : > { %v4879_v29 = vadd.f32 %v8839_v37, %v4397_v56  ;;  %v4983_v10 = vadd.f32 %v11871_v25, %v4944_v6  ;;  %v4910_v44 = vmax.f32 %v4878_v32, 0.0  ;;  %v11999_v47 = vrot.slane %v5355_v53, 5  ;;  %v8806_v43 = vpop.f32.mrf.mxu1  ;;  %v5257_v37 = vld [vmem:[#allocation2 + $0x24] sm:$0xf] }
 0x20d   : > { %5234 = vst.msk [vmem:[#allocation2 + $0x58] sm:$0xf] %vm5002_vm7, %v8277_v58  ;;  %v4908_v49 = vmax.f32 %v4876_v3, 0.0  ;;  %v12004_v62 = vrot.slane %v5361_v39, 5  ;;  %v5365_v23 = vshrl.u32 %v5256_v61, 16  ;;  %v8151_v56 = vcombine.low %v5255_v50, %v5256_v61  ;;  %v4813_v61 = vpop.f32.mrf.mxu0 }
 0x20e   : > { %v4911_v2 = vmax.f32 %v4879_v29, 0.0  ;;  %v8275_v27 = vpack.c.bf16 %v4983_v10, %v4983_v10  ;;  %v4949_v16 = vmul.f32 %v11864_v4, %v4910_v44  ;;  %v4395_v6 = vadd.f32 %v4318_v18, %v11859_v52  ;;  %v4331_v32 = vpop.f32.mrf.mxu1  ;;  %8963 = vmatpush3.bf16.msra.mxu0 %v9095_v36  ;;  %v5258_v44 = vld [vmem:[#allocation2 + $0x28] sm:$0xf] }
 0x20f   : > { %v4947_v17 = vmul.f32 %v11864_v4, %v4908_v49  ;;  %v12010_v9 = vrot.slane %v5365_v23, 4  ;;  %v5310_v58 = vor.u32 %v11949_v12, %v11947_v15  ;;  %8896 = vmatprep.mubr.msk.bf16.mxu0 %vm730_vm2, %v8151_v56  ;;  %v5320_v52 = vor.u32 %v11961_v28, %v11959_v54 }
 0x210   : > { %v4950_v53 = vmul.f32 %v11864_v4, %v4911_v2  ;;  %5232 = vst.msk [vmem:[#allocation2 + $0x4c] sm:$0xf] %vm5002_vm7, %v8275_v27  ;;  %v4988_v3 = vadd.f32 %v11871_v25, %v4949_v16  ;;  %v4877_v50 = vadd.f32 %v4800_v41, %v4395_v6  ;;  %v5376_v36 = vshrl.u32 %v5257_v37, 16  ;;  %v8807_v18 = vpop.f32.mrf.mxu1 }
 0x211   : > { %v4986_v29 = vadd.f32 %v11871_v25, %v4947_v17  ;;  %v5311_v10 = vrot.slane %v5310_v58, 4  ;;  %v5379_v15 = vshll.u32 %v5257_v37, 16  ;;  %v5321_v2 = vrot.slane %v5320_v52, 4 }
 0x212   : > { %v4989_v39 = vadd.f32 %v11871_v25, %v4950_v53  ;;  %v8280_v12 = vpack.c.bf16 %v4988_v3, %v4988_v3  ;;  %v4909_v49 = vmax.f32 %v4877_v50, 0.0  ;;  %v12021_v23 = vrot.slane %v5376_v36, 4  ;;  %v8843_v3 = vpop.f32.mrf.mxu0  ;;  %v4334_v50 = vpop.f32.mrf.mxu1 }
 0x213   : > { %v8278_v27 = vpack.c.bf16 %v4986_v29, %v4986_v29  ;;  %v5316_v28 = vsel %vm9231_vm3, %v5311_v10, %v11959_v54  ;;  %v12026_v56 = vrot.slane %v5379_v15, 5  ;;  %v5326_v17 = vsel %vm9231_vm3, %v5321_v2, %v11721_v42  ;;  %v5260_v2 = vld [vmem:[#allocation2 + $0x34] sm:$0xf] }
 0x214   : > { %v8281_v41 = vpack.c.bf16 %v4989_v39, %v4989_v39  ;;  %5237 = vst.msk [vmem:[#allocation2 + $0x6c] sm:$0xf] %vm5002_vm7, %v8280_v12  ;;  %v4948_v6 = vmul.f32 %v11864_v4, %v4909_v49  ;;  %v5385_v53 = vshll.u32 %v5258_v44, 16  ;;  %v5389_v58 = vshrl.u32 %v5258_v44, 16  ;;  %v5259_v39 = vld [vmem:[#allocation2 + $0x30] sm:$0xf] }
 0x215   : > { %5235 = vst.msk [vmem:[#allocation2 + $0x60] sm:$0xf] %vm5002_vm7, %v8278_v27  ;;  %v8115_v52 = vcombine.low %v5316_v28, %v5326_v17  ;;  %v8152_v54 = vcombine.low %v5257_v37, %v5258_v44  ;;  %v5334_v36 = vor.u32 %v11973_v26, %v11968_v11  ;;  %v5344_v29 = vor.u32 %v11985_v5, %v11983_v48  ;;  %v4816_v28 = vpop.f32.mrf.mxu0 }
 0x216   : > { %5238 = vst.msk [vmem:[#allocation2 + $0x70] sm:$0xf] %vm5002_vm7, %v8281_v41  ;;  %v4987_v10 = vadd.f32 %v11871_v25, %v4948_v6  ;;  %v12040_v42 = vrot.slane %v5385_v53, 5  ;;  %v12042_v15 = vrot.slane %v5389_v58, 4  ;;  %v4400_v12 = vadd.f32 %v8806_v43, %v11687_v20  ;;  %v12050_v6 = vpop.f32.mrf.mxu1  ;;  %v9094_v53 = vld [vmem:[%s12677_s4 + $0x20] sm:$0xff]  }
 0x217   : > { %8856 = vmatprep.mubr.msk.bf16.mxu1 %vm730_vm2, %v8115_v52  ;;  %8897 = vmatmul.mubr.msk.bf16.gmra.mxu0 %vm730_vm2, %v8152_v54  ;;  %v5335_v37 = vrot.slane %v5334_v36, 4  ;;  %v5345_v44 = vrot.slane %v5344_v29, 4  ;;  %v4398_v11 = vadd.f32 %v4331_v32, %v11697_v63  ;;  %v4401_v26 = vadd.f32 %v8807_v18, %v11707_v22  ;;  %v5261_v29 = vld [vmem:[#allocation2 + $0x3c] sm:$0xf] }
 0x218   : > { %v8279_v5 = vpack.c.bf16 %v4987_v10, %v4987_v10  ;;  %v4882_v49 = vadd.f32 %v12001_v31, %v4400_v12  ;;  %v5400_v27 = vshrl.u32 %v5259_v39, 16  ;;  %v5403_v41 = vshll.u32 %v5259_v39, 16  ;;  %v8846_v10 = vpop.f32.mrf.mxu0  ;;  %v4347_v12 = vpop.f32.mrf.mxu1 }
 0x219   : > { %v5340_v20 = vsel %vm9231_vm3, %v5335_v37, %v11983_v48  ;;  %v5350_v43 = vsel %vm9231_vm3, %v5345_v44, %v11727_v1  ;;  %v4880_v63 = vadd.f32 %v4813_v61, %v4398_v11  ;;  %v4883_v32 = vadd.f32 %v8843_v3, %v4401_v26  ;;  %v9120_v37 = vld [vmem:[%s12677_s4 + $0x28] sm:$0xff]  }
 0x21a   : > { %5236 = vst.msk [vmem:[#allocation2 + $0x64] sm:$0xf] %vm5002_vm7, %v8279_v5  ;;  %v8116_v22 = vcombine.low %v5340_v20, %v5350_v43  ;;  %v4914_v31 = vmax.f32 %v4882_v49, 0.0  ;;  %v12059_v18 = vrot.slane %v5400_v27, 4  ;;  %v12061_v17 = vrot.slane %v5403_v41, 5 }
 0x21b   : > { %v4912_v58 = vmax.f32 %v4880_v63, 0.0  ;;  %v4915_v48 = vmax.f32 %v4883_v32, 0.0  ;;  %v5409_v52 = vshll.u32 %v5260_v2, 16  ;;  %v5413_v54 = vshrl.u32 %v5260_v2, 16 }
 0x21c   : > { %8857 = vmatmul.mubr.msk.bf16.vlgmr.msra.gmra.mxu1 %vm730_vm2, %v8116_v22  ;;  %v4953_v1 = vmul.f32 %v11864_v4, %v4914_v31  ;;  %v8153_v61 = vcombine.low %v5259_v39, %v5260_v2  ;;  %v4399_v3 = vadd.f32 %v4334_v50, %v11718_v46  ;;  %v5358_v36 = vor.u32 %v11999_v47, %v11997_v14  ;;  %v5262_v2 = vld [vmem:[#allocation2 + $0x40] sm:$0xf]  ;;  %v8811_v22 = vpop.f32.mrf.mxu1 }
 0x21d   : > { %8925 = vmatpush3.bf16.msra.mxu1 %v9120_v37  ;;  %v4951_v44 = vmul.f32 %v11864_v4, %v4912_v58  ;;  %v4954_v11 = vmul.f32 %v11864_v4, %v4915_v48  ;;  %v12076_v26 = vrot.slane %v5409_v52, 5  ;;  %v12078_v39 = vrot.slane %v5413_v54, 4  ;;  %v5263_v37 = vld [vmem:[#allocation2 + $0x48] sm:$0xf] }
 0x21e   : > { %v4992_v46 = vadd.f32 %v11871_v25, %v4953_v1  ;;  %8900 = vmatprep.mubr.msk.bf16.mxu0 %vm730_vm2, %v8153_v61  ;;  %v4881_v14 = vadd.f32 %v4816_v28, %v4399_v3  ;;  %v5359_v47 = vrot.slane %v5358_v36, 4  ;;  %v5368_v50 = vor.u32 %v12010_v9, %v12004_v62  ;;  %8926 = vmatprep.subr.bf16.mxu1 %v9094_v53  ;;  %v4829_v28 = vpop.f32.mrf.mxu0 }
 0x21f   : > { %v4990_v5 = vadd.f32 %v11871_v25, %v4951_v44  ;;  %v4993_v49 = vadd.f32 %v11871_v25, %v4954_v11  ;;  %v5424_v27 = vshrl.u32 %v5261_v29, 16  ;;  %v5427_v41 = vshll.u32 %v5261_v29, 16 }
 0x220   : > { %v8284_v20 = vpack.c.bf16 %v4992_v46, %v4992_v46  ;;  %v4913_v43 = vmax.f32 %v4881_v14, 0.0  ;;  %v5364_v63 = vsel %vm9231_vm3, %v5359_v47, %v12004_v62  ;;  %v5369_v32 = vrot.slane %v5368_v50, 4  ;;  %v8847_v14 = vpop.f32.mrf.mxu0  ;;  %v4350_v47 = vpop.f32.mrf.mxu1 }
 0x221   : > { %v8282_v31 = vpack.c.bf16 %v4990_v5, %v4990_v5  ;;  %v8285_v58 = vpack.c.bf16 %v4993_v49, %v4993_v49  ;;  %v12089_v9 = vrot.slane %v5424_v27, 4  ;;  %v12091_v48 = vrot.slane %v5427_v41, 5  ;;  %8927 = vmatpush3.bf16.msra.mxu1 %v9094_v53  ;;  %v5264_v49 = vld [vmem:[#allocation2 + $0x4c] sm:$0xf] }
 0x222   : > { %5241 = vst.msk [vmem:[#allocation2 + $0x84] sm:$0xf] %vm5002_vm7, %v8284_v20  ;;  %v4952_v52 = vmul.f32 %v11864_v4, %v4913_v43  ;;  %v5374_v54 = vsel %vm9231_vm3, %v5369_v32, %v11735_v24  ;;  %v5433_v1 = vshll.u32 %v5262_v2, 16  ;;  %v5437_v62 = vshrl.u32 %v5262_v2, 16  ;;  %v4832_v43 = vpop.f32.mrf.mxu0 }
 0x223   : > { %5239 = vst.msk [vmem:[#allocation2 + $0x78] sm:$0xf] %vm5002_vm7, %v8282_v31  ;;  %5242 = vst.msk [vmem:[#allocation2 + $0x88] sm:$0xf] %vm5002_vm7, %v8285_v58  ;;  %v8117_v61 = vcombine.low %v5364_v63, %v5374_v54  ;;  %v8154_v3 = vcombine.low %v5261_v29, %v5262_v2  ;;  %v5382_v36 = vor.u32 %v12026_v56, %v12021_v23  ;;  %v5448_v2 = vshrl.u32 %v5263_v37, 16  ;;  %v8814_v63 = vpop.f32.mrf.mxu1 }
 0x224   : > { %v5392_v53 = vor.u32 %v12042_v15, %v12040_v42  ;;  %v4991_v44 = vadd.f32 %v11871_v25, %v4952_v52  ;;  %v12105_v11 = vrot.slane %v5433_v1, 5  ;;  %v12107_v24 = vrot.slane %v5437_v62, 4  ;;  %v5265_v54 = vld [vmem:[#allocation2 + $0x54] sm:$0xf] }
 0x225   : > { %v4404_v46 = vadd.f32 %v12050_v6, %v11732_v38  ;;  %8860 = vmatprep.mubr.msk.bf16.mxu1 %vm730_vm2, %v8117_v61  ;;  %8901 = vmatmul.mubr.msk.bf16.gmra.mxu0 %vm730_vm2, %v8154_v3  ;;  %v5383_v23 = vrot.slane %v5382_v36, 4  ;;  %v4402_v15 = vadd.f32 %v4347_v12, %v11751_v13  ;;  %v4405_v29 = vadd.f32 %v8811_v22, %v11763_v34 }
 0x226   : > { %v5393_v56 = vrot.slane %v5392_v53, 4  ;;  %v8283_v50 = vpack.c.bf16 %v4991_v44, %v4991_v44  ;;  %v5451_v27 = vshll.u32 %v5263_v37, 16  ;;  %v12122_v34 = vrot.slane %v5448_v2, 4  ;;  %v8850_v44 = vpop.f32.mrf.mxu0 }
 0x227   : > { %v4886_v5 = vadd.f32 %v8846_v10, %v4404_v46  ;;  %v5388_v38 = vsel %vm9231_vm3, %v5383_v23, %v12040_v42  ;;  %v4884_v41 = vadd.f32 %v4829_v28, %v4402_v15  ;;  %v4887_v20 = vadd.f32 %v8847_v14, %v4405_v29  ;;  %v5266_v14 = vld [vmem:[#allocation2 + $0x58] sm:$0xf] }
 0x228   : > { %v5398_v6 = vsel %vm9231_vm3, %v5393_v56, %v11745_v60  ;;  %5240 = vst.msk [vmem:[#allocation2 + $0x7c] sm:$0xf] %vm5002_vm7, %v8283_v50  ;;  %v12124_v10 = vrot.slane %v5451_v27, 5  ;;  %v5457_v31 = vshll.u32 %v5264_v49, 16  ;;  %v5461_v42 = vshrl.u32 %v5264_v49, 16 }
 0x229   : > { %v8118_v13 = vcombine.low %v5388_v38, %v5398_v6  ;;  %v4918_v12 = vmax.f32 %v4886_v5, 0.0  ;;  %v4916_v32 = vmax.f32 %v4884_v41, 0.0  ;;  %v4919_v22 = vmax.f32 %v4887_v20, 0.0  ;;  %v4845_v20 = vpop.f32.mrf.mxu0 }
 0x22a   : > { %v8155_v28 = vcombine.low %v5263_v37, %v5264_v49  ;;  %v4403_v58 = vadd.f32 %v4350_v47, %v11780_v40  ;;  %v5406_v52 = vor.u32 %v12061_v17, %v12059_v18  ;;  %v12133_v61 = vrot.slane %v5457_v31, 5  ;;  %v4363_v18 = vpop.f32.mrf.mxu1 }
 0x22b   : > { %8861 = vmatmul.mubr.msk.bf16.gmra.mxu1 %vm730_vm2, %v8118_v13  ;;  %v4957_v60 = vmul.f32 %v11864_v4, %v4918_v12  ;;  %v4955_v1 = vmul.f32 %v11864_v4, %v4916_v32  ;;  %v4958_v62 = vmul.f32 %v11864_v4, %v4919_v22  ;;  %v12135_v3 = vrot.slane %v5461_v42, 4  ;;  %v5267_v22 = vld [vmem:[#allocation2 + $0x60] sm:$0xf] }
 0x22c   : > { %8904 = vmatprep.mubr.msk.bf16.mxu0 %vm730_vm2, %v8155_v28  ;;  %v4885_v53 = vadd.f32 %v4832_v43, %v4403_v58  ;;  %v5407_v37 = vrot.slane %v5406_v52, 4  ;;  %v5416_v40 = vor.u32 %v12078_v39, %v12076_v26  ;;  %v5472_v47 = vshrl.u32 %v5265_v54, 16  ;;  %v8815_v13 = vpop.f32.mrf.mxu1 }
 0x22d   : > { %v4996_v36 = vadd.f32 %v11871_v25, %v4957_v60  ;;  %v4994_v17 = vadd.f32 %v11871_v25, %v4955_v1  ;;  %v4997_v46 = vadd.f32 %v11871_v25, %v4958_v62  ;;  %v5475_v23 = vshll.u32 %v5265_v54, 16  ;;  %v8851_v1 = vpop.f32.mrf.mxu0  ;;  %v5268_v62 = vld [vmem:[#allocation2 + $0x64] sm:$0xf] }
 0x22e   : > { %v4917_v15 = vmax.f32 %v4885_v53, 0.0  ;;  %v5412_v29 = vsel %vm9231_vm3, %v5407_v37, %v12076_v26  ;;  %v5417_v50 = vrot.slane %v5416_v40, 4  ;;  %v12146_v2 = vrot.slane %v5472_v47, 4 }
 0x22f   : > { %v8288_v56 = vpack.c.bf16 %v4996_v36, %v4996_v36  ;;  %v8286_v5 = vpack.c.bf16 %v4994_v17, %v4994_v17  ;;  %v8289_v49 = vpack.c.bf16 %v4997_v46, %v4997_v46  ;;  %v12148_v39 = vrot.slane %v5475_v23, 5  ;;  %v4366_v46 = vpop.f32.mrf.mxu1 }
 0x230   : > { %v4956_v27 = vmul.f32 %v11864_v4, %v4917_v15  ;;  %v5422_v38 = vsel %vm9231_vm3, %v5417_v50, %v11790_v51  ;;  %v5481_v6 = vshll.u32 %v5266_v14, 16  ;;  %v5485_v41 = vshrl.u32 %v5266_v14, 16  ;;  %v12942_v50 = vld [vmem:[#allocation19_spill] sm:$0xff] }
 0x231   : > { %5245 = vst.msk [vmem:[#allocation2 + $0x9c] sm:$0xf] %vm5002_vm7, %v8288_v56  ;;  %5243 = vst.msk [vmem:[#allocation2 + $0x90] sm:$0xf] %vm5002_vm7, %v8286_v5  ;;  %v8119_v26 = vcombine.low %v5412_v29, %v5422_v38  ;;  %v8156_v12 = vcombine.low %v5265_v54, %v5266_v14  ;;  %v5430_v43 = vor.u32 %v12091_v48, %v12089_v9  ;;  %v12940_v48 = vld [vmem:[#allocation23_spill] sm:$0xff]  ;;  %v5496_v36 = vshrl.u32 %v5267_v22, 16 }
 0x232   : > { %5246 = vst.msk [vmem:[#allocation2 + $0xa0] sm:$0xf] %vm5002_vm7, %v8289_v49  ;;  %v5440_v32 = vor.u32 %v12107_v24, %v12105_v11  ;;  %v4995_v31 = vadd.f32 %v11871_v25, %v4956_v27  ;;  %v12162_v51 = vrot.slane %v5481_v6, 5  ;;  %v12164_v42 = vrot.slane %v5485_v41, 4  ;;  %v5269_v27 = vld [vmem:[#allocation2 + $0x6c] sm:$0xf] }
 0x233   : > { %v4408_v60 = vadd.f32 %v8814_v63, %v11795_v35  ;;  %8864 = vmatprep.mubr.msk.bf16.mxu1 %vm730_vm2, %v8119_v26  ;;  %8905 = vmatmul.mubr.msk.bf16.gmra.mxu0 %vm730_vm2, %v8156_v12  ;;  %v5431_v28 = vrot.slane %v5430_v43, 4  ;;  %v4406_v9 = vadd.f32 %v4363_v18, %v11813_v0  ;;  %v4409_v52 = vadd.f32 %v8815_v13, %v12940_v48  ;;  %v12941_v63 = vld [vmem:[#allocation12_spill] sm:$0xff]  ;;  %v4848_v13 = vpop.f32.mrf.mxu0 }
 0x234   : > { %v5441_v58 = vrot.slane %v5440_v32, 4  ;;  %v8287_v24 = vpack.c.bf16 %v4995_v31, %v4995_v31  ;;  %v5499_v53 = vshll.u32 %v5267_v22, 16  ;;  %v5505_v56 = vshll.u32 %v5268_v62, 16 }
 0x235   : > { %v4890_v54 = vadd.f32 %v8850_v44, %v4408_v60  ;;  %v5436_v35 = vsel %vm9231_vm3, %v5431_v28, %v12105_v11  ;;  %v4888_v40 = vadd.f32 %v4845_v20, %v4406_v9  ;;  %v4891_v17 = vadd.f32 %v8851_v1, %v4409_v52 }
 0x236   : > { %v5446_v37 = vsel %vm9231_vm3, %v5441_v58, %v12941_v63  ;;  %5244 = vst.msk [vmem:[#allocation2 + $0x94] sm:$0xf] %vm5002_vm7, %v8287_v24  ;;  %v12178_v44 = vrot.slane %v5496_v36, 4  ;;  %v12180_v14 = vrot.slane %v5499_v53, 5  ;;  %v5509_v15 = vshrl.u32 %v5268_v62, 16 }
 0x237   : > { %v8120_v0 = vcombine.low %v5436_v35, %v5446_v37  ;;  %v4922_v18 = vmax.f32 %v4890_v54, 0.0  ;;  %v4920_v47 = vmax.f32 %v4888_v40, 0.0  ;;  %v4923_v23 = vmax.f32 %v4891_v17, 0.0  ;;  %v5272_v63 = vld [vmem:[#allocation2 + $0x7c] sm:$0xf] }
 0x238   : > { %v8157_v29 = vcombine.low %v5267_v22, %v5268_v62  ;;  %v4407_v5 = vadd.f32 %v4366_v46, %v12942_v50  ;;  %v5454_v49 = vor.u32 %v12124_v10, %v12122_v34  ;;  %v12189_v41 = vrot.slane %v5505_v56, 5  ;;  %v5270_v22 = vld [vmem:[#allocation2 + $0x70] sm:$0xf]  ;;  %v5271_v62 = vld [vmem:[#allocation2 + $0x78] sm:$0xf] }
 0x239   : > { %8865 = vmatmul.mubr.msk.bf16.gmra.mxu1 %vm730_vm2, %v8120_v0  ;;  %v4961_v11 = vmul.f32 %v11864_v4, %v4922_v18  ;;  %v4959_v38 = vmul.f32 %v11864_v4, %v4920_v47  ;;  %v4962_v6 = vmul.f32 %v11864_v4, %v4923_v23  ;;  %v12191_v20 = vrot.slane %v5509_v15, 4  ;;  %v5273_v50 = vld [vmem:[#allocation2 + $0x84] sm:$0xf] }
 0x23a   : > { %8908 = vmatprep.mubr.msk.bf16.mxu0 %vm730_vm2, %v8157_v29  ;;  %v4889_v12 = vadd.f32 %v4848_v13, %v4407_v5  ;;  %v5455_v43 = vrot.slane %v5454_v49, 4  ;;  %v5464_v32 = vor.u32 %v12135_v3, %v12133_v61  ;;  %v5520_v31 = vshrl.u32 %v5269_v27, 16  ;;  %v5274_v5 = vld [vmem:[#allocation2 + $0x88] sm:$0xf] }
 0x23b   : > { %v5000_v26 = vadd.f32 %v11871_v25, %v4961_v11  ;;  %v4998_v34 = vadd.f32 %v11871_v25, %v4959_v38  ;;  %v5001_v10 = vadd.f32 %v11871_v25, %v4962_v6  ;;  %v5523_v60 = vshll.u32 %v5269_v27, 16  ;;  %v12943_v25 = vld [vmem:[#allocation8_spill] sm:$0xff] }
 0x23c   : > { %v4921_v58 = vmax.f32 %v4889_v12, 0.0  ;;  %v5460_v9 = vsel %vm9231_vm3, %v5455_v43, %v12133_v61  ;;  %v5465_v48 = vrot.slane %v5464_v32, 4  ;;  %v5522_v54 = vrot.slane %v5520_v31, 4 }
 0x23d   : > { %v8292_v28 = vpack.c.bf16 %v5000_v26, %v5000_v26  ;;  %v8290_v52 = vpack.c.bf16 %v4998_v34, %v4998_v34  ;;  %v8293_v24 = vpack.c.bf16 %v5001_v10, %v5001_v10  ;;  %v5525_v1 = vrot.slane %v5523_v60, 5 }
 0x23e   : > { %v4960_v3 = vmul.f32 %v11864_v4, %v4921_v58  ;;  %v5470_v36 = vsel %vm9231_vm3, %v5465_v48, %v12943_v25  ;;  %v5529_v53 = vshll.u32 %v5270_v22, 16  ;;  %v5533_v35 = vshrl.u32 %v5270_v22, 16  ;;  %v9121_v4 = vld [vmem:[%s12676_s3] ss:$0 sm:$0xff]  ;;  %v5276_v48 = vld [vmem:[#allocation2 + $0x94] sm:$0xf] }
 0x23f   : > { %5249 = vst.msk [vmem:[#allocation2 + $0xb4] sm:$0xf] %vm5002_vm7, %v8292_v28  ;;  %5247 = vst.msk [vmem:[#allocation2 + $0xa8] sm:$0xf] %vm5002_vm7, %v8290_v52  ;;  %v8121_v61 = vcombine.low %v5460_v9, %v5470_v36  ;;  %v8158_v37 = vcombine.low %v5269_v27, %v5270_v22  ;;  %v5478_v40 = vor.u32 %v12148_v39, %v12146_v2  ;;  %v5544_v47 = vshrl.u32 %v5271_v62, 16  ;;  %v12944_v27 = vld [vmem:[#allocation28_spill] sm:$0xff] }
 0x240   : > { %5250 = vst.msk [vmem:[#allocation2 + $0xb8] sm:$0xf] %vm5002_vm7, %v8293_v24  ;;  %v5488_v17 = vor.u32 %v12164_v42, %v12162_v51  ;;  %v4999_v46 = vadd.f32 %v9121_v4, %v4960_v3  ;;  %v12216_v0 = vrot.slane %v5529_v53, 5  ;;  %v5535_v18 = vrot.slane %v5533_v35, 4  ;;  %v5275_v9 = vld [vmem:[#allocation2 + $0x90] sm:$0xf] }
 0x241   : > { %8868 = vmatprep.mubr.msk.bf16.mxu1 %vm730_vm2, %v8121_v61  ;;  %8909 = vmatmul.mubr.msk.bf16.gmra.mxu0 %vm730_vm2, %v8158_v37  ;;  %v5479_v23 = vrot.slane %v5478_v40, 4  ;;  %v5547_v15 = vshll.u32 %v5271_v62, 16  ;;  %v5553_v2 = vshll.u32 %v5272_v63, 16  ;;  %v5546_v11 = vrot.slane %v5544_v47, 4  ;;  %v5277_v36 = vld [vmem:[#allocation2 + $0x9c] sm:$0xf] }
 0x242   : > { %v5489_v56 = vrot.slane %v5488_v17, 4  ;;  %v8291_v39 = vpack.c.bf16 %v4999_v46, %v4999_v46  ;;  %v5557_v42 = vshrl.u32 %v5272_v63, 16  ;;  %v8159_v29 = vcombine.low %v5271_v62, %v5272_v63 }
 0x243   : > { %v5484_v49 = vsel %vm9231_vm3, %v5479_v23, %v12162_v51  ;;  %v5549_v6 = vrot.slane %v5547_v15, 5  ;;  %v12226_v13 = vrot.slane %v5553_v2, 5  ;;  %v5502_v43 = vor.u32 %v12180_v14, %v12178_v44 }
 0x244   : > { %v5494_v38 = vsel %vm9231_vm3, %v5489_v56, %v12944_v27  ;;  %5248 = vst.msk [vmem:[#allocation2 + $0xac] sm:$0xf] %vm5002_vm7, %v8291_v39  ;;  %v5559_v12 = vrot.slane %v5557_v42, 4  ;;  %8912 = vmatprep.mubr.msk.bf16.mxu0 %vm730_vm2, %v8159_v29  ;;  %v5512_v32 = vor.u32 %v12191_v20, %v12189_v41  ;;  %v5568_v51 = vshrl.u32 %v5273_v50, 16 }
 0x245   : > { %v8122_v26 = vcombine.low %v5484_v49, %v5494_v38  ;;  %v5571_v34 = vshll.u32 %v5273_v50, 16  ;;  %v5577_v10 = vshll.u32 %v5274_v5, 16  ;;  %v5581_v22 = vshrl.u32 %v5274_v5, 16 }
 0x246   : > { %v5503_v31 = vrot.slane %v5502_v43, 4  ;;  %v5513_v60 = vrot.slane %v5512_v32, 4  ;;  %v8160_v28 = vcombine.low %v5273_v50, %v5274_v5  ;;  %v5526_v58 = vor.u32 %v5525_v1, %v5522_v54  ;;  %v5278_v54 = vld [vmem:[#allocation2 + $0xa0] sm:$0xf]  ;;  %v5279_v29 = vld [vmem:[#allocation2 + $0xa8] sm:$0xf] }
 0x247   : > { %8869 = vmatmul.mubr.msk.bf16.gmra.mxu1 %vm730_vm2, %v8122_v26  ;;  %v5570_v52 = vrot.slane %v5568_v51, 4  ;;  %v5573_v24 = vrot.slane %v5571_v34, 5  ;;  %v12235_v62 = vrot.slane %v5577_v10, 5  ;;  %v5583_v44 = vrot.slane %v5581_v22, 4 }
 0x248   : > { %v5508_v14 = vsel %vm9231_vm3, %v5503_v31, %v12189_v41  ;;  %v5518_v20 = vsel %vm9231_vm3, %v5513_v60, %v11874_v19  ;;  %v5527_v3 = vrot.slane %v5526_v58, 4  ;;  %v5536_v25 = vor.u32 %v5535_v18, %v12216_v0  ;;  %v12945_v18 = vld [vmem:[#allocation11_spill] sm:$0xff] }
 0x249   : > { %v8123_v1 = vcombine.low %v5508_v14, %v5518_v20  ;;  %8913 = vmatmul.mubr.msk.bf16.gmra.mxu0 %vm730_vm2, %v8160_v28  ;;  %v5592_v53 = vshrl.u32 %v5275_v9, 16  ;;  %v5595_v35 = vshll.u32 %v5275_v9, 16  ;;  %v5601_v63 = vshll.u32 %v5276_v48, 16  ;;  %v5281_v28 = vld [vmem:[#allocation2 + $0xb4] sm:$0xf] }
 0x24a   : > { %v5532_v61 = vsel %vm9231_vm3, %v5527_v3, %v12216_v0  ;;  %v5537_v41 = vrot.slane %v5536_v25, 4  ;;  %v5605_v37 = vshrl.u32 %v5276_v48, 16  ;;  %v8161_v40 = vcombine.low %v5275_v9, %v5276_v48 }
 0x24b   : > { %8872 = vmatprep.mubr.msk.bf16.mxu1 %vm730_vm2, %v8123_v1  ;;  %v5594_v19 = vrot.slane %v5592_v53, 4  ;;  %v5597_v17 = vrot.slane %v5595_v35, 5  ;;  %v12249_v4 = vrot.slane %v5601_v63, 5  ;;  %v5550_v46 = vor.u32 %v5549_v6, %v5546_v11  ;;  %v5280_v11 = vld [vmem:[#allocation2 + $0xac] sm:$0xf] }
 0x24c   : > { %v5542_v47 = vsel %vm9231_vm3, %v5537_v41, %v12945_v18  ;;  %v5607_v23 = vrot.slane %v5605_v37, 4  ;;  %8916 = vmatprep.mubr.msk.bf16.mxu0 %vm730_vm2, %v8161_v40  ;;  %v5560_v56 = vor.u32 %v5559_v12, %v12226_v13  ;;  %v5616_v0 = vshrl.u32 %v5277_v36, 16  ;;  %v6633_v63 = vld [vmem:[#allocation2 + $0xc] sm:$0xf]  ;;  %v6634_v40 = vld [vmem:[#allocation2 + $0x10] sm:$0xf] }
 0x24d   : > { %v8124_v15 = vcombine.low %v5532_v61, %v5542_v47  ;;  %v5551_v2 = vrot.slane %v5550_v46, 4  ;;  %v5619_v39 = vshll.u32 %v5277_v36, 16  ;;  %v5625_v42 = vshll.u32 %v5278_v54, 16 }
 0x24e   : > { %v5561_v50 = vrot.slane %v5560_v56, 4  ;;  %v5618_v5 = vrot.slane %v5616_v0, 4  ;;  %v5629_v49 = vshrl.u32 %v5278_v54, 16  ;;  %v8162_v27 = vcombine.low %v5277_v36, %v5278_v54 }
 0x24f   : > { %8873 = vmatmul.mubr.msk.bf16.gmra.mxu1 %vm730_vm2, %v8124_v15  ;;  %v5556_v38 = vsel %vm9231_vm3, %v5551_v2, %v12226_v13  ;;  %v5621_v6 = vrot.slane %v5619_v39, 5  ;;  %v12260_v26 = vrot.slane %v5625_v42, 5  ;;  %v5574_v12 = vor.u32 %v5573_v24, %v5570_v52  ;;  %v5282_v52 = vld [vmem:[#allocation2 + $0xb8] sm:$0xf] }
 0x250   : > { %v5566_v43 = vsel %vm9231_vm3, %v5561_v50, %v11880_v57  ;;  %v5631_v32 = vrot.slane %v5629_v49, 4  ;;  %v5584_v51 = vor.u32 %v5583_v44, %v12235_v62  ;;  %v5640_v34 = vshrl.u32 %v5279_v29, 16  ;;  %v6636_v42 = vld [vmem:[#allocation2 + $0x18] sm:$0xf] }
 0x251   : > { %v8125_v10 = vcombine.low %v5556_v38, %v5566_v43  ;;  %8917 = vmatmul.mubr.msk.bf16.gmra.mxu0 %vm730_vm2, %v8162_v27  ;;  %v5575_v22 = vrot.slane %v5574_v12, 4  ;;  %v5643_v31 = vshll.u32 %v5279_v29, 16  ;;  %v5649_v60 = vshll.u32 %v5280_v11, 16  ;;  %v6637_v38 = vld [vmem:[#allocation2 + $0x1c] sm:$0xf] }
 0x252   : > { %v5585_v13 = vrot.slane %v5584_v51, 4  ;;  %v5642_v58 = vrot.slane %v5640_v34, 4  ;;  %v5653_v9 = vshrl.u32 %v5280_v11, 16  ;;  %v8163_v48 = vcombine.low %v5279_v29, %v5280_v11 }
 0x253   : > { %8876 = vmatprep.mubr.msk.bf16.mxu1 %vm730_vm2, %v8125_v10  ;;  %v5580_v57 = vsel %vm9231_vm3, %v5575_v22, %v12235_v62  ;;  %v5645_v24 = vrot.slane %v5643_v31, 5  ;;  %v5651_v44 = vrot.slane %v5649_v60, 5  ;;  %v5598_v14 = vor.u32 %v5597_v17, %v5594_v19 }
 0x254   : > { %v5590_v20 = vsel %vm9231_vm3, %v5585_v13, %v11876_v30  ;;  %v5655_v3 = vrot.slane %v5653_v9, 4  ;;  %8920 = vmatprep.mubr.msk.bf16.mxu0 %vm730_vm2, %v8163_v48  ;;  %v5608_v25 = vor.u32 %v5607_v23, %v12249_v4  ;;  %v5664_v36 = vshrl.u32 %v5281_v28, 16  ;;  %v6639_v48 = vld [vmem:[#allocation2 + $0x24] sm:$0xf] }
 0x255   : > { %v8126_v54 = vcombine.low %v5580_v57, %v5590_v20  ;;  %v5599_v1 = vrot.slane %v5598_v14, 4  ;;  %v5667_v53 = vshll.u32 %v5281_v28, 16  ;;  %v5673_v35 = vshll.u32 %v5282_v52, 16 }
 0x256   : > { %v5609_v61 = vrot.slane %v5608_v25, 4  ;;  %v5666_v62 = vrot.slane %v5664_v36, 4  ;;  %v5677_v41 = vshrl.u32 %v5282_v52, 16  ;;  %v8164_v37 = vcombine.low %v5281_v28, %v5282_v52  ;;  %v6640_v36 = vld [vmem:[#allocation2 + $0x28] sm:$0xf] }
 0x257   : > { %8877 = vmatmul.mubr.msk.bf16.gmra.mxu1 %vm730_vm2, %v8126_v54  ;;  %v5604_v30 = vsel %vm9231_vm3, %v5599_v1, %v12249_v4  ;;  %v5669_v19 = vrot.slane %v5667_v53, 5  ;;  %v12280_v17 = vrot.slane %v5673_v35, 5  ;;  %v5622_v46 = vor.u32 %v5621_v6, %v5618_v5 }
 0x258   : > { %v5614_v18 = vsel %vm9231_vm3, %v5609_v61, %v11889_v45  ;;  %v5679_v47 = vrot.slane %v5677_v41, 4  ;;  %v5632_v23 = vor.u32 %v5631_v32, %v12260_v26  ;;  %v6682_v56 = vshrl.u32 %v6633_v63, 16  ;;  %v6642_v41 = vld [vmem:[#allocation2 + $0x30] sm:$0xf] }
 0x259   : > { %v8127_v0 = vcombine.low %v5604_v30, %v5614_v18  ;;  %8921 = vmatmul.mubr.msk.bf16.gmra.mxu0 %vm730_vm2, %v8164_v37  ;;  %v5623_v15 = vrot.slane %v5622_v46, 4  ;;  %v6685_v2 = vshll.u32 %v6633_v63, 16  ;;  %v6691_v39 = vshll.u32 %v6634_v40, 16  ;;  %v6643_v46 = vld [vmem:[#allocation2 + $0x34] sm:$0xf] }
 0x25a   : > { %v5633_v4 = vrot.slane %v5632_v23, 4  ;;  %v6684_v29 = vrot.slane %v6682_v56, 4  ;;  %v6695_v50 = vshrl.u32 %v6634_v40, 16  ;;  %v5646_v49 = vor.u32 %v5645_v24, %v5642_v58 }
 0x25b   : > { %8880 = vmatprep.mubr.msk.bf16.mxu1 %vm730_vm2, %v8127_v0  ;;  %v5628_v45 = vsel %vm9231_vm3, %v5623_v15, %v12260_v26  ;;  %v6687_v5 = vrot.slane %v6685_v2, 5  ;;  %v6693_v27 = vrot.slane %v6691_v39, 5  ;;  %v5656_v11 = vor.u32 %v5655_v3, %v5651_v44 }
 0x25c   : > { %v5638_v6 = vsel %vm9231_vm3, %v5633_v4, %v11882_v59  ;;  %v6697_v12 = vrot.slane %v6695_v50, 4  ;;  %v5647_v43 = vrot.slane %v5646_v49, 4  ;;  %v6706_v32 = vshrl.u32 %v6636_v42, 16  ;;  %v9100_v4 = vld [vmem:[#allocation2 + $0xc] sm:$0xff]   ;;  %v6646_v49 = vld [vmem:[#allocation2 + $0x40] sm:$0xf] }
 0x25d   : > { %v8128_v51 = vcombine.low %v5628_v45, %v5638_v6  ;;  %v6688_v34 = vor.u32 %v6687_v5, %v6684_v29  ;;  %v5657_v10 = vrot.slane %v5656_v11, 4  ;;  %v6709_v22 = vshll.u32 %v6636_v42, 16 }
 0x25e   : > { %v6698_v31 = vor.u32 %v6697_v12, %v6693_v27  ;;  %v5652_v60 = vsel %vm9231_vm3, %v5647_v43, %v5651_v44  ;;  %v6708_v26 = vrot.slane %v6706_v32, 4  ;;  %v6715_v28 = vshll.u32 %v6637_v38, 16  ;;  %v6648_v43 = vld [vmem:[#allocation2 + $0x48] sm:$0xf] }
 0x25f   : > { %8881 = vmatmul.mubr.msk.bf16.gmra.mxu1 %vm730_vm2, %v8128_v51  ;;  %v6689_v13 = vrot.slane %v6688_v34, 4  ;;  %v5662_v59 = vsel %vm9231_vm3, %v5657_v10, %v11904_v21  ;;  %v6711_v58 = vrot.slane %v6709_v22, 5  ;;  %v6719_v9 = vshrl.u32 %v6637_v38, 16 }
 0x260   : > { %v6699_v52 = vrot.slane %v6698_v31, 4  ;;  %v8129_v57 = vcombine.low %v5652_v60, %v5662_v59  ;;  %v6717_v24 = vrot.slane %v6715_v28, 5  ;;  %v5670_v14 = vor.u32 %v5669_v19, %v5666_v62  ;;  %v6649_v59 = vld [vmem:[#allocation2 + $0x4c] sm:$0xf] }
 0x261   : > { %v6694_v20 = vsel %vm9231_vm3, %v6689_v13, %v6693_v27  ;;  %v6712_v44 = vor.u32 %v6711_v58, %v6708_v26  ;;  %v6721_v3 = vrot.slane %v6719_v9, 4  ;;  %v5680_v25 = vor.u32 %v5679_v47, %v12280_v17  ;;  %v12946_v9 = vld [vmem:[#allocation30_spill] sm:$0xff] }
 0x262   : > { %v6704_v54 = vsel %vm9231_vm3, %v6699_v52, %v11891_v33  ;;  %8884 = vmatprep.mubr.msk.bf16.mxu1 %vm730_vm2, %v8129_v57  ;;  %v5671_v21 = vrot.slane %v5670_v14, 4  ;;  %v6730_v1 = vshrl.u32 %v6639_v48, 16  ;;  %v6733_v53 = vshll.u32 %v6639_v48, 16 }
 0x263   : > { %v8225_v35 = vcombine.low %v6694_v20, %v6704_v54  ;;  %v6713_v63 = vrot.slane %v6712_v44, 4  ;;  %v6722_v61 = vor.u32 %v6721_v3, %v6717_v24  ;;  %v5681_v62 = vrot.slane %v5680_v25, 4  ;;  %v9101_v44 = vld [vmem:[#allocation2 + $0x18] sm:$0xff]  }
 0x264   : > { %v5676_v37 = vsel %vm9231_vm3, %v5671_v21, %v12280_v17  ;;  %v6732_v40 = vrot.slane %v6730_v1, 4  ;;  %v6735_v30 = vrot.slane %v6733_v53, 5  ;;  %v6739_v19 = vshll.u32 %v6640_v36, 16  ;;  %v6645_v17 = vld [vmem:[#allocation2 + $0x3c] sm:$0xf]  ;;  %v9102_v21 = vld [vmem:[#allocation2 + $0x24] sm:$0xff]  }
 0x265   : > { %8964 = vmatprep.mubr.msk.bf16.mxu0 %vm730_vm2, %v8225_v35  ;;  %v6718_v33 = vsel %vm9231_vm3, %v6713_v63, %v6717_v24  ;;  %v6723_v18 = vrot.slane %v6722_v61, 4  ;;  %v5686_v47 = vsel %vm9231_vm3, %v5681_v62, %v11926_v8  ;;  %v6743_v23 = vshrl.u32 %v6640_v36, 16  ;;  %v6651_v35 = vld [vmem:[#allocation2 + $0x54] sm:$0xf] }
 0x266   : > { %v8130_v56 = vcombine.low %v5676_v37, %v5686_v47  ;;  %v6736_v0 = vor.u32 %v6735_v30, %v6732_v40  ;;  %v6741_v15 = vrot.slane %v6739_v19, 5  ;;  %v6754_v2 = vshrl.u32 %v6642_v41, 16  ;;  %v6652_v30 = vld [vmem:[#allocation2 + $0x58] sm:$0xf] }
 0x267   : > { %v6728_v39 = vsel %vm9231_vm3, %v6723_v18, %v11893_v7  ;;  %v6745_v42 = vrot.slane %v6743_v23, 4  ;;  %v6757_v29 = vshll.u32 %v6642_v41, 16  ;;  %v6763_v50 = vshll.u32 %v6643_v46, 16  ;;  %v12947_v41 = vld [vmem:[#allocation4_spill] sm:$0xff] }
 0x268   : > { %v8226_v45 = vcombine.low %v6718_v33, %v6728_v39  ;;  %8885 = vmatmul.mubr.msk.bf16.gmra.mxu1 %vm730_vm2, %v8130_v56  ;;  %v6737_v5 = vrot.slane %v6736_v0, 4  ;;  %v6756_v8 = vrot.slane %v6754_v2, 4  ;;  %v6767_v27 = vshrl.u32 %v6643_v46, 16  ;;  %v6653_v56 = vld [vmem:[#allocation2 + $0x5c] sm:$0x1] }
 0x269   : > { %v6746_v11 = vor.u32 %v6745_v42, %v6741_v15  ;;  %8928 = vmatprep.mubr.msk.bf16.mxu1 %vm730_vm2, %v9100_v4  ;;  %v6759_v38 = vrot.slane %v6757_v29, 5  ;;  %v6765_v6 = vrot.slane %v6763_v50, 5  ;;  %v6778_v12 = vshrl.u32 %v6645_v17, 16  ;;  %v6654_v4 = vld [vmem:[#allocation2 + $0x60] sm:$0xf] }
 0x26a   : > { %8965 = vmatmul.mubr.msk.bf16.vlgmr.msra.gmra.mxu0 %vm730_vm2, %v8226_v45  ;;  %v6742_v7 = vsel %vm9231_vm3, %v6737_v5, %v6741_v15  ;;  %v6769_v32 = vrot.slane %v6767_v27, 4  ;;  %v6781_v51 = vshll.u32 %v6645_v17, 16  ;;  %v6787_v34 = vshll.u32 %v6646_v49, 16  ;;  %v12949_v15 = vld [vmem:[#allocation21_spill] sm:$0xff]  ;;  %v6655_v5 = vld [vmem:[#allocation2 + $0x64] sm:$0xf] }
 0x26b   : > { %v6747_v10 = vrot.slane %v6746_v11, 4  ;;  %v6760_v22 = vor.u32 %v6759_v38, %v6756_v8  ;;  %v6780_v31 = vrot.slane %v6778_v12, 4  ;;  %v6791_v60 = vshrl.u32 %v6646_v49, 16  ;;  %v9103_v12 = vld [vmem:[#allocation2 + $0x30] sm:$0xff]  }
 0x26c   : > { %v6770_v26 = vor.u32 %v6769_v32, %v6765_v6  ;;  %v6783_v28 = vrot.slane %v6781_v51, 5  ;;  %v6789_v13 = vrot.slane %v6787_v34, 5  ;;  %v6802_v58 = vshrl.u32 %v6648_v43, 16 }
 0x26d   : > { %v6752_v48 = vsel %vm9231_vm3, %v6747_v10, %v12946_v9  ;;  %v6761_v52 = vrot.slane %v6760_v22, 4  ;;  %v6793_v57 = vrot.slane %v6791_v60, 4  ;;  %v6805_v24 = vshll.u32 %v6648_v43, 16  ;;  %v9104_v22 = vld [vmem:[#allocation2 + $0x3c] sm:$0xff]   ;;  %v6658_v9 = vld [vmem:[#allocation2 + $0x70] sm:$0xf] }
 0x26e   : > { %v8227_v14 = vcombine.low %v6742_v7, %v6752_v48  ;;  %v6771_v20 = vrot.slane %v6770_v26, 4  ;;  %v6784_v3 = vor.u32 %v6783_v28, %v6780_v31  ;;  %v6804_v25 = vrot.slane %v6802_v58, 4  ;;  %v6656_v7 = vld [vmem:[#allocation2 + $0x68] sm:$0x1]  ;;  %v6657_v26 = vld [vmem:[#allocation2 + $0x6c] sm:$0xf] }
 0x26f   : > { %v6766_v36 = vsel %vm9231_vm3, %v6761_v52, %v6765_v6  ;;  %v6794_v54 = vor.u32 %v6793_v57, %v6789_v13  ;;  %v6807_v1 = vrot.slane %v6805_v24, 5  ;;  %v6811_v53 = vshll.u32 %v6649_v59, 16 }
 0x270   : > { %8968 = vmatprep.mubr.msk.bf16.mxu0 %vm730_vm2, %v8227_v14  ;;  %v6776_v63 = vsel %vm9231_vm3, %v6771_v20, %v11910_v55  ;;  %8929 = vmatmul.mubr.msk.bf16.vlgmr.msra.gmra.mxu1 %vm730_vm2, %v9101_v44  ;;  %v6785_v61 = vrot.slane %v6784_v3, 4  ;;  %v6815_v62 = vshrl.u32 %v6649_v59, 16  ;;  %v12948_v37 = vshll.u32 %v12947_v41, 16  ;;  %v6661_v41 = vld [vmem:[#allocation2 + $0x7c] sm:$0xf] }
 0x271   : > { %v8228_v19 = vcombine.low %v6766_v36, %v6776_v63  ;;  %v6795_v46 = vrot.slane %v6794_v54, 4  ;;  %8932 = vmatprep.mubr.msk.bf16.mxu1 %vm730_vm2, %v9102_v21  ;;  %v6808_v33 = vor.u32 %v6807_v1, %v6804_v25  ;;  %v6813_v18 = vrot.slane %v6811_v53, 5  ;;  %v6659_v54 = vld [vmem:[#allocation2 + $0x74] sm:$0x1]  ;;  %v6660_v53 = vld [vmem:[#allocation2 + $0x78] sm:$0xf] }
 0x272   : > { %v6823_v40 = vrot.slane %v12948_v37, 5  ;;  %v6790_v47 = vsel %vm9231_vm3, %v6785_v61, %v6789_v13  ;;  %v6817_v23 = vrot.slane %v6815_v62, 4  ;;  %v6826_v55 = vshrl.u32 %v6651_v35, 16 }
 0x273   : > { %v6829_v0 = vshll.u32 %v6651_v35, 16  ;;  %8969 = vmatmul.mubr.msk.bf16.gmra.mxu0 %vm730_vm2, %v8228_v19  ;;  %v6800_v2 = vsel %vm9231_vm3, %v6795_v46, %v12949_v15  ;;  %v6809_v17 = vrot.slane %v6808_v33, 4  ;;  %v6835_v39 = vshll.u32 %v6652_v30, 16  ;;  %v9105_v33 = vld [vmem:[#allocation2 + $0x48] sm:$0xff]  }
 0x274   : > { %v6839_v42 = vshrl.u32 %v6652_v30, 16  ;;  %v8229_v29 = vcombine.low %v6790_v47, %v6800_v2  ;;  %v6818_v50 = vor.u32 %v6817_v23, %v6813_v18  ;;  %v6828_v49 = vrot.slane %v6826_v55, 4  ;;  %v6662_v47 = vld [vmem:[#allocation2 + $0x80] sm:$0x1]  ;;  %v9106_v2 = vld [vmem:[#allocation2 + $0x54] sm:$0xff]  }
 0x275   : > { %v6831_v45 = vrot.slane %v6829_v0, 5  ;;  %v6814_v8 = vsel %vm9231_vm3, %v6809_v17, %v6813_v18  ;;  %v6837_v27 = vrot.slane %v6835_v39, 5  ;;  %v6845_v38 = vshll.u32 %v6653_v56, 16  ;;  %v6663_v39 = vld [vmem:[#allocation2 + $0x84] sm:$0xf] }
 0x276   : > { %v6841_v11 = vrot.slane %v6839_v42, 4  ;;  %8972 = vmatprep.mubr.msk.bf16.mxu0 %vm730_vm2, %v8229_v29  ;;  %v6819_v6 = vrot.slane %v6818_v50, 4  ;;  %v6850_v32 = vshrl.u32 %v6654_v4, 16  ;;  %v6853_v51 = vshll.u32 %v6654_v4, 16 }
 0x277   : > { %v6832_v43 = vor.u32 %v6831_v45, %v6828_v49  ;;  %v6847_v10 = vrot.slane %v6845_v38, 5  ;;  %v6859_v31 = vshll.u32 %v6655_v5, 16  ;;  %v6863_v60 = vshrl.u32 %v6655_v5, 16  ;;  %v6664_v49 = vld [vmem:[#allocation2 + $0x88] sm:$0xf] }
 0x278   : > { %v6842_v34 = vor.u32 %v6841_v11, %v6837_v27  ;;  %v6824_v28 = vsel %vm9231_vm3, %v6819_v6, %v6823_v40  ;;  %8933 = vmatmul.mubr.msk.bf16.gmra.mxu1 %vm730_vm2, %v9103_v12  ;;  %v6852_v59 = vrot.slane %v6850_v32, 4  ;;  %v6855_v58 = vrot.slane %v6853_v51, 5  ;;  %v6665_v51 = vld [vmem:[#allocation2 + $0x8c] sm:$0x1] }
 0x279   : > { %v6833_v13 = vrot.slane %v6832_v43, 4  ;;  %v8230_v48 = vcombine.low %v6814_v8, %v6824_v28  ;;  %8936 = vmatprep.mubr.msk.bf16.mxu1 %vm730_vm2, %v9104_v22  ;;  %v6861_v57 = vrot.slane %v6859_v31, 5  ;;  %v6865_v24 = vrot.slane %v6863_v60, 4 }
 0x27a   : > { %v6843_v52 = vrot.slane %v6842_v34, 4  ;;  %v6856_v20 = vor.u32 %v6855_v58, %v6852_v59  ;;  %v6869_v44 = vshll.u32 %v6656_v7, 16  ;;  %v6874_v3 = vshrl.u32 %v6657_v26, 16 }
 0x27b   : > { %v6838_v14 = vsel %vm9231_vm3, %v6833_v13, %v6837_v27  ;;  %8973 = vmatmul.mubr.msk.bf16.gmra.mxu0 %vm730_vm2, %v8230_v48  ;;  %v6866_v36 = vor.u32 %v6865_v24, %v6861_v57  ;;  %v6877_v21 = vshll.u32 %v6657_v26, 16  ;;  %v6883_v1 = vshll.u32 %v6658_v9, 16  ;;  %v6666_v26 = vld [vmem:[#allocation2 + $0x90] sm:$0xf] }
 0x27c   : > { %v6848_v25 = vsel %vm9231_vm3, %v6843_v52, %v6847_v10  ;;  %v6857_v63 = vrot.slane %v6856_v20, 4  ;;  %v6871_v61 = vrot.slane %v6869_v44, 5  ;;  %v6876_v62 = vrot.slane %v6874_v3, 4  ;;  %v6668_v20 = vld [vmem:[#allocation2 + $0x98] sm:$0x1] }
 0x27d   : > { %v8231_v35 = vcombine.low %v6838_v14, %v6848_v25  ;;  %v6867_v37 = vrot.slane %v6866_v36, 4  ;;  %v6879_v40 = vrot.slane %v6877_v21, 5  ;;  %v6885_v30 = vrot.slane %v6883_v1, 5  ;;  %v9108_v25 = vld [vmem:[#allocation2 + $0x6c] sm:$0xff]  }
 0x27e   : > { %v6887_v19 = vshrl.u32 %v6658_v9, 16  ;;  %v6862_v46 = vsel %vm9231_vm3, %v6857_v63, %v6861_v57  ;;  %v6893_v18 = vshll.u32 %v6659_v54, 16  ;;  %v6898_v23 = vshrl.u32 %v6660_v53, 16  ;;  %v6667_v9 = vld [vmem:[#allocation2 + $0x94] sm:$0xf]  ;;  %v9107_v57 = vld [vmem:[#allocation2 + $0x60] sm:$0xff]  }
 0x27f   : > { %8976 = vmatprep.mubr.msk.bf16.mxu0 %vm730_vm2, %v8231_v35  ;;  %v6901_v56 = vshll.u32 %v6660_v53, 16  ;;  %v6872_v55 = vsel %vm9231_vm3, %v6867_v37, %v6871_v61  ;;  %v6880_v0 = vor.u32 %v6879_v40, %v6876_v62  ;;  %v6907_v17 = vshll.u32 %v6661_v41, 16  ;;  %v6669_v63 = vld [vmem:[#allocation2 + $0x9c] sm:$0xf]  ;;  %v6670_v40 = vld [vmem:[#allocation2 + $0xa0] sm:$0xf] }
 0x280   : > { %v6889_v15 = vrot.slane %v6887_v19, 4  ;;  %v8232_v42 = vcombine.low %v6862_v46, %v6872_v55  ;;  %8937 = vmatmul.mubr.msk.bf16.gmra.mxu1 %vm730_vm2, %v9105_v33  ;;  %v6895_v4 = vrot.slane %v6893_v18, 5  ;;  %v6900_v29 = vrot.slane %v6898_v23, 4 }
 0x281   : > { %v6903_v50 = vrot.slane %v6901_v56, 5  ;;  %v6881_v45 = vrot.slane %v6880_v0, 4  ;;  %8940 = vmatprep.mubr.msk.bf16.mxu1 %vm730_vm2, %v9106_v2  ;;  %v6909_v8 = vrot.slane %v6907_v17, 5  ;;  %v6911_v27 = vshrl.u32 %v6661_v41, 16  ;;  %v6671_v56 = vld [vmem:[#allocation2 + $0xa4] sm:$0x1] }
 0x282   : > { %v6890_v5 = vor.u32 %v6889_v15, %v6885_v30  ;;  %v6917_v38 = vshll.u32 %v6662_v47, 16  ;;  %v6922_v6 = vshrl.u32 %v6663_v39, 16  ;;  %v6925_v12 = vshll.u32 %v6663_v39, 16  ;;  %v6672_v39 = vld [vmem:[#allocation2 + $0xa8] sm:$0xf] }
 0x283   : > { %v6904_v11 = vor.u32 %v6903_v50, %v6900_v29  ;;  %8977 = vmatmul.mubr.msk.bf16.gmra.mxu0 %vm730_vm2, %v8232_v42  ;;  %v6886_v43 = vsel %vm9231_vm3, %v6881_v45, %v6885_v30  ;;  %v6913_v32 = vrot.slane %v6911_v27, 4  ;;  %v6931_v34 = vshll.u32 %v6664_v49, 16 }
 0x284   : > { %v6891_v7 = vrot.slane %v6890_v5, 4  ;;  %v6919_v22 = vrot.slane %v6917_v38, 5  ;;  %v6924_v31 = vrot.slane %v6922_v6, 4  ;;  %v6927_v60 = vrot.slane %v6925_v12, 5 }
 0x285   : > { %v6905_v10 = vrot.slane %v6904_v11, 4  ;;  %v6914_v13 = vor.u32 %v6913_v32, %v6909_v8  ;;  %v6933_v59 = vrot.slane %v6931_v34, 5  ;;  %v6935_v58 = vshrl.u32 %v6664_v49, 16  ;;  %v6673_v49 = vld [vmem:[#allocation2 + $0xac] sm:$0xf] }
 0x286   : > { %v6896_v28 = vsel %vm9231_vm3, %v6891_v7, %v6895_v4  ;;  %v6928_v24 = vor.u32 %v6927_v60, %v6924_v31  ;;  %v6941_v14 = vshll.u32 %v6665_v51, 16  ;;  %v6946_v36 = vshrl.u32 %v6666_v26, 16  ;;  %v6674_v34 = vld [vmem:[#allocation2 + $0xb0] sm:$0x1]  ;;  %v6675_v31 = vld [vmem:[#allocation2 + $0xb4] sm:$0xf] }
 0x287   : > { %v8233_v48 = vcombine.low %v6886_v43, %v6896_v28  ;;  %v6910_v52 = vsel %vm9231_vm3, %v6905_v10, %v6909_v8  ;;  %v6915_v44 = vrot.slane %v6914_v13, 4  ;;  %v6937_v3 = vrot.slane %v6935_v58, 4  ;;  %v9109_v8 = vld [vmem:[#allocation2 + $0x78] sm:$0xff]   ;;  %v9110_v43 = vld [vmem:[#allocation2 + $0x84] sm:$0xff]  }
 0x288   : > { %v6949_v54 = vshll.u32 %v6666_v26, 16  ;;  %8941 = vmatmul.mubr.msk.bf16.gmra.mxu1 %vm730_vm2, %v9107_v57  ;;  %v6929_v21 = vrot.slane %v6928_v24, 4  ;;  %v6943_v1 = vrot.slane %v6941_v14, 5  ;;  %v6955_v53 = vshll.u32 %v6667_v9, 16 }
 0x289   : > { %8980 = vmatprep.mubr.msk.bf16.mxu0 %vm730_vm2, %v8233_v48  ;;  %v6959_v35 = vshrl.u32 %v6667_v9, 16  ;;  %v6920_v61 = vsel %vm9231_vm3, %v6915_v44, %v6919_v22  ;;  %v6938_v62 = vor.u32 %v6937_v3, %v6933_v59  ;;  %8944 = vmatprep.mubr.msk.bf16.mxu1 %vm730_vm2, %v9108_v25  ;;  %v6948_v41 = vrot.slane %v6946_v36, 4  ;;  %v6677_v36 = vld [vmem:[#allocation2 + $0xbc] sm:$0x1] }
 0x28a   : > { %v6951_v37 = vrot.slane %v6949_v54, 5  ;;  %v8234_v30 = vcombine.low %v6910_v52, %v6920_v61  ;;  %v6934_v19 = vsel %vm9231_vm3, %v6929_v21, %v6933_v59  ;;  %v6957_v46 = vrot.slane %v6955_v53, 5  ;;  %v6676_v59 = vld [vmem:[#allocation2 + $0xb8] sm:$0xf]  ;;  %v5088_v21 = vld [vmem:[#allocation2 + $0xc8] sm:$0x1] }
 0x28b   : > { %v6961_v33 = vrot.slane %v6959_v35, 4  ;;  %v6939_v18 = vrot.slane %v6938_v62, 4  ;;  %v6965_v23 = vshll.u32 %v6668_v20, 16  ;;  %v6970_v55 = vshrl.u32 %v6669_v63, 16  ;;  %v6678_v61 = vld [vmem:[#allocation2 + $0xc0] sm:$0xf] }
 0x28c   : > { %v6952_v47 = vor.u32 %v6951_v37, %v6948_v41  ;;  %8981 = vmatmul.mubr.msk.bf16.gmra.mxu0 %vm730_vm2, %v8234_v30  ;;  %v6973_v15 = vshll.u32 %v6669_v63, 16  ;;  %v6979_v2 = vshll.u32 %v6670_v40, 16  ;;  %v6983_v17 = vshrl.u32 %v6670_v40, 16  ;;  %v9111_v40 = vld [vmem:[#allocation2 + $0x90] sm:$0xff]  }
 0x28d   : > { %v6962_v0 = vor.u32 %v6961_v33, %v6957_v46  ;;  %v6944_v42 = vsel %vm9231_vm3, %v6939_v18, %v6943_v1  ;;  %v6967_v29 = vrot.slane %v6965_v23, 5  ;;  %v6972_v50 = vrot.slane %v6970_v55, 4 }
 0x28e   : > { %v6953_v4 = vrot.slane %v6952_v47, 4  ;;  %v8235_v45 = vcombine.low %v6934_v19, %v6944_v42  ;;  %v6975_v27 = vrot.slane %v6973_v15, 5  ;;  %v6981_v11 = vrot.slane %v6979_v2, 5  ;;  %v6679_v19 = vld [vmem:[#allocation2 + $0xc4] sm:$0xf]  ;;  %v9112_v47 = vld [vmem:[#allocation2 + $0x9c] sm:$0xff]  }
 0x28f   : > { %v6963_v5 = vrot.slane %v6962_v0, 4  ;;  %v6985_v6 = vrot.slane %v6983_v17, 4  ;;  %v6989_v12 = vshll.u32 %v6671_v56, 16  ;;  %v6994_v7 = vshrl.u32 %v6672_v39, 16 }
 0x290   : > { %v6958_v38 = vsel %vm9231_vm3, %v6953_v4, %v6957_v46  ;;  %8984 = vmatprep.mubr.msk.bf16.mxu0 %vm730_vm2, %v8235_v45  ;;  %8945 = vmatmul.mubr.msk.bf16.gmra.mxu1 %vm730_vm2, %v9109_v8  ;;  %v6976_v51 = vor.u32 %v6975_v27, %v6972_v50  ;;  %v6997_v10 = vshll.u32 %v6672_v39, 16  ;;  %v7003_v22 = vshll.u32 %v6673_v49, 16 }
 0x291   : > { %v6968_v32 = vsel %vm9231_vm3, %v6963_v5, %v6967_v29  ;;  %v6986_v26 = vor.u32 %v6985_v6, %v6981_v11  ;;  %v6991_v28 = vrot.slane %v6989_v12, 5  ;;  %8948 = vmatprep.mubr.msk.bf16.mxu1 %vm730_vm2, %v9110_v43  ;;  %v6996_v13 = vrot.slane %v6994_v7, 4  ;;  %v9113_v12 = vld [vmem:[#allocation2 + $0xa8] sm:$0xff]  }
 0x292   : > { %v8236_v60 = vcombine.low %v6958_v38, %v6968_v32  ;;  %v6977_v58 = vrot.slane %v6976_v51, 4  ;;  %v6999_v9 = vrot.slane %v6997_v10, 5  ;;  %v7005_v48 = vrot.slane %v7003_v22, 5 }
 0x293   : > { %v7007_v52 = vshrl.u32 %v6673_v49, 16  ;;  %v6987_v57 = vrot.slane %v6986_v26, 4  ;;  %v7013_v24 = vshll.u32 %v6674_v34, 16  ;;  %v7018_v14 = vshrl.u32 %v6675_v31, 16  ;;  %v9114_v34 = vld [vmem:[#allocation2 + $0xb4] sm:$0xff]  }
 0x294   : > { %v7021_v20 = vshll.u32 %v6675_v31, 16  ;;  %8985 = vmatmul.mubr.msk.bf16.gmra.mxu0 %vm730_vm2, %v8236_v60  ;;  %v6982_v44 = vsel %vm9231_vm3, %v6977_v58, %v6981_v11  ;;  %v7000_v3 = vor.u32 %v6999_v9, %v6996_v13  ;;  %v7027_v54 = vshll.u32 %v6676_v59, 16 }
 0x295   : > { %v7009_v25 = vrot.slane %v7007_v52, 4  ;;  %v6992_v1 = vsel %vm9231_vm3, %v6987_v57, %v6991_v28  ;;  %v7015_v53 = vrot.slane %v7013_v24, 5  ;;  %v7020_v35 = vrot.slane %v7018_v14, 4 }
 0x296   : > { %v7023_v63 = vrot.slane %v7021_v20, 5  ;;  %v8237_v62 = vcombine.low %v6982_v44, %v6992_v1  ;;  %v7001_v41 = vrot.slane %v7000_v3, 4  ;;  %v7029_v30 = vrot.slane %v7027_v54, 5 }
 0x297   : > { %v7010_v37 = vor.u32 %v7009_v25, %v7005_v48  ;;  %v7031_v33 = vshrl.u32 %v6676_v59, 16  ;;  %v7037_v18 = vshll.u32 %v6677_v36, 16  ;;  %v5089_v56 = vsel %vm11496_vm10, 0, %v5088_v21  ;;  %v9115_v59 = vld [vmem:[#allocation2 + $0xc0] sm:$0xff]  }
 0x298   : > { %v7024_v46 = vor.u32 %v7023_v63, %v7020_v35  ;;  %8988 = vmatprep.mubr.msk.bf16.mxu0 %vm730_vm2, %v8237_v62  ;;  %8949 = vmatmul.mubr.msk.bf16.gmra.mxu1 %vm730_vm2, %v9111_v40  ;;  %5090 = vst [vmem:[#allocation2 + $0xc8] sm:$0x1] %v5089_v56  ;;  %v7042_v0 = vshrl.u32 %v6678_v61, 16  ;;  %v7045_v15 = vshll.u32 %v6678_v61, 16  ;;  %v7006_v2 = vsel %vm9231_vm3, %v7001_v41, %v7005_v48 }
 0x299   : > { %v7011_v55 = vrot.slane %v7010_v37, 4  ;;  %v7033_v39 = vrot.slane %v7031_v33, 4  ;;  %8952 = vmatprep.mubr.msk.bf16.mxu1 %vm730_vm2, %v9112_v47  ;;  %v7051_v42 = vshll.u32 %v6679_v19, 16  ;;  %v7055_v49 = vshrl.u32 %v6679_v19, 16 }
 0x29a   : > { %v7025_v17 = vrot.slane %v7024_v46, 4  ;;  %v7044_v29 = vrot.slane %v7042_v0, 4  ;;  %v7047_v50 = vrot.slane %v7045_v15, 5  ;;  %v7039_v8 = vrot.slane %v7037_v18, 5 }
 0x29b   : > { %v7016_v4 = vsel %vm9231_vm3, %v7011_v55, %v7015_v53  ;;  %v7034_v5 = vor.u32 %v7033_v39, %v7029_v30  ;;  %v7053_v27 = vrot.slane %v7051_v42, 5  ;;  %v7057_v38 = vrot.slane %v7055_v49, 4 }
 0x29c   : > { %v8238_v45 = vcombine.low %v7006_v2, %v7016_v4  ;;  %v7048_v11 = vor.u32 %v7047_v50, %v7044_v29  ;;  %v7030_v32 = vsel %vm9231_vm3, %v7025_v17, %v7029_v30 }
 0x29d   : > { %v7035_v6 = vrot.slane %v7034_v5, 4  ;;  %v7058_v7 = vor.u32 %v7057_v38, %v7053_v27 }
 0x29e   : > { %8989 = vmatmul.mubr.msk.bf16.gmra.mxu0 %vm730_vm2, %v8238_v45  ;;  %v7049_v43 = vrot.slane %v7048_v11, 4 }
 0x29f   : > { %v7040_v51 = vsel %vm9231_vm3, %v7035_v6, %v7039_v8  ;;  %v6680_v10 = vld [vmem:[#allocation2 + $0xc8] sm:$0x1]  ;;  %v7059_v31 = vrot.slane %v7058_v7, 4 }
 0x2a0   : > { %v8239_v22 = vcombine.low %v7030_v32, %v7040_v51  ;;  %8953 = vmatmul.mubr.msk.bf16.gmra.mxu1 %vm730_vm2, %v9113_v12  ;;  %v7061_v60 = vshll.u32 %v6680_v10, 16  ;;  %v7054_v26 = vsel %vm9231_vm3, %v7049_v43, %v7053_v27 }
 0x2a1   : > { %8956 = vmatprep.mubr.msk.bf16.mxu1 %vm730_vm2, %v9114_v34 }
 0x2a2   : > { %8992 = vmatprep.mubr.msk.bf16.mxu0 %vm730_vm2, %v8239_v22  ;;  %v7063_v28 = vrot.slane %v7061_v60, 5 }
 0x2a4   : > { %v7064_v13 = vsel %vm9231_vm3, %v7059_v31, %v7063_v28 }
 0x2a5   : > { %v8240_v58 = vcombine.low %v7054_v26, %v7064_v13 }
 0x2a7   : > { %8993 = vmatmul.mubr.msk.bf16.gmra.mxu0 %vm730_vm2, %v8240_v58 }
 0x2a8   : > { %8957 = vmatmul.mubr.msk.bf16.gmra.mxu1 %vm730_vm2, %v9115_v59 }
 0x2c9   : > { %v12414_v9 = vpop.f32.mrf.mxu0 }
 0x2cb   : > { %v12416_v48 = vpop.f32.mrf.mxu0 }
 0x2cd   : > { %v12418_v52 = vpop.f32.mrf.mxu0 }
 0x2cf   : > { %v12420_v57 = vpop.f32.mrf.mxu0 }
 0x2d7   : > { %v12422_v24 = vpop.f32.mrf.mxu0 }
 0x2d9   : > { %v12424_v14 = vpop.f32.mrf.mxu0 }
 0x2db   : > { %v12426_v20 = vpop.f32.mrf.mxu0 }
 0x2dc   : > { %v8858_v16 = vpop.f32.mrf.mxu1 }
 0x2dd   : > { %v12428_v3 = vpop.f32.mrf.mxu0 }
 0x2de   : > { %v5834_v44 = vpop.f32.mrf.mxu1 }
 0x2e0   : > { %v12430_v25 = vpop.f32.mrf.mxu1 }
 0x2e2   : > { %v12434_v54 = vpop.f32.mrf.mxu1 }
 0x2e5   : > { %v12432_v36 = vpop.f32.mrf.mxu0 }
 0x2e7   : > { %v12436_v21 = vpop.f32.mrf.mxu0 }
 0x2e9   : > { %v12440_v53 = vpop.f32.mrf.mxu0 }
 0x2eb   : > { %v12438_v1 = vpop.f32.mrf.mxu1  ;;  %v12444_v63 = vpop.f32.mrf.mxu0 }
 0x2ed   : > { %v12442_v35 = vpop.f32.mrf.mxu1 }
 0x2ef   : > { %v12446_v61 = vpop.f32.mrf.mxu1 }
 0x2f1   : > { %v12450_v41 = vpop.f32.mrf.mxu1 }
 0x2f3   : > { %v12448_v62 = vpop.f32.mrf.mxu0 }
 0x2f5   : > { %v12452_v37 = vpop.f32.mrf.mxu0 }
 0x2f7   : > { %v12456_v30 = vpop.f32.mrf.mxu0 }
 0x2f9   : > { %v12454_v40 = vpop.f32.mrf.mxu1  ;;  %v12460_v46 = vpop.f32.mrf.mxu0 }
 0x2fb   : > { %v12458_v19 = vpop.f32.mrf.mxu1 }
 0x2fd   : > { %v12462_v33 = vpop.f32.mrf.mxu1 }
 0x2ff   : > { %v12466_v47 = vpop.f32.mrf.mxu1 }
 0x301   : > { %v12464_v18 = vpop.f32.mrf.mxu0 }
 0x303   : > { %v12468_v23 = vpop.f32.mrf.mxu0 }
 0x305   : > { %v12470_v56 = vpop.f32.mrf.mxu0 }
 0x307   : > { %v12472_v55 = vpop.f32.mrf.mxu1  ;;  %v12474_v0 = vpop.f32.mrf.mxu0 }
 0x309   : > { %v12476_v15 = vpop.f32.mrf.mxu1  ;;  %v12478_v2 = vpop.f32.mrf.mxu0 }
 0x30b   : > { %v12480_v17 = vpop.f32.mrf.mxu1  ;;  %v12482_v39 = vpop.f32.mrf.mxu0 }
 0x30d   : > { %v12484_v42 = vpop.f32.mrf.mxu1  ;;  %v12486_v4 = vpop.f32.mrf.mxu0 }
 0x30f   : > { %v12488_v29 = vpop.f32.mrf.mxu1  ;;  %v12490_v50 = vpop.f32.mrf.mxu0 }
 0x311   : > { %v12492_v49 = vpop.f32.mrf.mxu1  ;;  %v12494_v45 = vpop.f32.mrf.mxu0 }
 0x312   : > { %12951 = vst [vmem:[#allocation32_spill] sm:$0xff] %v12494_v45 }
 0x313   : > { %v12496_v5 = vpop.f32.mrf.mxu1  ;;  %v12498_v8 = vpop.f32.mrf.mxu0 }
 0x314   : > { %12952 = vst [vmem:[#allocation18_spill] sm:$0xff] %v12498_v8 }
 0x315   : > { %v12500_v27 = vpop.f32.mrf.mxu1  ;;  %v12502_v11 = vpop.f32.mrf.mxu0 }
 0x316   : > { %12953 = vst [vmem:[#allocation34_spill] sm:$0xff] %v12502_v11  ;;  %v6144_v11 = vadd.f32 %v12414_v9, %v8858_v16 }
 0x317   : > { %v12504_v38 = vpop.f32.mrf.mxu1  ;;  %v12506_v6 = vpop.f32.mrf.mxu0 }
 0x318   : > { %12954 = vst [vmem:[#allocation36_spill] sm:$0xff] %v12506_v6 }
 0x319   : > { %v12508_v12 = vpop.f32.mrf.mxu1  ;;  %v12510_v43 = vpop.f32.mrf.mxu0 }
 0x31a   : > { %12955 = vst [vmem:[#allocation24_spill] sm:$0xff] %v12510_v43 }
 0x31b   : > { %v12512_v7 = vpop.f32.mrf.mxu1  ;;  %v12516_v51 = vpop.f32.mrf.mxu0 }
 0x31c   : > { %12956 = vst [vmem:[#allocation25_spill] sm:$0xff] %v12516_v51 }
 0x31d   : > { %v12514_v32 = vpop.f32.mrf.mxu1  ;;  %v12522_v22 = vpop.f32.mrf.mxu0 }
 0x31e   : > { %12958 = vst [vmem:[#allocation26_spill] sm:$0xff] %v12522_v22 }
 0x31f   : > { %v12518_v34 = vpop.f32.mrf.mxu1  ;;  %v12528_v26 = vpop.f32.mrf.mxu0 }
 0x320   : > { %12961 = vst [vmem:[#allocation17_spill] sm:$0xff] %v12528_v26 }
 0x321   : > { %v12520_v10 = vpop.f32.mrf.mxu1 }
 0x322   : > { %12957 = vst [vmem:[#allocation13_spill] sm:$0xff] %v12520_v10 }
 0x323   : > { %v12524_v31 = vpop.f32.mrf.mxu1 }
 0x324   : > { %12959 = vst [vmem:[#allocation15_spill] sm:$0xff] %v12524_v31  ;;  %v6136_v31 = vadd.f32 %v12416_v48, %v5834_v44  ;;  %v6139_v48 = vadd.f32 %v12420_v57, %v12434_v54  ;;  %v6152_v57 = vadd.f32 %v12424_v14, %v12442_v35  ;;  %v6155_v14 = vadd.f32 %v12428_v3, %v12450_v41 }
 0x325   : > { %v12526_v60 = vpop.f32.mrf.mxu1  ;;  %v6168_v3 = vadd.f32 %v12436_v21, %v12458_v19  ;;  %v6171_v21 = vadd.f32 %v12444_v63, %v12466_v47  ;;  %v6184_v63 = vadd.f32 %v12452_v37, %v12476_v15  ;;  %v6187_v37 = vadd.f32 %v12460_v46, %v12484_v42 }
 0x326   : > { %12960 = vst [vmem:[#allocation38_spill] sm:$0xff] %v12526_v60  ;;  %v6200_v46 = vadd.f32 %v12468_v23, %v12492_v49  ;;  %v6203_v23 = vadd.f32 %v12474_v0, %v12500_v27  ;;  %v6216_v0 = vadd.f32 %v12482_v39, %v12508_v12  ;;  %v6219_v39 = vadd.f32 %v12490_v50, %v12514_v32  ;;  %v12967_v50 = vld [vmem:[#allocation18_spill] sm:$0xff] }
 0x328   : > { %v12530_v28 = vpop.f32.mrf.mxu1 }
 0x329   : > { %12962 = vst [vmem:[#allocation40_spill] sm:$0xff] %v12530_v28  ;;  %v6147_v28 = vadd.f32 %v12418_v52, %v12430_v25  ;;  %v6160_v25 = vadd.f32 %v12422_v24, %v12438_v1  ;;  %v6163_v24 = vadd.f32 %v12426_v20, %v12446_v61  ;;  %v6176_v20 = vadd.f32 %v12432_v36, %v12454_v40 }
 0x32a   : > { %v8966_v13 = vpop.f32.mrf.mxu0  ;;  %v12532_v59 = vpop.f32.mrf.mxu1  ;;  %v6179_v36 = vadd.f32 %v12440_v53, %v12462_v33  ;;  %v6192_v53 = vadd.f32 %v12448_v62, %v12472_v55  ;;  %v6195_v62 = vadd.f32 %v12456_v30, %v12480_v17  ;;  %v6208_v30 = vadd.f32 %v12464_v18, %v12488_v29 }
 0x32b   : > { %12963 = vst [vmem:[#allocation27_spill] sm:$0xff] %v12532_v59  ;;  %v6211_v18 = vadd.f32 %v12470_v56, %v12496_v5  ;;  %v6224_v56 = vadd.f32 %v12478_v2, %v12504_v38  ;;  %v6227_v2 = vadd.f32 %v12486_v4, %v12512_v7 }
 0x32c   : > { %v7212_v58 = vpop.f32.mrf.mxu0  ;;  %v12534_v51 = vpop.f32.mrf.mxu1 }
 0x32e   : > { %v8967_v43 = vpop.f32.mrf.mxu0  ;;  %v12536_v6 = vpop.f32.mrf.mxu1 }
 0x32f   : > { %12964 = vst [vmem:[#allocation14_spill] sm:$0xff] %v12536_v6 }
 0x330   : > { %v7215_v22 = vpop.f32.mrf.mxu0  ;;  %v8930_v8 = vpop.f32.mrf.mxu1 }
 0x331   : > { %v6603_v60 = vadd.f32 %v8930_v8, %v6144_v11 }
 0x332   : > { %v6474_v26 = vpop.f32.mrf.mxu1 }
 0x333   : > { %v8970_v10 = vpop.f32.mrf.mxu0  ;;  %v7341_v59 = vadd.f32 %v8966_v13, %v6603_v60  ;;  %v6601_v45 = vadd.f32 %v6474_v26, %v6136_v31 }
 0x334   : > { %v8931_v9 = vpop.f32.mrf.mxu1 }
 0x335   : > { %v7373_v16 = vmax.f32 %v7341_v59, 0.0  ;;  %v7228_v44 = vpop.f32.mrf.mxu0  ;;  %v7339_v8 = vadd.f32 %v7212_v58, %v6601_v45  ;;  %v6604_v11 = vadd.f32 %v8931_v9, %v6147_v28 }
 0x336   : > { %v6477_v52 = vpop.f32.mrf.mxu1 }
 0x337   : > { %7406 = vst.msk [vmem:[%s12546_s16 + $0x10] sm:$0xff] %vm7403_vm11, %v7373_v16  ;;  %v7371_v31 = vmax.f32 %v7339_v8, 0.0  ;;  %v8971_v60 = vpop.f32.mrf.mxu0  ;;  %v7342_v26 = vadd.f32 %v8967_v43, %v6604_v11  ;;  %v6602_v13 = vadd.f32 %v6477_v52, %v6139_v48 }
 0x338   : > { %v8934_v6 = vpop.f32.mrf.mxu1 }
 0x339   : > { %7404 = vst.msk [vmem:[%s12546_s16] sm:$0xff] %vm7403_vm11, %v7371_v31  ;;  %v7374_v54 = vmax.f32 %v7342_v26, 0.0  ;;  %v7231_v45 = vpop.f32.mrf.mxu0  ;;  %v7340_v28 = vadd.f32 %v7215_v22, %v6602_v13  ;;  %v6607_v59 = vadd.f32 %v8934_v6, %v6160_v25 }
 0x33a   : > { %v6490_v58 = vpop.f32.mrf.mxu1 }
 0x33b   : > { %7407 = vst.msk [vmem:[%s12546_s16 + $0x18] sm:$0xff] %vm7403_vm11, %v7374_v54  ;;  %v7372_v1 = vmax.f32 %v7340_v28, 0.0  ;;  %v8974_v43 = vpop.f32.mrf.mxu0  ;;  %v7345_v9 = vadd.f32 %v8970_v10, %v6607_v59  ;;  %v6605_v48 = vadd.f32 %v6490_v58, %v6152_v57 }
 0x33c   : > { %v8935_v16 = vpop.f32.mrf.mxu1 }
 0x33d   : > { %7405 = vst.msk [vmem:[%s12546_s16 + $0x8] sm:$0xff] %vm7403_vm11, %v7372_v1  ;;  %v7377_v35 = vmax.f32 %v7345_v9, 0.0  ;;  %v7244_v6 = vpop.f32.mrf.mxu0  ;;  %v7343_v22 = vadd.f32 %v7228_v44, %v6605_v48  ;;  %v6608_v8 = vadd.f32 %v8935_v16, %v6163_v24 }
 0x33e   : > { %v6493_v11 = vpop.f32.mrf.mxu1 }
 0x33f   : > { %7410 = vst.msk [vmem:[%s12546_s16 + $0x30] sm:$0xff] %vm7403_vm11, %v7377_v35  ;;  %v7375_v61 = vmax.f32 %v7343_v22, 0.0  ;;  %v8975_v10 = vpop.f32.mrf.mxu0  ;;  %v7346_v52 = vadd.f32 %v8971_v60, %v6608_v8  ;;  %v6606_v25 = vadd.f32 %v6493_v11, %v6155_v14 }
 0x340   : > { %v8938_v31 = vpop.f32.mrf.mxu1 }
 0x341   : > { %7408 = vst.msk [vmem:[%s12546_s16 + $0x20] sm:$0xff] %vm7403_vm11, %v7375_v61  ;;  %v7378_v41 = vmax.f32 %v7346_v52, 0.0  ;;  %v7247_v44 = vpop.f32.mrf.mxu0  ;;  %v7344_v26 = vadd.f32 %v7231_v45, %v6606_v25  ;;  %v6611_v13 = vadd.f32 %v8938_v31, %v6176_v20 }
 0x342   : > { %v6506_v57 = vpop.f32.mrf.mxu1 }
 0x343   : > { %7411 = vst.msk [vmem:[%s12546_s16 + $0x38] sm:$0xff] %vm7403_vm11, %v7378_v41  ;;  %v7376_v40 = vmax.f32 %v7344_v26, 0.0  ;;  %v8978_v60 = vpop.f32.mrf.mxu0  ;;  %v7349_v54 = vadd.f32 %v8974_v43, %v6611_v13  ;;  %v6609_v28 = vadd.f32 %v6506_v57, %v6168_v3 }
 0x344   : > { %v8939_v59 = vpop.f32.mrf.mxu1 }
 0x345   : > { %7409 = vst.msk [vmem:[%s12546_s16 + $0x28] sm:$0xff] %vm7403_vm11, %v7376_v40  ;;  %v7381_v19 = vmax.f32 %v7349_v54, 0.0  ;;  %v7260_v45 = vpop.f32.mrf.mxu0  ;;  %v7347_v58 = vadd.f32 %v7244_v6, %v6609_v28  ;;  %v6612_v24 = vadd.f32 %v8939_v59, %v6179_v36 }
 0x346   : > { %v6509_v1 = vpop.f32.mrf.mxu1 }
 0x347   : > { %7414 = vst.msk [vmem:[%s12546_s16 + $0x50] sm:$0xff] %vm7403_vm11, %v7381_v19  ;;  %v7379_v33 = vmax.f32 %v7347_v58, 0.0  ;;  %v8979_v43 = vpop.f32.mrf.mxu0  ;;  %v7350_v9 = vadd.f32 %v8975_v10, %v6612_v24  ;;  %v6610_v48 = vadd.f32 %v6509_v1, %v6171_v21 }
 0x348   : > { %v8942_v16 = vpop.f32.mrf.mxu1 }
 0x349   : > { %7412 = vst.msk [vmem:[%s12546_s16 + $0x40] sm:$0xff] %vm7403_vm11, %v7379_v33  ;;  %v7382_v47 = vmax.f32 %v7350_v9, 0.0  ;;  %v7263_v14 = vpop.f32.mrf.mxu0  ;;  %v7348_v35 = vadd.f32 %v7247_v44, %v6610_v48  ;;  %v6615_v6 = vadd.f32 %v8942_v16, %v6192_v53 }
 0x34a   : > { %v6522_v22 = vpop.f32.mrf.mxu1 }
 0x34b   : > { %7415 = vst.msk [vmem:[%s12546_s16 + $0x58] sm:$0xff] %vm7403_vm11, %v7382_v47  ;;  %v7380_v55 = vmax.f32 %v7348_v35, 0.0  ;;  %v7353_v8 = vadd.f32 %v8978_v60, %v6615_v6  ;;  %v6613_v11 = vadd.f32 %v6522_v22, %v6184_v63 }
 0x34c   : > { %v8982_v20 = vpop.f32.mrf.mxu0  ;;  %v8943_v61 = vpop.f32.mrf.mxu1 }
 0x34d   : > { %7413 = vst.msk [vmem:[%s12546_s16 + $0x48] sm:$0xff] %vm7403_vm11, %v7380_v55  ;;  %v7385_v15 = vmax.f32 %v7353_v8, 0.0  ;;  %v7351_v10 = vadd.f32 %v7260_v45, %v6613_v11  ;;  %v6616_v52 = vadd.f32 %v8943_v61, %v6195_v62  ;;  %v12965_v55 = vld [vmem:[#allocation32_spill] sm:$0xff] }
 0x34e   : > { %v7276_v25 = vpop.f32.mrf.mxu0  ;;  %v6525_v31 = vpop.f32.mrf.mxu1  ;;  %v6240_v4 = vadd.f32 %v12965_v55, %v12518_v34  ;;  %v12968_v34 = vld [vmem:[#allocation15_spill] sm:$0xff] }
 0x34f   : > { %7418 = vst.msk [vmem:[%s12546_s16 + $0x70] sm:$0xff] %vm7403_vm11, %v7385_v15  ;;  %v7383_v17 = vmax.f32 %v7351_v10, 0.0  ;;  %v7354_v3 = vadd.f32 %v8979_v43, %v6616_v52  ;;  %v6614_v41 = vadd.f32 %v6525_v31, %v6187_v37  ;;  %v12966_v37 = vld [vmem:[#allocation13_spill] sm:$0xff] }
 0x350   : > { %v8983_v44 = vpop.f32.mrf.mxu0  ;;  %v8946_v26 = vpop.f32.mrf.mxu1  ;;  %v6232_v32 = vadd.f32 %v12967_v50, %v12966_v37 }
 0x351   : > { %7416 = vst.msk [vmem:[%s12546_s16 + $0x60] sm:$0xff] %vm7403_vm11, %v7383_v17  ;;  %v7386_v42 = vmax.f32 %v7354_v3, 0.0  ;;  %v7352_v13 = vadd.f32 %v7263_v14, %v6614_v41  ;;  %v6619_v57 = vadd.f32 %v8946_v26, %v6208_v30  ;;  %v12969_v30 = vld [vmem:[#allocation34_spill] sm:$0xff] }
 0x352   : > { %v7279_v36 = vpop.f32.mrf.mxu0  ;;  %v6538_v40 = vpop.f32.mrf.mxu1  ;;  %v6243_v17 = vadd.f32 %v12969_v30, %v12968_v34 }
 0x353   : > { %7419 = vst.msk [vmem:[%s12546_s16 + $0x78] sm:$0xff] %vm7403_vm11, %v7386_v42  ;;  %v7384_v29 = vmax.f32 %v7352_v13, 0.0  ;;  %v7357_v60 = vadd.f32 %v8982_v20, %v6619_v57  ;;  %v6617_v54 = vadd.f32 %v6538_v40, %v6200_v46  ;;  %v12970_v46 = vld [vmem:[#allocation38_spill] sm:$0xff]  ;;  %v12971_v42 = vld [vmem:[#allocation36_spill] sm:$0xff] }
 0x354   : > { %v8986_v28 = vpop.f32.mrf.mxu0  ;;  %v8947_v59 = vpop.f32.mrf.mxu1  ;;  %v6235_v13 = vadd.f32 %v12971_v42, %v12970_v46 }
 0x355   : > { %7417 = vst.msk [vmem:[%s12546_s16 + $0x68] sm:$0xff] %vm7403_vm11, %v7384_v29  ;;  %v7389_v49 = vmax.f32 %v7357_v60, 0.0  ;;  %v7355_v21 = vadd.f32 %v7276_v25, %v6617_v54  ;;  %v6620_v19 = vadd.f32 %v8947_v59, %v6211_v18  ;;  %v12972_v60 = vld [vmem:[#allocation40_spill] sm:$0xff] }
 0x356   : > { %v7292_v45 = vpop.f32.mrf.mxu0  ;;  %v6541_v58 = vpop.f32.mrf.mxu1  ;;  %v12973_v54 = vld [vmem:[#allocation24_spill] sm:$0xff] }
 0x357   : > { %7422 = vst.msk [vmem:[%s12546_s16 + $0x90] sm:$0xff] %vm7403_vm11, %v7389_v49  ;;  %v7387_v5 = vmax.f32 %v7355_v21, 0.0  ;;  %v7358_v24 = vadd.f32 %v8983_v44, %v6620_v19  ;;  %v6618_v1 = vadd.f32 %v6541_v58, %v6203_v23  ;;  %v12975_v58 = vld [vmem:[#allocation25_spill] sm:$0xff] }
 0x358   : > { %v8987_v53 = vpop.f32.mrf.mxu0  ;;  %v8950_v33 = vpop.f32.mrf.mxu1 }
 0x359   : > { %7420 = vst.msk [vmem:[%s12546_s16 + $0x80] sm:$0xff] %vm7403_vm11, %v7387_v5  ;;  %v7390_v27 = vmax.f32 %v7358_v24, 0.0  ;;  %v7356_v43 = vadd.f32 %v7279_v36, %v6618_v1  ;;  %v6623_v9 = vadd.f32 %v8950_v33, %v6224_v56 }
 0x35a   : > { %v7295_v48 = vpop.f32.mrf.mxu0  ;;  %v6554_v16 = vpop.f32.mrf.mxu1 }
 0x35b   : > { %7423 = vst.msk [vmem:[%s12546_s16 + $0x98] sm:$0xff] %vm7403_vm11, %v7390_v27  ;;  %v7388_v38 = vmax.f32 %v7356_v43, 0.0  ;;  %v7361_v63 = vadd.f32 %v8986_v28, %v6623_v9  ;;  %v6621_v47 = vadd.f32 %v6554_v16, %v6216_v0  ;;  %v6256_v28 = vadd.f32 %v12973_v54, %v12972_v60  ;;  %v12976_v0 = vld [vmem:[#allocation26_spill] sm:$0xff] }
 0x35c   : > { %v8951_v14 = vpop.f32.mrf.mxu1  ;;  %v6259_v27 = vadd.f32 %v12976_v0, %v12534_v51 }
 0x35d   : > { %7421 = vst.msk [vmem:[%s12546_s16 + $0x88] sm:$0xff] %vm7403_vm11, %v7388_v38  ;;  %v7393_v35 = vmax.f32 %v7361_v63, 0.0  ;;  %v7359_v6 = vadd.f32 %v7292_v45, %v6621_v47  ;;  %v6624_v22 = vadd.f32 %v8951_v14, %v6227_v2  ;;  %v12974_v45 = vld [vmem:[#allocation27_spill] sm:$0xff]  ;;  %v12977_v38 = vld [vmem:[#allocation14_spill] sm:$0xff]  ;;  %v12978_v63 = vld [vmem:[#allocation17_spill] sm:$0xff] }
 0x35e   : > { %v8990_v12 = vpop.f32.mrf.mxu0  ;;  %v6557_v62 = vpop.f32.mrf.mxu1  ;;  %v6248_v56 = vadd.f32 %v12975_v58, %v12974_v45  ;;  %v6251_v47 = vadd.f32 %v12978_v63, %v12977_v38 }
 0x35f   : > { %7426 = vst.msk [vmem:[%s12546_s16 + $0xb0] sm:$0xff] %vm7403_vm11, %v7393_v35  ;;  %v7391_v8 = vmax.f32 %v7359_v6, 0.0  ;;  %v7362_v11 = vadd.f32 %v8987_v53, %v6624_v22  ;;  %v6622_v20 = vadd.f32 %v6557_v62, %v6219_v39 }
 0x360   : > { %v7308_v7 = vpop.f32.mrf.mxu0  ;;  %v8954_v61 = vpop.f32.mrf.mxu1 }
 0x361   : > { %7424 = vst.msk [vmem:[%s12546_s16 + $0xa0] sm:$0xff] %vm7403_vm11, %v7391_v8  ;;  %v7394_v10 = vmax.f32 %v7362_v11, 0.0  ;;  %v7360_v52 = vadd.f32 %v7295_v48, %v6622_v20  ;;  %v6627_v25 = vadd.f32 %v8954_v61, %v6240_v4 }
 0x362   : > { %v8991_v15 = vpop.f32.mrf.mxu0  ;;  %v6570_v31 = vpop.f32.mrf.mxu1 }
 0x363   : > { %7427 = vst.msk [vmem:[%s12546_s16 + $0xb8] sm:$0xff] %vm7403_vm11, %v7394_v10  ;;  %v7392_v3 = vmax.f32 %v7360_v52, 0.0  ;;  %v7365_v41 = vadd.f32 %v8990_v12, %v6627_v25  ;;  %v6625_v44 = vadd.f32 %v6570_v31, %v6232_v32 }
 0x364   : > { %v8955_v26 = vpop.f32.mrf.mxu1  ;;  %v7311_v57 = vpop.f32.mrf.mxu0 }
 0x365   : > { %7425 = vst.msk [vmem:[%s12546_s16 + $0xa8] sm:$0xff] %vm7403_vm11, %v7392_v3  ;;  %v7397_v36 = vmax.f32 %v7365_v41, 0.0  ;;  %v7363_v40 = vadd.f32 %v7308_v7, %v6625_v44  ;;  %v6628_v18 = vadd.f32 %v8955_v26, %v6243_v17 }
 0x366   : > { %v6573_v29 = vpop.f32.mrf.mxu1 }
 0x367   : > { %7430 = vst.msk [vmem:[%s12546_s16 + $0xd0] sm:$0xff] %vm7403_vm11, %v7397_v36  ;;  %v7395_v59 = vmax.f32 %v7363_v40, 0.0  ;;  %v7366_v23 = vadd.f32 %v8991_v15, %v6628_v18  ;;  %v8994_v49 = vpop.f32.mrf.mxu0  ;;  %v6626_v21 = vadd.f32 %v6573_v29, %v6235_v13 }
 0x368   : > { %v8958_v19 = vpop.f32.mrf.mxu1 }
 0x369   : > { %7428 = vst.msk [vmem:[%s12546_s16 + $0xc0] sm:$0xff] %vm7403_vm11, %v7395_v59  ;;  %v7398_v5 = vmax.f32 %v7366_v23, 0.0  ;;  %v7364_v24 = vadd.f32 %v7311_v57, %v6626_v21  ;;  %v7324_v1 = vpop.f32.mrf.mxu0  ;;  %v6631_v53 = vadd.f32 %v8958_v19, %v6256_v28 }
 0x36a   : > { %v6586_v33 = vpop.f32.mrf.mxu1 }
 0x36b   : > { %7431 = vst.msk [vmem:[%s12546_s16 + $0xd8] sm:$0xff] %vm7403_vm11, %v7398_v5  ;;  %v7396_v43 = vmax.f32 %v7364_v24, 0.0  ;;  %v7369_v9 = vadd.f32 %v8994_v49, %v6631_v53  ;;  %v6629_v48 = vadd.f32 %v6586_v33, %v6248_v56  ;;  %v8995_v16 = vpop.f32.mrf.mxu0 }
 0x36c   : > { %v8959_v2 = vpop.f32.mrf.mxu1 }
 0x36d   : > { %7429 = vst.msk [vmem:[%s12546_s16 + $0xc8] sm:$0xff] %vm7403_vm11, %v7396_v43  ;;  %v7401_v14 = vmax.f32 %v7369_v9, 0.0  ;;  %v7367_v39 = vadd.f32 %v7324_v1, %v6629_v48  ;;  %v6632_v12 = vadd.f32 %v8959_v2, %v6259_v27  ;;  %v7327_v62 = vpop.f32.mrf.mxu0 }
 0x36e   : > { %v6589_v35 = vpop.f32.mrf.mxu1 }
 0x36f   : > { %7434 = vst.msk [vmem:[%s12546_s16 + $0xf0] sm:$0xff] %vm7403_vm11, %v7401_v14  ;;  %v7399_v51 = vmax.f32 %v7367_v39, 0.0  ;;  %v7370_v6 = vadd.f32 %v8995_v16, %v6632_v12  ;;  %v6630_v22 = vadd.f32 %v6589_v35, %v6251_v47 }
 0x371   : > { %7432 = vst.msk [vmem:[%s12546_s16 + $0xe0] sm:$0xff] %vm7403_vm11, %v7399_v51  ;;  %v7402_v55 = vmax.f32 %v7370_v6, 0.0  ;;  %v7368_v4 = vadd.f32 %v7327_v62, %v6630_v22 }
 0x373   : > { %7435 = vst.msk [vmem:[%s12546_s16 + $0xf8] sm:$0xff] %vm7403_vm11, %v7402_v55  ;;  %v7400_v7 = vmax.f32 %v7368_v4, 0.0 }
 0x375   : > { %7433 = vst.msk [vmem:[%s12546_s16 + $0xe8] sm:$0xff] %vm7403_vm11, %v7400_v7 }
 0x376 PF: > { %s15_s18 = sadd.s32 1, %s9128_s18  }
 0x377   : > { %p12_p4 = scmp.ge.s32.totalorder %s15_s18, 4  }
 0x379   :  { %14 = sbr.rel (!%p12_p4) target bundleno = 1 (0x1), region = 84 }

</bundles_post_ra>
